<compile_context>
chip_gen: v6e
topology: v6e:2x2x1
jax: 0.10.0
libtpu: 0.0.40
codegen_flags: <defaults>
</compile_context>

<pallas_src>
import functools

import jax
import jax.numpy as jnp
from jax.experimental import pallas as pl
from jax.experimental.pallas import tpu as pltpu


def critic_kernel(x_ref, wfc_ref, bfc_ref, wqkv_ref, bqkv_ref, wo_ref, bo_ref,
                  w1_ref, b1_ref, w2t_ref, b2_ref, o_ref, *, num_heads):
    bblk, n, _ = x_ref.shape
    hidden = wfc_ref.shape[1]
    head_dim = hidden // num_heads
    bf16 = jnp.bfloat16

    # fc + tanh on the flattened (bblk*n, in) activation.
    x = x_ref[...].reshape(bblk * n, x_ref.shape[2]).astype(bf16)
    h = jnp.tanh(
        jnp.dot(x, wfc_ref[...], preferred_element_type=jnp.float32)
        + bfc_ref[...])                                          # (M, H) f32

    # Fused QKV projection (scale already folded into W_q / b_q).
    qkv = (jnp.dot(h.astype(bf16), wqkv_ref[...],
                   preferred_element_type=jnp.float32)
           + bqkv_ref[...])                                      # (M, 3H) f32
    qkv = qkv.reshape(bblk, n, 3 * hidden)
    q = qkv[:, :, 0:hidden]
    k = qkv[:, :, hidden:2 * hidden]
    v = qkv[:, :, 2 * hidden:3 * hidden]

    # Multi-head attention with the output projection folded into the loop.
    attn_acc = jnp.zeros((bblk * n, hidden), jnp.float32)
    for hh in range(num_heads):
        lo = hh * head_dim
        qh = q[:, :, lo:lo + head_dim].astype(bf16)              # (b, n, hd)
        kh = k[:, :, lo:lo + head_dim].astype(bf16)
        vh = v[:, :, lo:lo + head_dim].astype(bf16)

        s = jnp.einsum('bqd,bkd->bqk', qh, kh,
                       preferred_element_type=jnp.float32)       # (b, n, n)
        s = s - jnp.max(s, axis=-1, keepdims=True)
        p = jnp.exp(s)
        p = p * pl.reciprocal(jnp.sum(p, axis=-1, keepdims=True), approx=True)

        ctx = jnp.einsum('bqk,bkd->bqd', p.astype(bf16), vh,
                         preferred_element_type=jnp.float32)     # (b, n, hd)
        ctx2 = ctx.reshape(bblk * n, head_dim).astype(bf16)
        # Row-slice of W_o (sublane dim, head_dim-aligned) -> cheap.
        attn_acc = attn_acc + jnp.dot(ctx2, wo_ref[lo:lo + head_dim, :],
                                      preferred_element_type=jnp.float32)

    attn = attn_acc + bo_ref[...]                                # (M, H)

    # critic head: Linear -> Tanh -> Linear(out_dim=1)
    c1 = jnp.tanh(
        jnp.dot(attn.astype(bf16), w1_ref[...],
                preferred_element_type=jnp.float32)
        + b1_ref[...])                                           # (M, H)

    # Final H->1 projection as VPU multiply + lane reduction; store the
    # result as a lane-dense (bblk, n) slab (no trailing dim-1 masked stores).
    out = jnp.sum(c1.reshape(bblk, n, hidden) * w2t_ref[...], axis=-1)
    o_ref[...] = out + b2_ref[...]


def prepare_params(params, num_heads):
    """Fold softmax scale into W_q/b_q, fuse QKV, cast MXU weights to bf16."""
    hidden = params["w_fc"].shape[1]
    head_dim = hidden // num_heads
    scale = 1.0 / (head_dim ** 0.5)
    bf16 = jnp.bfloat16
    w_qkv = jnp.concatenate(
        [params["w_q"] * scale, params["w_k"], params["w_v"]], axis=1)
    b_qkv = jnp.concatenate(
        [params["b_q"] * scale, params["b_k"], params["b_v"]], axis=1)
    return {
        "w_fc": params["w_fc"].astype(bf16), "b_fc": params["b_fc"],
        "w_qkv": w_qkv.astype(bf16), "b_qkv": b_qkv,
        "w_o": params["w_o"].astype(bf16), "b_o": params["b_o"],
        "w_c1": params["w_c1"].astype(bf16), "b_c1": params["b_c1"],
        "w_c2t": params["w_c2"].T.astype(jnp.float32),   # (1, H), VPU use
        "b_c2": params["b_c2"],                          # (1, 1)
    }


def centralized_critic_forward(x, params, num_heads=4, block_b=8):
    B, N, IN = x.shape
    hidden = params["w_fc"].shape[1]
    assert hidden % num_heads == 0, "hidden_dim must be divisible by num_heads"
    assert B % block_b == 0, "batch must be divisible by block_b"

    prep = prepare_params(params, num_heads)
    weight_args = [
        prep["w_fc"], prep["b_fc"],
        prep["w_qkv"], prep["b_qkv"],
        prep["w_o"], prep["b_o"],
        prep["w_c1"], prep["b_c1"],
        prep["w_c2t"], prep["b_c2"],
    ]

    in_specs = [pl.BlockSpec((block_b, N, IN), lambda b: (b, 0, 0))]
    for w in weight_args:
        # Whole weight / bias every grid step (grid-invariant index map).
        in_specs.append(pl.BlockSpec(w.shape, lambda b, nd=w.ndim: (0,) * nd))

    out_specs = pl.BlockSpec((block_b, N), lambda b: (b, 0))

    out = pl.pallas_call(
        functools.partial(critic_kernel, num_heads=num_heads),
        out_shape=jax.ShapeDtypeStruct((B, N), jnp.float32),
        grid=(B // block_b,),
        in_specs=in_specs,
        out_specs=out_specs,
        compiler_params=pltpu.CompilerParams(
            dimension_semantics=("parallel",),
            vmem_limit_bytes=48 * 1024 * 1024),
    )(x, *weight_args)
    return out[..., None]                                        # (B, N, 1)


def reference_forward(x, params, num_heads):
    """Pure-JAX f32 reference of the torch module's num_heads>0 path."""
    h = jnp.tanh(x @ params["w_fc"] + params["b_fc"])
    q = h @ params["w_q"] + params["b_q"]
    k = h @ params["w_k"] + params["b_k"]
    v = h @ params["w_v"] + params["b_v"]
    B, N, H = h.shape
    hd = H // num_heads
    qh = q.reshape(B, N, num_heads, hd).transpose(0, 2, 1, 3)
    kh = k.reshape(B, N, num_heads, hd).transpose(0, 2, 1, 3)
    vh = v.reshape(B, N, num_heads, hd).transpose(0, 2, 1, 3)
    s = jnp.einsum('bhqd,bhkd->bhqk', qh, kh) / jnp.sqrt(jnp.float32(hd))
    p = jax.nn.softmax(s, axis=-1)
    ctx = jnp.einsum('bhqk,bhkd->bhqd', p, vh)
    ctx = ctx.transpose(0, 2, 1, 3).reshape(B, N, H)
    attn = ctx @ params["w_o"] + params["b_o"]
    c1 = jnp.tanh(attn @ params["w_c1"] + params["b_c1"])
    return c1 @ params["w_c2"] + params["b_c2"]


def init_params(key, in_dim, hidden_dim):
    # Deterministic synthetic init mirroring layer_init (orthogonal weights,
    # zero biases).  Weights stored (in, out) so kernel matmuls are x @ W.
    ks = jax.random.split(key, 7)
    ortho = jax.nn.initializers.orthogonal
    sqrt2 = 2.0 ** 0.5
    f32 = jnp.float32
    return {
        "w_fc": ortho(scale=sqrt2)(ks[0], (in_dim, hidden_dim), f32),
        "b_fc": jnp.zeros((1, hidden_dim), f32),
        "w_q": ortho(scale=1.0)(ks[1], (hidden_dim, hidden_dim), f32),
        "b_q": jnp.zeros((1, hidden_dim), f32),
        "w_k": ortho(scale=1.0)(ks[2], (hidden_dim, hidden_dim), f32),
        "b_k": jnp.zeros((1, hidden_dim), f32),
        "w_v": ortho(scale=1.0)(ks[3], (hidden_dim, hidden_dim), f32),
        "b_v": jnp.zeros((1, hidden_dim), f32),
        "w_o": ortho(scale=1.0)(ks[4], (hidden_dim, hidden_dim), f32),
        "b_o": jnp.zeros((1, hidden_dim), f32),
        "w_c1": ortho(scale=sqrt2)(ks[5], (hidden_dim, hidden_dim), f32),
        "b_c1": jnp.zeros((1, hidden_dim), f32),
        "w_c2": ortho(scale=1.0)(ks[6], (hidden_dim, 1), f32),
        "b_c2": jnp.zeros((1, 1), f32),
    }


if __name__ == "__main__":
    # batch, num_agents (seq), obs features; hidden chosen lane-aligned (128)
    B, N, IN = 16, 8, 16
    HIDDEN, NUM_HEADS = 128, 4
    BLOCK_B = 8                      # 2 grid steps -> both v7x TensorCores

    key = jax.random.PRNGKey(0)
    k_param, k_x = jax.random.split(key)
    params = init_params(k_param, IN, HIDDEN)
    x = jax.random.normal(k_x, (B, N, IN), dtype=jnp.float32)

    out = centralized_critic_forward(x, params, num_heads=NUM_HEADS,
                                     block_b=BLOCK_B)
    out = jax.block_until_ready(out)

    assert out.shape == (B, N, 1) and out.dtype == jnp.float32
    assert bool(jnp.all(jnp.isfinite(out)))

    ref = reference_forward(x, params, NUM_HEADS)
    max_err = float(jnp.max(jnp.abs(out - ref)))
    assert max_err < 5e-2, f"max abs error vs f32 reference: {max_err}"

    print("KERNEL_OK")
</pallas_src>

<mosaic_0001>
module attributes {stable_mosaic.version = 11 : i64} {
  func.func @critic_kernel(%arg0: i32, %arg1: memref<8x8x16xf32, #tpu.memory_space<vmem>>, %arg2: memref<16x128xbf16, #tpu.memory_space<vmem>>, %arg3: memref<1x128xf32, #tpu.memory_space<vmem>>, %arg4: memref<128x384xbf16, #tpu.memory_space<vmem>>, %arg5: memref<1x384xf32, #tpu.memory_space<vmem>>, %arg6: memref<128x128xbf16, #tpu.memory_space<vmem>>, %arg7: memref<1x128xf32, #tpu.memory_space<vmem>>, %arg8: memref<128x128xbf16, #tpu.memory_space<vmem>>, %arg9: memref<1x128xf32, #tpu.memory_space<vmem>>, %arg10: memref<1x128xf32, #tpu.memory_space<vmem>>, %arg11: memref<1x1xf32, #tpu.memory_space<vmem>>, %arg12: memref<8x8xf32, #tpu.memory_space<vmem>>) attributes {dimension_semantics = [#tpu.dimension_semantics<parallel>], iteration_bounds = array<i64: 2>, scalar_prefetch = 0 : i64, scratch_operands = 0 : i64, tpu.core_type = #tpu.core_type<tc>, window_params = [{transform_indices = @transform_0, window_bounds = array<i64: 8, 8, 16>}, {pipeline_mode = #tpu.pipeline_mode<synchronous>, transform_indices = @transform_1, window_bounds = array<i64: 16, 128>}, {pipeline_mode = #tpu.pipeline_mode<synchronous>, transform_indices = @transform_2, window_bounds = array<i64: 1, 128>}, {pipeline_mode = #tpu.pipeline_mode<synchronous>, transform_indices = @transform_3, window_bounds = array<i64: 128, 384>}, {pipeline_mode = #tpu.pipeline_mode<synchronous>, transform_indices = @transform_4, window_bounds = array<i64: 1, 384>}, {pipeline_mode = #tpu.pipeline_mode<synchronous>, transform_indices = @transform_5, window_bounds = array<i64: 128, 128>}, {pipeline_mode = #tpu.pipeline_mode<synchronous>, transform_indices = @transform_6, window_bounds = array<i64: 1, 128>}, {pipeline_mode = #tpu.pipeline_mode<synchronous>, transform_indices = @transform_7, window_bounds = array<i64: 128, 128>}, {pipeline_mode = #tpu.pipeline_mode<synchronous>, transform_indices = @transform_8, window_bounds = array<i64: 1, 128>}, {pipeline_mode = #tpu.pipeline_mode<synchronous>, transform_indices = @transform_9, window_bounds = array<i64: 1, 128>}, {pipeline_mode = #tpu.pipeline_mode<synchronous>, transform_indices = @transform_10, window_bounds = array<i64: 1, 1>}, {transform_indices = @transform_11, window_bounds = array<i64: 8, 8>}]} {
    %c0 = arith.constant 0 : index
    %c0_0 = arith.constant 0 : index
    %c0_1 = arith.constant 0 : index
    %0 = vector.load %arg1[%c0, %c0_0, %c0_1] : memref<8x8x16xf32, #tpu.memory_space<vmem>>, vector<8x8x16xf32>
    %1 = vector.shape_cast %0 : vector<8x8x16xf32> to vector<64x16xf32>
    %2 = arith.truncf %1 : vector<64x16xf32> to vector<64x16xbf16>
    %c0_2 = arith.constant 0 : index
    %c0_3 = arith.constant 0 : index
    %3 = vector.load %arg2[%c0_2, %c0_3] : memref<16x128xbf16, #tpu.memory_space<vmem>>, vector<16x128xbf16>
    %cst = arith.constant dense<0.000000e+00> : vector<64x128xf32>
    %4 = tpu.matmul %2, %3, %cst {dimension_numbers = #tpu.dot_dimension_numbers<[1], [0], [0], [1], [0, 0, 1, 1], [], []>} : vector<64x16xbf16>, vector<16x128xbf16>, vector<64x128xf32> -> vector<64x128xf32>
    %c0_4 = arith.constant 0 : index
    %c0_5 = arith.constant 0 : index
    %5 = vector.load %arg3[%c0_4, %c0_5] : memref<1x128xf32, #tpu.memory_space<vmem>>, vector<1x128xf32>
    %6 = vector.broadcast %5 : vector<1x128xf32> to vector<64x128xf32>
    %7 = arith.addf %4, %6 : vector<64x128xf32>
    %8 = math.tanh %7 : vector<64x128xf32>
    %9 = arith.truncf %8 : vector<64x128xf32> to vector<64x128xbf16>
    %c0_6 = arith.constant 0 : index
    %c0_7 = arith.constant 0 : index
    %10 = vector.load %arg4[%c0_6, %c0_7] : memref<128x384xbf16, #tpu.memory_space<vmem>>, vector<128x384xbf16>
    %cst_8 = arith.constant dense<0.000000e+00> : vector<64x384xf32>
    %11 = tpu.matmul %9, %10, %cst_8 {dimension_numbers = #tpu.dot_dimension_numbers<[1], [0], [0], [1], [0, 0, 1, 1], [], []>} : vector<64x128xbf16>, vector<128x384xbf16>, vector<64x384xf32> -> vector<64x384xf32>
    %c0_9 = arith.constant 0 : index
    %c0_10 = arith.constant 0 : index
    %12 = vector.load %arg5[%c0_9, %c0_10] : memref<1x384xf32, #tpu.memory_space<vmem>>, vector<1x384xf32>
    %13 = vector.broadcast %12 : vector<1x384xf32> to vector<64x384xf32>
    %14 = arith.addf %11, %13 : vector<64x384xf32>
    %15 = vector.shape_cast %14 : vector<64x384xf32> to vector<8x8x384xf32>
    %16 = vector.extract_strided_slice %15 {offsets = [0, 0, 0], sizes = [8, 8, 128], strides = [1, 1, 1]} : vector<8x8x384xf32> to vector<8x8x128xf32>
    %17 = vector.extract_strided_slice %15 {offsets = [0, 0, 128], sizes = [8, 8, 128], strides = [1, 1, 1]} : vector<8x8x384xf32> to vector<8x8x128xf32>
    %18 = vector.extract_strided_slice %15 {offsets = [0, 0, 256], sizes = [8, 8, 128], strides = [1, 1, 1]} : vector<8x8x384xf32> to vector<8x8x128xf32>
    %cst_11 = arith.constant 0.000000e+00 : f32
    %19 = vector.broadcast %cst_11 : f32 to vector<64x128xf32>
    %20 = vector.extract_strided_slice %16 {offsets = [0, 0, 0], sizes = [8, 8, 32], strides = [1, 1, 1]} : vector<8x8x128xf32> to vector<8x8x32xf32>
    %21 = arith.truncf %20 : vector<8x8x32xf32> to vector<8x8x32xbf16>
    %22 = vector.extract_strided_slice %17 {offsets = [0, 0, 0], sizes = [8, 8, 32], strides = [1, 1, 1]} : vector<8x8x128xf32> to vector<8x8x32xf32>
    %23 = arith.truncf %22 : vector<8x8x32xf32> to vector<8x8x32xbf16>
    %24 = vector.extract_strided_slice %18 {offsets = [0, 0, 0], sizes = [8, 8, 32], strides = [1, 1, 1]} : vector<8x8x128xf32> to vector<8x8x32xf32>
    %25 = arith.truncf %24 : vector<8x8x32xf32> to vector<8x8x32xbf16>
    "tpu.trace_start"() <{level = 10 : i32, message = "bqd,bkd->bqk"}> : () -> ()
    %cst_12 = arith.constant dense<0.000000e+00> : vector<8x8x8xf32>
    %26 = tpu.matmul %21, %23, %cst_12 {dimension_numbers = #tpu.dot_dimension_numbers<[2], [2], [1], [1], [0, 0, 0, 1, 1, 1], [0], [0]>} : vector<8x8x32xbf16>, vector<8x8x32xbf16>, vector<8x8x8xf32> -> vector<8x8x8xf32>
    "tpu.trace_stop"() : () -> ()
    %cst_13 = arith.constant dense<0xFF800000> : vector<8x8xf32>
    %27 = vector.multi_reduction <maximumf>, %26, %cst_13 [2] : vector<8x8x8xf32> to vector<8x8xf32>
    %28 = vector.shape_cast %27 : vector<8x8xf32> to vector<8x8x1xf32>
    %29 = vector.broadcast %28 : vector<8x8x1xf32> to vector<8x8x8xf32>
    %30 = arith.subf %26, %29 : vector<8x8x8xf32>
    %31 = math.exp %30 : vector<8x8x8xf32>
    %cst_14 = arith.constant dense<0.000000e+00> : vector<8x8xf32>
    %32 = vector.multi_reduction <add>, %31, %cst_14 [2] : vector<8x8x8xf32> to vector<8x8xf32>
    %33 = vector.shape_cast %32 : vector<8x8xf32> to vector<8x8x1xf32>
    %34 = tpu.reciprocal %33 {approx = true} : vector<8x8x1xf32> -> vector<8x8x1xf32>
    %35 = vector.broadcast %34 : vector<8x8x1xf32> to vector<8x8x8xf32>
    %36 = arith.mulf %31, %35 : vector<8x8x8xf32>
    %37 = arith.truncf %36 : vector<8x8x8xf32> to vector<8x8x8xbf16>
    "tpu.trace_start"() <{level = 10 : i32, message = "bqk,bkd->bqd"}> : () -> ()
    %cst_15 = arith.constant dense<0.000000e+00> : vector<8x8x32xf32>
    %38 = tpu.matmul %37, %25, %cst_15 {dimension_numbers = #tpu.dot_dimension_numbers<[2], [1], [1], [2], [0, 0, 0, 1, 1, 2], [0], [0]>} : vector<8x8x8xbf16>, vector<8x8x32xbf16>, vector<8x8x32xf32> -> vector<8x8x32xf32>
    "tpu.trace_stop"() : () -> ()
    %39 = vector.shape_cast %38 : vector<8x8x32xf32> to vector<64x32xf32>
    %40 = arith.truncf %39 : vector<64x32xf32> to vector<64x32xbf16>
    %c0_16 = arith.constant 0 : index
    %c0_17 = arith.constant 0 : index
    %41 = vector.load %arg6[%c0_16, %c0_17] : memref<128x128xbf16, #tpu.memory_space<vmem>>, vector<32x128xbf16>
    %cst_18 = arith.constant dense<0.000000e+00> : vector<64x128xf32>
    %42 = tpu.matmul %40, %41, %cst_18 {dimension_numbers = #tpu.dot_dimension_numbers<[1], [0], [0], [1], [0, 0, 1, 1], [], []>} : vector<64x32xbf16>, vector<32x128xbf16>, vector<64x128xf32> -> vector<64x128xf32>
    %43 = arith.addf %19, %42 : vector<64x128xf32>
    %44 = vector.extract_strided_slice %16 {offsets = [0, 0, 32], sizes = [8, 8, 32], strides = [1, 1, 1]} : vector<8x8x128xf32> to vector<8x8x32xf32>
    %45 = arith.truncf %44 : vector<8x8x32xf32> to vector<8x8x32xbf16>
    %46 = vector.extract_strided_slice %17 {offsets = [0, 0, 32], sizes = [8, 8, 32], strides = [1, 1, 1]} : vector<8x8x128xf32> to vector<8x8x32xf32>
    %47 = arith.truncf %46 : vector<8x8x32xf32> to vector<8x8x32xbf16>
    %48 = vector.extract_strided_slice %18 {offsets = [0, 0, 32], sizes = [8, 8, 32], strides = [1, 1, 1]} : vector<8x8x128xf32> to vector<8x8x32xf32>
    %49 = arith.truncf %48 : vector<8x8x32xf32> to vector<8x8x32xbf16>
    "tpu.trace_start"() <{level = 10 : i32, message = "bqd,bkd->bqk"}> : () -> ()
    %cst_19 = arith.constant dense<0.000000e+00> : vector<8x8x8xf32>
    %50 = tpu.matmul %45, %47, %cst_19 {dimension_numbers = #tpu.dot_dimension_numbers<[2], [2], [1], [1], [0, 0, 0, 1, 1, 1], [0], [0]>} : vector<8x8x32xbf16>, vector<8x8x32xbf16>, vector<8x8x8xf32> -> vector<8x8x8xf32>
    "tpu.trace_stop"() : () -> ()
    %cst_20 = arith.constant dense<0xFF800000> : vector<8x8xf32>
    %51 = vector.multi_reduction <maximumf>, %50, %cst_20 [2] : vector<8x8x8xf32> to vector<8x8xf32>
    %52 = vector.shape_cast %51 : vector<8x8xf32> to vector<8x8x1xf32>
    %53 = vector.broadcast %52 : vector<8x8x1xf32> to vector<8x8x8xf32>
    %54 = arith.subf %50, %53 : vector<8x8x8xf32>
    %55 = math.exp %54 : vector<8x8x8xf32>
    %cst_21 = arith.constant dense<0.000000e+00> : vector<8x8xf32>
    %56 = vector.multi_reduction <add>, %55, %cst_21 [2] : vector<8x8x8xf32> to vector<8x8xf32>
    %57 = vector.shape_cast %56 : vector<8x8xf32> to vector<8x8x1xf32>
    %58 = tpu.reciprocal %57 {approx = true} : vector<8x8x1xf32> -> vector<8x8x1xf32>
    %59 = vector.broadcast %58 : vector<8x8x1xf32> to vector<8x8x8xf32>
    %60 = arith.mulf %55, %59 : vector<8x8x8xf32>
    %61 = arith.truncf %60 : vector<8x8x8xf32> to vector<8x8x8xbf16>
    "tpu.trace_start"() <{level = 10 : i32, message = "bqk,bkd->bqd"}> : () -> ()
    %cst_22 = arith.constant dense<0.000000e+00> : vector<8x8x32xf32>
    %62 = tpu.matmul %61, %49, %cst_22 {dimension_numbers = #tpu.dot_dimension_numbers<[2], [1], [1], [2], [0, 0, 0, 1, 1, 2], [0], [0]>} : vector<8x8x8xbf16>, vector<8x8x32xbf16>, vector<8x8x32xf32> -> vector<8x8x32xf32>
    "tpu.trace_stop"() : () -> ()
    %63 = vector.shape_cast %62 : vector<8x8x32xf32> to vector<64x32xf32>
    %64 = arith.truncf %63 : vector<64x32xf32> to vector<64x32xbf16>
    %c32 = arith.constant 32 : index
    %c0_23 = arith.constant 0 : index
    %65 = vector.load %arg6[%c32, %c0_23] : memref<128x128xbf16, #tpu.memory_space<vmem>>, vector<32x128xbf16>
    %cst_24 = arith.constant dense<0.000000e+00> : vector<64x128xf32>
    %66 = tpu.matmul %64, %65, %cst_24 {dimension_numbers = #tpu.dot_dimension_numbers<[1], [0], [0], [1], [0, 0, 1, 1], [], []>} : vector<64x32xbf16>, vector<32x128xbf16>, vector<64x128xf32> -> vector<64x128xf32>
    %67 = arith.addf %43, %66 : vector<64x128xf32>
    %68 = vector.extract_strided_slice %16 {offsets = [0, 0, 64], sizes = [8, 8, 32], strides = [1, 1, 1]} : vector<8x8x128xf32> to vector<8x8x32xf32>
    %69 = arith.truncf %68 : vector<8x8x32xf32> to vector<8x8x32xbf16>
    %70 = vector.extract_strided_slice %17 {offsets = [0, 0, 64], sizes = [8, 8, 32], strides = [1, 1, 1]} : vector<8x8x128xf32> to vector<8x8x32xf32>
    %71 = arith.truncf %70 : vector<8x8x32xf32> to vector<8x8x32xbf16>
    %72 = vector.extract_strided_slice %18 {offsets = [0, 0, 64], sizes = [8, 8, 32], strides = [1, 1, 1]} : vector<8x8x128xf32> to vector<8x8x32xf32>
    %73 = arith.truncf %72 : vector<8x8x32xf32> to vector<8x8x32xbf16>
    "tpu.trace_start"() <{level = 10 : i32, message = "bqd,bkd->bqk"}> : () -> ()
    %cst_25 = arith.constant dense<0.000000e+00> : vector<8x8x8xf32>
    %74 = tpu.matmul %69, %71, %cst_25 {dimension_numbers = #tpu.dot_dimension_numbers<[2], [2], [1], [1], [0, 0, 0, 1, 1, 1], [0], [0]>} : vector<8x8x32xbf16>, vector<8x8x32xbf16>, vector<8x8x8xf32> -> vector<8x8x8xf32>
    "tpu.trace_stop"() : () -> ()
    %cst_26 = arith.constant dense<0xFF800000> : vector<8x8xf32>
    %75 = vector.multi_reduction <maximumf>, %74, %cst_26 [2] : vector<8x8x8xf32> to vector<8x8xf32>
    %76 = vector.shape_cast %75 : vector<8x8xf32> to vector<8x8x1xf32>
    %77 = vector.broadcast %76 : vector<8x8x1xf32> to vector<8x8x8xf32>
    %78 = arith.subf %74, %77 : vector<8x8x8xf32>
    %79 = math.exp %78 : vector<8x8x8xf32>
    %cst_27 = arith.constant dense<0.000000e+00> : vector<8x8xf32>
    %80 = vector.multi_reduction <add>, %79, %cst_27 [2] : vector<8x8x8xf32> to vector<8x8xf32>
    %81 = vector.shape_cast %80 : vector<8x8xf32> to vector<8x8x1xf32>
    %82 = tpu.reciprocal %81 {approx = true} : vector<8x8x1xf32> -> vector<8x8x1xf32>
    %83 = vector.broadcast %82 : vector<8x8x1xf32> to vector<8x8x8xf32>
    %84 = arith.mulf %79, %83 : vector<8x8x8xf32>
    %85 = arith.truncf %84 : vector<8x8x8xf32> to vector<8x8x8xbf16>
    "tpu.trace_start"() <{level = 10 : i32, message = "bqk,bkd->bqd"}> : () -> ()
    %cst_28 = arith.constant dense<0.000000e+00> : vector<8x8x32xf32>
    %86 = tpu.matmul %85, %73, %cst_28 {dimension_numbers = #tpu.dot_dimension_numbers<[2], [1], [1], [2], [0, 0, 0, 1, 1, 2], [0], [0]>} : vector<8x8x8xbf16>, vector<8x8x32xbf16>, vector<8x8x32xf32> -> vector<8x8x32xf32>
    "tpu.trace_stop"() : () -> ()
    %87 = vector.shape_cast %86 : vector<8x8x32xf32> to vector<64x32xf32>
    %88 = arith.truncf %87 : vector<64x32xf32> to vector<64x32xbf16>
    %c64 = arith.constant 64 : index
    %c0_29 = arith.constant 0 : index
    %89 = vector.load %arg6[%c64, %c0_29] : memref<128x128xbf16, #tpu.memory_space<vmem>>, vector<32x128xbf16>
    %cst_30 = arith.constant dense<0.000000e+00> : vector<64x128xf32>
    %90 = tpu.matmul %88, %89, %cst_30 {dimension_numbers = #tpu.dot_dimension_numbers<[1], [0], [0], [1], [0, 0, 1, 1], [], []>} : vector<64x32xbf16>, vector<32x128xbf16>, vector<64x128xf32> -> vector<64x128xf32>
    %91 = arith.addf %67, %90 : vector<64x128xf32>
    %92 = vector.extract_strided_slice %16 {offsets = [0, 0, 96], sizes = [8, 8, 32], strides = [1, 1, 1]} : vector<8x8x128xf32> to vector<8x8x32xf32>
    %93 = arith.truncf %92 : vector<8x8x32xf32> to vector<8x8x32xbf16>
    %94 = vector.extract_strided_slice %17 {offsets = [0, 0, 96], sizes = [8, 8, 32], strides = [1, 1, 1]} : vector<8x8x128xf32> to vector<8x8x32xf32>
    %95 = arith.truncf %94 : vector<8x8x32xf32> to vector<8x8x32xbf16>
    %96 = vector.extract_strided_slice %18 {offsets = [0, 0, 96], sizes = [8, 8, 32], strides = [1, 1, 1]} : vector<8x8x128xf32> to vector<8x8x32xf32>
    %97 = arith.truncf %96 : vector<8x8x32xf32> to vector<8x8x32xbf16>
    "tpu.trace_start"() <{level = 10 : i32, message = "bqd,bkd->bqk"}> : () -> ()
    %cst_31 = arith.constant dense<0.000000e+00> : vector<8x8x8xf32>
    %98 = tpu.matmul %93, %95, %cst_31 {dimension_numbers = #tpu.dot_dimension_numbers<[2], [2], [1], [1], [0, 0, 0, 1, 1, 1], [0], [0]>} : vector<8x8x32xbf16>, vector<8x8x32xbf16>, vector<8x8x8xf32> -> vector<8x8x8xf32>
    "tpu.trace_stop"() : () -> ()
    %cst_32 = arith.constant dense<0xFF800000> : vector<8x8xf32>
    %99 = vector.multi_reduction <maximumf>, %98, %cst_32 [2] : vector<8x8x8xf32> to vector<8x8xf32>
    %100 = vector.shape_cast %99 : vector<8x8xf32> to vector<8x8x1xf32>
    %101 = vector.broadcast %100 : vector<8x8x1xf32> to vector<8x8x8xf32>
    %102 = arith.subf %98, %101 : vector<8x8x8xf32>
    %103 = math.exp %102 : vector<8x8x8xf32>
    %cst_33 = arith.constant dense<0.000000e+00> : vector<8x8xf32>
    %104 = vector.multi_reduction <add>, %103, %cst_33 [2] : vector<8x8x8xf32> to vector<8x8xf32>
    %105 = vector.shape_cast %104 : vector<8x8xf32> to vector<8x8x1xf32>
    %106 = tpu.reciprocal %105 {approx = true} : vector<8x8x1xf32> -> vector<8x8x1xf32>
    %107 = vector.broadcast %106 : vector<8x8x1xf32> to vector<8x8x8xf32>
    %108 = arith.mulf %103, %107 : vector<8x8x8xf32>
    %109 = arith.truncf %108 : vector<8x8x8xf32> to vector<8x8x8xbf16>
    "tpu.trace_start"() <{level = 10 : i32, message = "bqk,bkd->bqd"}> : () -> ()
    %cst_34 = arith.constant dense<0.000000e+00> : vector<8x8x32xf32>
    %110 = tpu.matmul %109, %97, %cst_34 {dimension_numbers = #tpu.dot_dimension_numbers<[2], [1], [1], [2], [0, 0, 0, 1, 1, 2], [0], [0]>} : vector<8x8x8xbf16>, vector<8x8x32xbf16>, vector<8x8x32xf32> -> vector<8x8x32xf32>
    "tpu.trace_stop"() : () -> ()
    %111 = vector.shape_cast %110 : vector<8x8x32xf32> to vector<64x32xf32>
    %112 = arith.truncf %111 : vector<64x32xf32> to vector<64x32xbf16>
    %c96 = arith.constant 96 : index
    %c0_35 = arith.constant 0 : index
    %113 = vector.load %arg6[%c96, %c0_35] : memref<128x128xbf16, #tpu.memory_space<vmem>>, vector<32x128xbf16>
    %cst_36 = arith.constant dense<0.000000e+00> : vector<64x128xf32>
    %114 = tpu.matmul %112, %113, %cst_36 {dimension_numbers = #tpu.dot_dimension_numbers<[1], [0], [0], [1], [0, 0, 1, 1], [], []>} : vector<64x32xbf16>, vector<32x128xbf16>, vector<64x128xf32> -> vector<64x128xf32>
    %115 = arith.addf %91, %114 : vector<64x128xf32>
    %c0_37 = arith.constant 0 : index
    %c0_38 = arith.constant 0 : index
    %116 = vector.load %arg7[%c0_37, %c0_38] : memref<1x128xf32, #tpu.memory_space<vmem>>, vector<1x128xf32>
    %117 = vector.broadcast %116 : vector<1x128xf32> to vector<64x128xf32>
    %118 = arith.addf %115, %117 : vector<64x128xf32>
    %119 = arith.truncf %118 : vector<64x128xf32> to vector<64x128xbf16>
    %c0_39 = arith.constant 0 : index
    %c0_40 = arith.constant 0 : index
    %120 = vector.load %arg8[%c0_39, %c0_40] : memref<128x128xbf16, #tpu.memory_space<vmem>>, vector<128x128xbf16>
    %cst_41 = arith.constant dense<0.000000e+00> : vector<64x128xf32>
    %121 = tpu.matmul %119, %120, %cst_41 {dimension_numbers = #tpu.dot_dimension_numbers<[1], [0], [0], [1], [0, 0, 1, 1], [], []>} : vector<64x128xbf16>, vector<128x128xbf16>, vector<64x128xf32> -> vector<64x128xf32>
    %c0_42 = arith.constant 0 : index
    %c0_43 = arith.constant 0 : index
    %122 = vector.load %arg9[%c0_42, %c0_43] : memref<1x128xf32, #tpu.memory_space<vmem>>, vector<1x128xf32>
    %123 = vector.broadcast %122 : vector<1x128xf32> to vector<64x128xf32>
    %124 = arith.addf %121, %123 : vector<64x128xf32>
    %125 = math.tanh %124 : vector<64x128xf32>
    %126 = vector.shape_cast %125 : vector<64x128xf32> to vector<8x8x128xf32>
    %c0_44 = arith.constant 0 : index
    %c0_45 = arith.constant 0 : index
    %127 = vector.load %arg10[%c0_44, %c0_45] : memref<1x128xf32, #tpu.memory_space<vmem>>, vector<1x128xf32>
    %128 = vector.shape_cast %127 : vector<1x128xf32> to vector<1x1x128xf32>
    %129 = vector.broadcast %128 : vector<1x1x128xf32> to vector<8x8x128xf32>
    %130 = arith.mulf %126, %129 : vector<8x8x128xf32>
    %cst_46 = arith.constant dense<0.000000e+00> : vector<8x8xf32>
    %131 = vector.multi_reduction <add>, %130, %cst_46 [2] : vector<8x8x128xf32> to vector<8x8xf32>
    %c0_47 = arith.constant 0 : index
    %c0_48 = arith.constant 0 : index
    %132 = vector.load %arg11[%c0_47, %c0_48] : memref<1x1xf32, #tpu.memory_space<vmem>>, vector<1x1xf32>
    %133 = vector.broadcast %132 : vector<1x1xf32> to vector<8x8xf32>
    %134 = arith.addf %131, %133 : vector<8x8xf32>
    %c0_49 = arith.constant 0 : index
    %c0_50 = arith.constant 0 : index
    %135 = vector.load %arg12[%c0_49, %c0_50] : memref<8x8xf32, #tpu.memory_space<vmem>>, vector<8x8xf32>
    tpu.vector_store %arg12[%c0_49, %c0_50], %134 {strides = array<i32>} : memref<8x8xf32, #tpu.memory_space<vmem>>, vector<8x8xf32>,
    return
  }
  func.func @transform_0(%arg0: i32) -> (i32, i32, i32) {
    %c0_i32 = arith.constant 0 : i32
    %c0_i32_0 = arith.constant 0 : i32
    %c0_i32_1 = arith.constant 0 : i32
    return %arg0, %c0_i32, %c0_i32_0 : i32, i32, i32
  }
  func.func @transform_1(%arg0: i32) -> (i32, i32) {
    %c0_i32 = arith.constant 0 : i32
    %c0_i32_0 = arith.constant 0 : i32
    %c0_i32_1 = arith.constant 0 : i32
    return %c0_i32, %c0_i32_0 : i32, i32
  }
  func.func @transform_2(%arg0: i32) -> (i32, i32) {
    %c0_i32 = arith.constant 0 : i32
    %c0_i32_0 = arith.constant 0 : i32
    %c0_i32_1 = arith.constant 0 : i32
    return %c0_i32, %c0_i32_0 : i32, i32
  }
  func.func @transform_3(%arg0: i32) -> (i32, i32) {
    %c0_i32 = arith.constant 0 : i32
    %c0_i32_0 = arith.constant 0 : i32
    %c0_i32_1 = arith.constant 0 : i32
    return %c0_i32, %c0_i32_0 : i32, i32
  }
  func.func @transform_4(%arg0: i32) -> (i32, i32) {
    %c0_i32 = arith.constant 0 : i32
    %c0_i32_0 = arith.constant 0 : i32
    %c0_i32_1 = arith.constant 0 : i32
    return %c0_i32, %c0_i32_0 : i32, i32
  }
  func.func @transform_5(%arg0: i32) -> (i32, i32) {
    %c0_i32 = arith.constant 0 : i32
    %c0_i32_0 = arith.constant 0 : i32
    %c0_i32_1 = arith.constant 0 : i32
    return %c0_i32, %c0_i32_0 : i32, i32
  }
  func.func @transform_6(%arg0: i32) -> (i32, i32) {
    %c0_i32 = arith.constant 0 : i32
    %c0_i32_0 = arith.constant 0 : i32
    %c0_i32_1 = arith.constant 0 : i32
    return %c0_i32, %c0_i32_0 : i32, i32
  }
  func.func @transform_7(%arg0: i32) -> (i32, i32) {
    %c0_i32 = arith.constant 0 : i32
    %c0_i32_0 = arith.constant 0 : i32
    %c0_i32_1 = arith.constant 0 : i32
    return %c0_i32, %c0_i32_0 : i32, i32
  }
  func.func @transform_8(%arg0: i32) -> (i32, i32) {
    %c0_i32 = arith.constant 0 : i32
    %c0_i32_0 = arith.constant 0 : i32
    %c0_i32_1 = arith.constant 0 : i32
    return %c0_i32, %c0_i32_0 : i32, i32
  }
  func.func @transform_9(%arg0: i32) -> (i32, i32) {
    %c0_i32 = arith.constant 0 : i32
    %c0_i32_0 = arith.constant 0 : i32
    %c0_i32_1 = arith.constant 0 : i32
    return %c0_i32, %c0_i32_0 : i32, i32
  }
  func.func @transform_10(%arg0: i32) -> (i32, i32) {
    %c0_i32 = arith.constant 0 : i32
    %c0_i32_0 = arith.constant 0 : i32
    %c0_i32_1 = arith.constant 0 : i32
    return %c0_i32, %c0_i32_0 : i32, i32
  }
  func.func @transform_11(%arg0: i32) -> (i32, i32) {
    %c0_i32 = arith.constant 0 : i32
    %c0_i32_0 = arith.constant 0 : i32
    return %arg0, %c0_i32 : i32, i32
  }
}

</mosaic_0001>

<bundles_post_ra>
// kernel: tpu_custom_call.1
= control target key start
LH: loop header
LB: loop body
LE: loop exit
PB: predicated region body
PF: predicated region fallthrough
CT: control target
= control target key end

     0   :  { %s7714_s0 = inlined_call_operand.hbm [shape: f32[16,8,16], index: 0, kind: input, shape index: {}]   ;;  %s7715_s1 = inlined_call_operand.hbm [shape: bf16[16,128], index: 1, kind: input, shape index: {}]   ;;  %s7716_s2 = inlined_call_operand.vmem [shape: f32[1,128], index: 2, kind: input, shape index: {}]   ;;  %s7717_s3 = inlined_call_operand.hbm [shape: bf16[128,384], index: 3, kind: input, shape index: {}]   ;;  %s7718_s4 = inlined_call_operand.vmem [shape: f32[1,384], index: 4, kind: input, shape index: {}]   ;;  %s7719_s5 = inlined_call_operand.hbm [shape: bf16[128,128], index: 5, kind: input, shape index: {}]   ;;  %s7720_s6 = inlined_call_operand.vmem [shape: f32[1,128], index: 6, kind: input, shape index: {}]   ;;  %s7721_s7 = inlined_call_operand.hbm [shape: bf16[128,128], index: 7, kind: input, shape index: {}]   ;;  %s7722_s8 = inlined_call_operand.vmem [shape: f32[1,128], index: 8, kind: input, shape index: {}]   ;;  %s7723_s9 = inlined_call_operand.vmem [shape: f32[1,128], index: 9, kind: input, shape index: {}]   ;;  %s7724_s10 = inlined_call_operand.<no memory space> [shape: f32[1,1], index: 10, kind: input, shape index: {}]   ;;  %s7725_s11 = inlined_call_operand.vmem [shape: f32[16,8], index: 11, kind: output, shape index: {}]  }
   0x1   :  { %v16_v0 = vstv %s7724_s10 }
   0x2   :  { %17 = vst [vmem:[#allocation2] sm:$0x1] %v16_v0 }
   0x3   :  { %18 = vsyncpa [#allocation4], 0 }
   0x4   :  { %20 = vsyncpa [#allocation4 + $0x1], 0 }
   0x5   :  { %21 = vsyncpa [#allocation6], 0 }
   0x6   :  { %22 = vsyncpa [#allocation9], 0  ;;  %s6578_s19 = smov 0   ;;  %s6580_s20 = smov 0  }
   0x7   :  { %s6582_s21 = smov 0   ;;  %s6584_s22 = smov 0  }
   0x8 LB: > { %s6597_s10 = sadd.s32 4294967295, %s6496_s22   ;;  %p48_p0 = scmp.ne.s32.totalorder %s6488_s20, %s6484_s19  ;;  %s6496_s22 = sphi %s6584_s22, %s7742_s22   ;;  %s6492_s21 = sphi %s6582_s21, %s7741_s21   ;;  %s6488_s20 = sphi %s6580_s20, %s7740_s20   ;;  %s6484_s19 = sphi %s6578_s19, %s7739_s19  }
   0x9   : > { %p7726_p1 = scmp.eq.s32.totalorder %s6597_s10, 0  ;;  %p5200_p2 = scmp.ge.s32.totalorder %s6496_s22, 1 }
   0xa   : > { %p295_p3 = scmp.lt.s32.totalorder %s6496_s22, 3  ;;  %s6498_s25 = smov [#allocation5]  }
   0xb   : > { %p6605_p4 = por %p7726_p1, %p48_p0  ;;  %s307_s26 = sshll.u32 %s6498_s25, 4  ;;  %s308_s26 = int_to_ptr.vmem [resolvable:$true] %s307_s26 }
   0xc   : > { %p6609_p5 = pnand %p5200_p2, %p295_p3  ;;  %s6499_s28 = smov [#allocation8]  }
   0xd   : > { %s7729_s23 = scalar_select %p6605_p4, 1, 0 }
   0xe   : > { %s7730_s24 = scalar_select %p6609_p5, 1, 0 }
   0xf   : > { %p6038_p6 = pneg %p6609_p5  ;;  %s339_s29 = sshll.u32 %s6499_s28, 4  ;;  %s340_s29 = int_to_ptr.vmem [resolvable:$true] %s339_s29 }
  0x10   : > { %s6500_s30 = smov [#allocation7]   ;;  %s6333_s13 = scalar_lea.vmem %s308_s26, 128 }
  0x11   : > { %p6617_p7 = pnand %p6038_p6, %p7726_p1  ;;  %s323_s12 = sshll.u32 %s6500_s30, 4  ;;  %s324_s12 = int_to_ptr.vmem [resolvable:$true] %s323_s12 }
  0x12   : > { %p6334_p9 = scmp.ne.s32.totalorder %s308_s26, %s6333_s13  ;;  %p6341_p12 = scmp.lt.s32.totalorder %s308_s26, %s308_s26 }
  0x13   : > { %p6324_p8 = pneg %p6617_p7  ;;  %p6342_p13 = scmp.lt.s32.totalorder %s6333_s13, %s6333_s13 }
  0x15   : > { %p6336_p10 = pnand %p6334_p9, %p6324_p8  ;;  %p6343_p0 = por %p6342_p13, %p6341_p12 }
  0x17   : > { %p6337_p11 = pneg %p6336_p10 }
  0x19   : > { %p6344_p2 = pnand %p6343_p0, %p6337_p11 }
  0x1b   : > { %6347 = shalt.err (!%p6344_p2)
}
  0x1c   : > { %s6501_s14 = smov 64   ;;  %s6502_s15 = smov 4  }
  0x1d   : > { %6041 = dma.hbm_to_vmem [thread:$0]  (!%p6617_p7), %s7715_s1, 128, %s308_s26, [#allocation6], %s6501_s14, %s6501_s14, %s6502_s15  }
  0x1e   : > { %s6359_s18 = scalar_lea.vmem %s340_s29, 1024  ;;  %p6367_p10 = scmp.lt.s32.totalorder %s340_s29, %s340_s29 }
  0x1f   : > { %p6360_p3 = scmp.ne.s32.totalorder %s340_s29, %s6359_s18  ;;  %p6368_p11 = scmp.lt.s32.totalorder %s6359_s18, %s6359_s18 }
  0x21   : > { %p6362_p6 = pnand %p6360_p3, %p6324_p8  ;;  %p6369_p12 = por %p6368_p11, %p6367_p10 }
  0x23   : > { %p6363_p9 = pneg %p6362_p6 }
  0x25   : > { %p6370_p13 = pnand %p6369_p12, %p6363_p9 }
  0x27   : > { %6373 = shalt.err (!%p6370_p13)
}
  0x28   : > { %6047 = dma.hbm_to_vmem [thread:$0]  (!%p6617_p7), %s7719_s5, 1024, %s340_s29, [#allocation9], %s6501_s14, %s6501_s14, %s6502_s15  }
  0x29   : > { %s6385_s26 = scalar_lea.vmem %s324_s12, 3072  ;;  %p6393_p6 = scmp.lt.s32.totalorder %s324_s12, %s324_s12 }
  0x2a   : > { %p6386_p0 = scmp.ne.s32.totalorder %s324_s12, %s6385_s26  ;;  %p6394_p9 = scmp.lt.s32.totalorder %s6385_s26, %s6385_s26 }
  0x2c   : > { %p6388_p2 = pnand %p6386_p0, %p6324_p8  ;;  %p6395_p10 = por %p6394_p9, %p6393_p6 }
  0x2e   : > { %p6389_p3 = pneg %p6388_p2 }
  0x30   : > { %p6396_p11 = pnand %p6395_p10, %p6389_p3 }
  0x32   : > { %6399 = shalt.err (!%p6396_p11)
}
  0x33   : > { %s6503_s28 = smov 192   ;;  %s6504_s30 = smov 12  }
  0x34   : > { %6044 = dma.hbm_to_vmem [thread:$0]  (!%p6617_p7), %s7717_s3, 3072, %s324_s12, [#allocation6], %s6503_s28, %s6503_s28, %s6504_s30  }
  0x35   : > { %s6505_s29 = smov [#allocation10]  }
  0x36   : > { %s355_s17 = sshll.u32 %s6505_s29, 4  ;;  %s356_s17 = int_to_ptr.vmem [resolvable:$true] %s355_s17 }
  0x37   : > { %s6411_s18 = scalar_lea.vmem %s356_s17, 1024  ;;  %p6419_p2 = scmp.lt.s32.totalorder %s356_s17, %s356_s17 }
  0x38   : > { %p6412_p12 = scmp.ne.s32.totalorder %s356_s17, %s6411_s18  ;;  %p6420_p3 = scmp.lt.s32.totalorder %s6411_s18, %s6411_s18 }
  0x3a   : > { %p6414_p13 = pnand %p6412_p12, %p6324_p8  ;;  %p6421_p6 = por %p6420_p3, %p6419_p2 }
  0x3c   : > { %p6415_p0 = pneg %p6414_p13 }
  0x3e   : > { %p6422_p9 = pnand %p6421_p6, %p6415_p0 }
  0x40   : > { %6425 = shalt.err (!%p6422_p9)
}
  0x41   : > { %6050 = dma.hbm_to_vmem [thread:$0]  (!%p6617_p7), %s7721_s7, 1024, %s356_s17, [#allocation9], %s6501_s14, %s6501_s14, %s6502_s15  }
  0x42   : > { %s6665_s25 = sadd.s32 1, %s6496_s22   ;;  %s35_s27 = sadd.s32 1, %s6492_s21 }
  0x43   : > { %s32_s26 = ssub.s32 %s6496_s22, %s6665_s25  ;;  %p42_p8 = scmp.ne.s32.totalorder %s6492_s21, %s6488_s20 }
  0x44   : > { %p33_p10 = scmp.eq.s32.totalorder %s32_s26, 0  ;;  %p43_p11 = scmp.eq.s32.totalorder %s6496_s22, 0 }
  0x45   : > { %p6059_p12 = scmp.lt.s32.totalorder %s6496_s22, 2  ;;  %s378_s28 = sand.u32 1, %s6492_s21  }
  0x46   : > { %s6676_s30 = scalar_select %p33_p10, %s6492_s21, %s35_s27  }
  0x47   : > { %p44_p13 = por %p43_p11, %p42_p8  ;;  %s5206_s13 = sshll.u32 %s378_s28, 6 }
  0x48   : > { %s5348_s16 = sshll.u32 %s6496_s22, 10  ;;  %s382_s14 = scalar_lea.vmem [#allocation3], %s5206_s13 }
  0x49   : > { %s6682_s12 = scalar_lea.hbm %s7714_s0, %s5348_s16  ;;  %s389_s15 = sshll.u32 %s382_s14, 4  ;;  %s6688_s15 = int_to_ptr.vmem [resolvable:$true] %s389_s15 }
  0x4a   : > { %p6684_p7 = pnand %p6059_p12, %p44_p13  ;;  %s6690_s19 = scalar_lea.sflag [#allocation4], %s378_s28 }
  0x4b   : > { %s6426_s22 = scalar_lea.hbm %s6682_s12, 1024  ;;  %s6431_s13 = scalar_lea.hbm %s7714_s0, 2048 }
  0x4c   : > { %p6427_p0 = scmp.ne.s32.totalorder %s6682_s12, %s6426_s22  ;;  %p6428_p2 = pneg %p6684_p7 }
  0x4d   : > { %p6432_p9 = scmp.lt.s32.totalorder %s6682_s12, %s7714_s0  ;;  %p6433_p8 = scmp.lt.s32.totalorder %s6431_s13, %s6426_s22 }
  0x4e   : > { %p6429_p3 = pnand %p6428_p2, %p6427_p0 }
  0x4f   : > { %p6434_p10 = por %p6433_p8, %p6432_p9 }
  0x50   : > { %p6430_p6 = pneg %p6429_p3 }
  0x52   : > { %p6435_p11 = pnand %p6434_p10, %p6430_p6 }
  0x54   : > { %6438 = shalt.err (!%p6435_p11)
}
  0x55   : > { %s6439_s28 = scalar_lea.vmem %s6688_s15, 1024  ;;  %s6506_s18 = smov [#allocation3]  }
  0x56   : > { %p6440_p12 = scmp.ne.s32.totalorder %s6688_s15, %s6439_s28  ;;  %s6444_s14 = sshll.u32 %s6506_s18, 4  ;;  %s6445_s14 = int_to_ptr.vmem [resolvable:$false] %s6444_s14 }
  0x57   : > { %s6446_s27 = scalar_lea.vmem %s6445_s14, 2048  ;;  %p6447_p3 = scmp.lt.s32.totalorder %s6688_s15, %s6445_s14 }
  0x58   : > { %p6442_p13 = pnand %p6440_p12, %p6428_p2  ;;  %p6448_p1 = scmp.lt.s32.totalorder %s6446_s27, %s6439_s28 }
  0x5a   : > { %p6443_p0 = pneg %p6442_p13  ;;  %p6449_p4 = por %p6448_p1, %p6447_p3 }
  0x5c   : > { %p6450_p5 = pnand %p6449_p4, %p6443_p0 }
  0x5e   : > { %6453 = shalt.err (!%p6450_p5)
}
  0x5f   : > { %s6507_s22 = smov 128   ;;  %s6508_s26 = smov 8  }
  0x60   : > { %6054 = dma.hbm_to_vmem [thread:$0]  (!%p6684_p7), %s6682_s12, 1024, %s6688_s15, %s6690_s19, %s6507_s22, %s6507_s22, %s6508_s26  }
  0x61   : > { %p7733_p2 = scmp.ne.s32.totalorder %s7730_s24, 0 }
  0x62   : > { %s403_s13 = sand.u32 (!%p7733_p2), 1, %s6488_s20   ;;  %p7734_p1 = scmp.ne.s32.totalorder (!%p7733_p2), %s7729_s23, 0 }
  0x63   : > { %401 = sbr.rel (%p7733_p2) target bundleno = 4041 (0xfc9), region = 64  ;;  %s5210_s16 = sshll.u32 (!%p7733_p2), %s403_s13, 6 }
  0x64   : > { %s404_s29 = scalar_lea.sflag (!%p7733_p2), [#allocation4], %s403_s13  ;;  %s407_s28 = scalar_lea.vmem (!%p7733_p2), [#allocation3], %s5210_s16 }
  0x68   : > { %6471 = dma.done.wait (%p7734_p1), %s404_s29, 1024  }
  0x69   : > { %6473 = vsyncadd (%p7734_p1), %s404_s29, 4294966272  ;;  %p7735_p4 = scmp.eq.s32.totalorder %s6597_s10, 0 }
  0x6b   : > { %6475 = dma.done.wait (%p7735_p4), [#allocation6], 3200   ;;  %p7736_p5 = pmov %p7735_p4 }
  0x6c   : > { %p7737_p7 = pmov %p7735_p4 }
  0x6d   : > { %6477 = vsyncadd (%p7736_p5), [#allocation6], 4294964096 }
  0x6e   : > { %6479 = dma.done.wait (%p7737_p7), [#allocation9], 2048   ;;  %p7738_p6 = pmov %p7735_p4 }
  0x6f   : > { %v6113_v1 = vld [vmem:[#allocation5] sm:$0xff]   ;;  %v468_v3 = vld [vmem:[%s407_s28 + $0x8] sm:$0xff]  ;;  %vm494_vm0 = vcmask 130048   ;;  %v469_v4 = vld [vmem:[%s407_s28 + $0x10] sm:$0xff]  ;;  %v6509_v30 = vmov 0   ;;  %vm6511_vm1 = vmmov 0  }
  0x70   : > { %6481 = vsyncadd (%p7738_p6), [#allocation9], 4294965248  ;;  %v467_v2 = vld [vmem:[%s407_s28] sm:$0xff]  ;;  %5530 = vmatprep.subr.bf16.mxu0 %v6113_v1  ;;  %v470_v6 = vld [vmem:[%s407_s28 + $0x18] sm:$0xff]  ;;  %793 = vmatprep.mubr.bf16.mxu1 %v6509_v30  ;;  %vm923_vm2 = vcmask 261120   ;;  %vm1392_vm3 = vcmask 1043456  }
  0x71   : > { %v475_v5 = vpack.c.bf16 %v468_v3, %v467_v2  ;;  %v471_v7 = vld [vmem:[%s407_s28 + $0x20] sm:$0xff]  ;;  %v472_v8 = vld [vmem:[%s407_s28 + $0x28] sm:$0xff]  ;;  %5531 = vmatpush3.bf16.msra.mxu0 %v6113_v1  ;;  %v476_v9 = vpack.c.bf16 %v470_v6, %v469_v4  ;;  %v6116_v12 = vld [vmem:[#allocation7 + $0xa8] ss:$12 sps:$4 sm:$0xff]   ;;  %6112 = vset.pattern.permute.xlu0 %v6509_v30  ;;  %v6510_v4 = vmov 0.0   ;;  %vm1292_vm4 = vcmask 64512  }
  0x72   : > { %v477_v10 = vpack.c.bf16 %v472_v8, %v471_v7  ;;  %v6114_v11 = vld [vmem:[#allocation7 + $0xac] ss:$12 sps:$4 sm:$0xff]   ;;  %v474_v14 = vld [vmem:[%s407_s28 + $0x38] sm:$0xff]  ;;  %v6120_v18 = vld [vmem:[#allocation7 + $0x7c] ss:$12 sps:$4 sm:$0xff]   ;;  %5564 = vmatprep.subr.bf16.mxu0 %v6510_v4  ;;  %s6512_s17 = smov 96  }
  0x73   : > { %5532 = vmatprep.mubr.msk.bf16.mxu0 %vm494_vm0, %v475_v5  ;;  %v473_v13 = vld [vmem:[%s407_s28 + $0x30] sm:$0xff]  ;;  %v6117_v15 = vld [vmem:[#allocation7 + $0x94] ss:$12 sps:$4 sm:$0xff]   ;;  %761 = vmatprep.subr.bf16.mxu1 %v6114_v11  ;;  %v6119_v16 = vld [vmem:[#allocation7 + $0x90] ss:$12 sps:$4 sm:$0xff]   ;;  %v618_v5 = vlaneseq  ;;  %s6513_s19 = smov 64  }
  0x74   : > { %5533 = vmatmul.mubr.msk.bf16.vlgmr.msra.gmra.mxu0 %vm494_vm0, %v476_v9  ;;  %762 = vmatpush1.bf16.msra.mxu1 %v6116_v12  ;;  %v478_v17 = vpack.c.bf16 %v474_v14, %v473_v13  ;;  %v6122_v19 = vld [vmem:[#allocation7 + $0x78] ss:$12 sps:$4 sm:$0xff]   ;;  %v6125_v21 = vld [vmem:[#allocation7 + $0x60] ss:$12 sps:$4 sm:$0xff]   ;;  %v6128_v23 = vld [vmem:[#allocation7 + $0x48] ss:$12 sps:$4 sm:$0xff]  }
  0x75   : > { %5536 = vmatprep.mubr.msk.bf16.mxu0 %vm494_vm0, %v477_v10  ;;  %763 = vmatprep.subr.bf16.mxu1 %v6117_v15  ;;  %v6123_v20 = vld [vmem:[#allocation7 + $0x64] ss:$12 sps:$4 sm:$0xff]   ;;  %v6126_v22 = vld [vmem:[#allocation7 + $0x4c] ss:$12 sps:$4 sm:$0xff]   ;;  %v6129_v24 = vld [vmem:[#allocation7 + $0x34] ss:$12 sps:$4 sm:$0xff]  }
  0x76   : > { %v6131_v25 = vld [vmem:[#allocation7 + $0x30] ss:$12 sps:$4 sm:$0xff]   ;;  %v6134_v27 = vld [vmem:[#allocation7 + $0x18] ss:$12 sps:$4 sm:$0xff]   ;;  %v6137_v29 = vld [vmem:[#allocation7] ss:$12 sps:$4 sm:$0xff]  }
  0x77   : > { %v6132_v26 = vld [vmem:[#allocation7 + $0x1c] ss:$12 sps:$4 sm:$0xff]   ;;  %v6135_v28 = vld [vmem:[#allocation7 + $0x4] ss:$12 sps:$4 sm:$0xff]   ;;  %v5216_v34 = vld [vmem:[%s7716_s2] ss:$0 sm:$0xff] }
  0x78   : > { %764 = vmatpush1.bf16.msra.mxu1 %v6119_v16  ;;  %v6138_v31 = vld [vmem:[#allocation7 + $0xb0] ss:$12 sps:$4 sm:$0xff]   ;;  %v6139_v50 = vld [vmem:[#allocation7 + $0x98] ss:$12 sps:$4 sm:$0xff]   ;;  %v6140_v53 = vld [vmem:[#allocation7 + $0x80] ss:$12 sps:$4 sm:$0xff]  }
  0x79   : > { %765 = vmatprep.subr.bf16.mxu1 %v6120_v18  ;;  %v6141_v57 = vld [vmem:[#allocation7 + $0x68] ss:$12 sps:$4 sm:$0xff]   ;;  %v6142_v59 = vld [vmem:[#allocation7 + $0x50] ss:$12 sps:$4 sm:$0xff]   ;;  %v6143_v62 = vld [vmem:[#allocation7 + $0x38] ss:$12 sps:$4 sm:$0xff]  }
  0x7a   : > { %v6144_v0 = vld [vmem:[#allocation7 + $0x20] ss:$12 sps:$4 sm:$0xff]   ;;  %v6145_v3 = vld [vmem:[#allocation7 + $0x8] ss:$12 sps:$4 sm:$0xff]   ;;  %v6740_v6 = vshrl.u32 %v618_v5, 7  ;;  %s6514_s18 = smov 32  }
  0x7b   : > { %v6746_v8 = vld [vmem:[%s7718_s4] sm:$0x7]  ;;  %p462_p9 = scmp.lt.s32.totalorder %s6597_s10, 1  ;;  %vm5080_vm5 = vcmask 1041409   ;;  %vm5082_vm6 = vcmask 1042434   ;;  %vm5084_vm7 = vcmask 1043459  }
  0x7c   : > { %5537 = vmatmul.mubr.msk.bf16.gmra.mxu0 %vm494_vm0, %v478_v17  ;;  %766 = vmatpush1.bf16.msra.mxu1 %v6122_v19  ;;  %v624_v7 = vsub.s32 1, %v6740_v6  ;;  %v620_v11 = vsub.s32 0, %v6740_v6  ;;  %vm5086_vm8 = vcmask 1044484   ;;  %vm5088_vm9 = vcmask 1045509  }
  0x7d   : > { %767 = vmatprep.subr.bf16.mxu1 %v6123_v20  ;;  %5566 = vmatprep.mubr.msk.bf16.mxu0 %vm6511_vm1, %v6510_v4  ;;  %s7744_s10 = smov (!%p462_p9, %s6597_s10), 1  ;;  %vm5090_vm10 = vcmask 1046534   ;;  %vm5092_vm11 = vcmask 1047559  }
  0x7e   : > { %v6749_v9 = vrot.slane %v6746_v8, %v624_v7  ;;  %v6754_v15 = vrot.slane %v6746_v8, %v620_v11  ;;  %s5215_s29 = sshll.u32 %s7744_s10, 3 }
  0x7f   : > { %s465_s24 = scalar_lea.vmem %s7725_s11, %s5215_s29 }
  0x80   : > { %768 = vmatpush1.bf16.msra.mxu1 %v6125_v21 }
  0x81   : > { %769 = vmatprep.subr.bf16.mxu1 %v6126_v22 }
  0x84   : > { %770 = vmatpush1.bf16.msra.mxu1 %v6128_v23 }
  0x85   : > { %771 = vmatprep.subr.bf16.mxu1 %v6129_v24 }
  0x88   : > { %772 = vmatpush1.bf16.msra.mxu1 %v6131_v25 }
  0x89   : > { %773 = vmatprep.subr.bf16.mxu1 %v6132_v26 }
  0x8c   : > { %774 = vmatpush1.bf16.msra.mxu1 %v6134_v27 }
  0x8d   : > { %775 = vmatprep.subr.bf16.mxu1 %v6135_v28 }
  0x90   : > { %776 = vmatpush1.bf16.msra.mxu1 %v6137_v29 }
  0x91   : > { %5540 = vmatprep.subr.bf16.mxu1 %v6138_v31 }
 0x134   : > { %v5534_v32 = vpop.f32.mrf.mxu0 }
 0x135   : > { %v550_v43 = vadd.f32 %v5534_v32, %v5216_v34 }
 0x136   : > { %v541_v33 = vpop.f32.mrf.mxu0 }
 0x137   : > { %v542_v35 = vadd.f32 %v5216_v34, %v541_v33 }
 0x138   : > { %v5535_v36 = vpop.f32.mrf.mxu0 }
 0x139   : > { %6162 = vtanh.f32 %v542_v35  ;;  %v553_v41 = vadd.f32 %v5535_v36, %v5216_v34 }
 0x13a   : > { %v544_v37 = vpop.f32.mrf.mxu0 }
 0x13b   : > { %v545_v38 = vadd.f32 %v5216_v34, %v544_v37 }
 0x13c   : > { %v5538_v39 = vpop.f32.mrf.mxu0 }
 0x13d   : > { %6164 = vtanh.f32 %v545_v38  ;;  %v566_v51 = vadd.f32 %v5538_v39, %v5216_v34 }
 0x13e   : > { %v557_v40 = vpop.f32.mrf.mxu0  ;;  %6166 = vtanh.f32 %v553_v41 }
 0x13f   : > { %6168 = vtanh.f32 %v550_v43  ;;  %v558_v45 = vadd.f32 %v5216_v34, %v557_v40 }
 0x140   : > { %v5539_v42 = vpop.f32.mrf.mxu0 }
 0x141   : > { %6170 = vtanh.f32 %v558_v45  ;;  %v569_v52 = vadd.f32 %v5539_v42, %v5216_v34 }
 0x142   : > { %v560_v44 = vpop.f32.mrf.mxu0 }
 0x143   : > { %v561_v46 = vadd.f32 %v5216_v34, %v560_v44 }
 0x145   : > { %6172 = vtanh.f32 %v561_v46 }
 0x146   : > { %v6163_v47 = vpop.eup %6162  ;;  %6174 = vtanh.f32 %v566_v51 }
 0x147   : > { %6176 = vtanh.f32 %v569_v52 }
 0x14a   : > { %v6165_v48 = vpop.eup %6164 }
 0x14b   : > { %v580_v49 = vpack.c.bf16 %v6165_v48, %v6163_v47  ;;  %v6167_v54 = vpop.eup %6166 }
 0x14c   : > { %v6169_v55 = vpop.eup %6168 }
 0x14d   : > { %794 = vmatmul.mubr.bf16.vlgmr.msra.gmra.mxu1 %v580_v49  ;;  %v581_v56 = vpack.c.bf16 %v6167_v54, %v6169_v55 }
 0x14e   : > { %5541 = vmatpush3.bf16.msra.mxu1 %v6138_v31  ;;  %803 = vmatprep.mubr.bf16.mxu1 %v6509_v30  ;;  %v6171_v58 = vpop.eup %6170 }
 0x14f   : > { %5542 = vmatprep.subr.bf16.mxu1 %v6139_v50 }
 0x152   : > { %5543 = vmatpush3.bf16.msra.mxu1 %v6139_v50  ;;  %v6173_v60 = vpop.eup %6172 }
 0x153   : > { %5544 = vmatprep.subr.bf16.mxu1 %v6140_v53  ;;  %v582_v61 = vpack.c.bf16 %v6173_v60, %v6171_v58  ;;  %v6175_v63 = vpop.eup %6174 }
 0x154   : > { %v6177_v1 = vpop.eup %6176 }
 0x155   : > { %804 = vmatmul.mubr.bf16.gmra.mxu1 %v581_v56  ;;  %v583_v2 = vpack.c.bf16 %v6177_v1, %v6175_v63 }
 0x156   : > { %5545 = vmatpush3.bf16.msra.mxu1 %v6140_v53  ;;  %813 = vmatprep.mubr.bf16.mxu1 %v6509_v30 }
 0x157   : > { %5546 = vmatprep.subr.bf16.mxu1 %v6141_v57 }
 0x15a   : > { %5547 = vmatpush3.bf16.msra.mxu1 %v6141_v57 }
 0x15b   : > { %5548 = vmatprep.subr.bf16.mxu1 %v6142_v59 }
 0x15d   : > { %814 = vmatmul.mubr.bf16.gmra.mxu1 %v582_v61 }
 0x15e   : > { %5549 = vmatpush3.bf16.msra.mxu1 %v6142_v59  ;;  %823 = vmatprep.mubr.bf16.mxu1 %v6509_v30 }
 0x15f   : > { %5550 = vmatprep.subr.bf16.mxu1 %v6143_v62 }
 0x162   : > { %5551 = vmatpush3.bf16.msra.mxu1 %v6143_v62 }
 0x163   : > { %5552 = vmatprep.subr.bf16.mxu1 %v6144_v0 }
 0x165   : > { %824 = vmatmul.mubr.bf16.gmra.mxu1 %v583_v2 }
 0x166   : > { %5553 = vmatpush3.bf16.msra.mxu1 %v6144_v0  ;;  %5556 = vmatprep.mubr.bf16.mxu1 %v580_v49  ;;  %v628_v49 = vsub.s32 2, %v6740_v6 }
 0x167   : > { %5554 = vmatprep.subr.bf16.mxu1 %v6145_v3 }
 0x168   : > { %v6820_v57 = vrot.slane %v6746_v8, %v628_v49 }
 0x16a   : > { %5555 = vmatpush3.bf16.msra.mxu1 %v6145_v3 }
 0x16b   : > { %5576 = vmatprep.subr.bf16.mxu1 %v6510_v4 }
 0x16d   : > { %5557 = vmatmul.mubr.bf16.vlgmr.msra.gmra.mxu1 %v581_v56 }
 0x16e   : > { %5560 = vmatprep.mubr.bf16.mxu1 %v582_v61 }
 0x175   : > { %5561 = vmatmul.mubr.bf16.gmra.mxu1 %v583_v2 }
 0x176   : > { %5578 = vmatprep.mubr.msk.bf16.mxu1 %vm6511_vm1, %v6510_v4 }
 0x20d   : > { %v795_v10 = vpop.f32.mrf.mxu1 }
 0x20e   : > { %v796_v21 = vadd.f32 %v795_v10, %v6754_v15 }
 0x20f   : > { %v797_v12 = vpop.f32.mrf.mxu1 }
 0x210   : > { %v798_v13 = vadd.f32 %v797_v12, %v6749_v9  ;;  %v6766_v26 = vpack.c.bf16 %v796_v21, %v796_v21 }
 0x211   : > { %v799_v14 = vpop.f32.mrf.mxu1 }
 0x212   : > { %v6756_v16 = vpack.c.bf16 %v798_v13, %v798_v13  ;;  %v800_v33 = vadd.f32 %v799_v14, %v6754_v15 }
 0x213   : > { %v801_v17 = vpop.f32.mrf.mxu1 }
 0x214   : > { %v802_v18 = vadd.f32 %v801_v17, %v6749_v9  ;;  %v928_v19 = vsel %vm923_vm2, %v6756_v16, 0  ;;  %v6786_v39 = vpack.c.bf16 %v800_v33, %v800_v33 }
 0x215   : > { %v805_v20 = vpop.f32.mrf.mxu1  ;;  %5565 = vmatpush3.bf16.xpose.msra.mxu0 %v928_v19 }
 0x216   : > { %5570 = vmatprep.subr.bf16.mxu0 %v6510_v4  ;;  %v6763_v23 = vpack.c.bf16 %v802_v18, %v802_v18  ;;  %v806_v34 = vadd.f32 %v805_v20, %v6754_v15 }
 0x217   : > { %v807_v22 = vpop.f32.mrf.mxu1 }
 0x218   : > { %v808_v24 = vadd.f32 %v807_v22, %v6749_v9  ;;  %v974_v30 = vsel %vm923_vm2, %v6763_v23, 0  ;;  %v6788_v40 = vpack.c.bf16 %v806_v34, %v806_v34 }
 0x219   : > { %v809_v25 = vpop.f32.mrf.mxu1 }
 0x21a   : > { %v6768_v27 = vpack.c.bf16 %v808_v24, %v808_v24  ;;  %v810_v47 = vadd.f32 %v809_v25, %v6754_v15 }
 0x21b   : > { %v811_v28 = vpop.f32.mrf.mxu1 }
 0x21c   : > { %v812_v29 = vadd.f32 %v811_v28, %v6749_v9  ;;  %5567 = vmatmul.mubr.msk.bf16.vlgmr.msra.gmra.mxu0 %vm923_vm2, %v6766_v26  ;;  %v1020_v31 = vsel %vm923_vm2, %v6768_v27, 0  ;;  %v6813_v54 = vpack.c.bf16 %v810_v47, %v810_v47 }
 0x21d   : > { %v815_v32 = vpop.f32.mrf.mxu1  ;;  %5571 = vmatpush3.bf16.xpose.msra.mxu0 %v974_v30  ;;  %5577 = vmatpush3.bf16.xpose.msra.mxu1 %v1020_v31 }
 0x21e   : > { %5572 = vmatprep.mubr.msk.bf16.mxu0 %vm6511_vm1, %v6510_v4  ;;  %5582 = vmatprep.subr.bf16.mxu0 %v6510_v4  ;;  %v6783_v36 = vpack.c.bf16 %v812_v29, %v812_v29  ;;  %v816_v48 = vadd.f32 %v815_v32, %v6754_v15 }
 0x21f   : > { %v817_v35 = vpop.f32.mrf.mxu1  ;;  %5588 = vmatprep.subr.bf16.mxu1 %v6510_v4 }
 0x220   : > { %v818_v37 = vadd.f32 %v817_v35, %v6749_v9  ;;  %v1066_v44 = vsel %vm923_vm2, %v6783_v36, 0  ;;  %v6815_v55 = vpack.c.bf16 %v816_v48, %v816_v48 }
 0x221   : > { %v819_v38 = vpop.f32.mrf.mxu1 }
 0x222   : > { %v6790_v41 = vpack.c.bf16 %v818_v37, %v818_v37  ;;  %v820_v63 = vadd.f32 %v819_v38, %v6754_v15 }
 0x223   : > { %v821_v42 = vpop.f32.mrf.mxu1 }
 0x224   : > { %v822_v43 = vadd.f32 %v821_v42, %v6749_v9  ;;  %5573 = vmatmul.mubr.msk.bf16.vlgmr.msra.gmra.mxu0 %vm923_vm2, %v6786_v39  ;;  %5579 = vmatmul.mubr.msk.bf16.vlgmr.msra.gmra.mxu1 %vm923_vm2, %v6788_v40  ;;  %v1112_v45 = vsel %vm923_vm2, %v6790_v41, 0 }
 0x225   : > { %v825_v46 = vpop.f32.mrf.mxu1  ;;  %5583 = vmatpush3.bf16.xpose.msra.mxu0 %v1066_v44  ;;  %5589 = vmatpush3.bf16.xpose.msra.mxu1 %v1112_v45 }
 0x226   : > { %5584 = vmatprep.mubr.msk.bf16.mxu0 %vm6511_vm1, %v6510_v4  ;;  %5590 = vmatprep.mubr.msk.bf16.mxu1 %vm6511_vm1, %v6510_v4  ;;  %v6810_v51 = vpack.c.bf16 %v822_v43, %v822_v43  ;;  %v826_v0 = vadd.f32 %v825_v46, %v6754_v15 }
 0x227   : > { %v827_v50 = vpop.f32.mrf.mxu1  ;;  %5594 = vmatprep.subr.bf16.mxu0 %v6510_v4  ;;  %5600 = vmatprep.subr.bf16.mxu1 %v6510_v4 }
 0x228   : > { %v828_v52 = vadd.f32 %v827_v50, %v6749_v9  ;;  %v1158_v60 = vsel %vm923_vm2, %v6810_v51, 0  ;;  %v6847_v10 = vpack.c.bf16 %v826_v0, %v826_v0 }
 0x229   : > { %v829_v53 = vpop.f32.mrf.mxu1 }
 0x22a   : > { %v6817_v56 = vpack.c.bf16 %v828_v52, %v828_v52  ;;  %v830_v20 = vadd.f32 %v829_v53, %v6754_v15 }
 0x22b   : > { %v831_v58 = vpop.f32.mrf.mxu1 }
 0x22c   : > { %v832_v59 = vadd.f32 %v831_v58, %v6749_v9  ;;  %5585 = vmatmul.mubr.msk.bf16.vlgmr.msra.gmra.mxu0 %vm923_vm2, %v6813_v54  ;;  %5591 = vmatmul.mubr.msk.bf16.vlgmr.msra.gmra.mxu1 %vm923_vm2, %v6815_v55  ;;  %v1204_v61 = vsel %vm923_vm2, %v6817_v56, 0  ;;  %v6845_v9 = vpack.c.bf16 %v820_v63, %v820_v63  ;;  %v6878_v28 = vpack.c.bf16 %v830_v20, %v830_v20 }
 0x22d   : > { %v5558_v62 = vpop.f32.mrf.mxu1  ;;  %5595 = vmatpush3.bf16.xpose.msra.mxu0 %v1158_v60  ;;  %5601 = vmatpush3.bf16.xpose.msra.mxu1 %v1204_v61 }
 0x22e   : > { %v6834_v1 = vadd.f32 %v5558_v62, %v6820_v57  ;;  %5596 = vmatprep.mubr.msk.bf16.mxu0 %vm6511_vm1, %v6510_v4  ;;  %5602 = vmatprep.mubr.msk.bf16.mxu1 %vm6511_vm1, %v6510_v4  ;;  %v6842_v3 = vpack.c.bf16 %v832_v59, %v832_v59 }
 0x22f   : > { %v868_v2 = vpop.f32.mrf.mxu1  ;;  %5606 = vmatprep.subr.bf16.mxu0 %v6510_v4  ;;  %5612 = vmatprep.subr.bf16.mxu1 %v6510_v4 }
 0x230   : > { %v869_v7 = vadd.f32 %v868_v2, %v6820_v57  ;;  %v1250_v17 = vsel %vm923_vm2, %v6842_v3, 0 }
 0x231   : > { %v5559_v8 = vpop.f32.mrf.mxu1 }
 0x232   : > { %v6849_v11 = vpack.c.bf16 %v869_v7, %v869_v7  ;;  %v6852_v12 = vadd.f32 %v5559_v8, %v6820_v57 }
 0x233   : > { %v871_v13 = vpop.f32.mrf.mxu1 }
 0x234   : > { %v872_v14 = vadd.f32 %v871_v13, %v6820_v57  ;;  %5597 = vmatmul.mubr.msk.bf16.vlgmr.msra.gmra.mxu0 %vm923_vm2, %v6845_v9  ;;  %5603 = vmatmul.mubr.msk.bf16.vlgmr.msra.gmra.mxu1 %vm923_vm2, %v6847_v10  ;;  %v1394_v18 = vsel %vm1392_vm3, %v6849_v11, 0 }
 0x235   : > { %v5562_v19 = vpop.f32.mrf.mxu1  ;;  %5607 = vmatpush3.bf16.xpose.msra.mxu0 %v1250_v17  ;;  %5613 = vmatpush3.bf16.msra.mxu1 %v1394_v18 }
 0x236   : > { %v6865_v21 = vadd.f32 %v5562_v19, %v6820_v57  ;;  %5608 = vmatprep.mubr.msk.bf16.mxu0 %vm6511_vm1, %v6510_v4  ;;  %5618 = vmatprep.subr.bf16.mxu0 %v6510_v4  ;;  %v6873_v24 = vpack.c.bf16 %v872_v14, %v872_v14 }
 0x237   : > { %v884_v22 = vpop.f32.mrf.mxu1  ;;  %5614 = vmatprep.mubr.msk.bf16.mxu1 %vm6511_vm1, %v6510_v4  ;;  %5624 = vmatprep.subr.bf16.mxu1 %v6510_v4 }
 0x238   : > { %v6876_v25 = vadd.f32 %v884_v22, %v6820_v57  ;;  %v1440_v30 = vsel %vm1392_vm3, %v6873_v24, 0 }
 0x239   : > { %v5563_v15 = vpop.f32.mrf.mxu1 }
 0x23a   : > { %v6881_v29 = vadd.f32 %v5563_v15, %v6820_v57 }
 0x23b   : > { %v6891_v35 = vpop.f32.mrf.mxu1 }
 0x23c   : > { %5609 = vmatmul.mubr.msk.bf16.vlgmr.msra.gmra.mxu0 %vm923_vm2, %v6878_v28 }
 0x23d   : > { %5619 = vmatpush3.bf16.msra.mxu0 %v1440_v30  ;;  %5620 = vmatprep.mubr.msk.bf16.mxu0 %vm6511_vm1, %v6510_v4 }
 0x23e   : > { %5630 = vmatprep.subr.bf16.mxu0 %v6510_v4 }
 0x2dc   : > { %v964_v31 = vpop.f32.mrf.mxu0 }
 0x2dd   : > { %v1293_v32 = vsel %vm1292_vm4, %v964_v31, -inf }
 0x2de   : > { %1294 = vmax.xlane.f32.xlu0 %v1293_v32  ;;  %v5568_v33 = vpop.f32.mrf.mxu0 }
 0x2e0   : > { %v967_v34 = vpop.f32.mrf.mxu0 }
 0x2e2   : > { %v5569_v37 = vpop.f32.mrf.mxu0 }
 0x2e4   : > { %v1010_v38 = vpop.f32.mrf.mxu0  ;;  %v1056_v42 = vpop.f32.mrf.mxu1 }
 0x2e5   : > { %v1299_v43 = vsel %vm1292_vm4, %v1056_v42, -inf  ;;  %v1296_v44 = vsel %vm1292_vm4, %v1010_v38, -inf }
 0x2e6   : > { %1300 = vmax.xlane.f32.xlu1 %v1299_v43  ;;  %v5580_v45 = vpop.f32.mrf.mxu1  ;;  %1297 = vmax.xlane.f32.xlu0 %v1296_v44  ;;  %v5574_v46 = vpop.f32.mrf.mxu0 }
 0x2e8   : > { %v1013_v47 = vpop.f32.mrf.mxu0  ;;  %v1059_v48 = vpop.f32.mrf.mxu1 }
 0x2ea   : > { %v5575_v49 = vpop.f32.mrf.mxu0  ;;  %v5581_v50 = vpop.f32.mrf.mxu1 }
 0x2ec   : > { %v1102_v52 = vpop.f32.mrf.mxu0  ;;  %v1148_v53 = vpop.f32.mrf.mxu1 }
 0x2ed   : > { %v1305_v58 = vsel %vm1292_vm4, %v1148_v53, -inf  ;;  %v1302_v59 = vsel %vm1292_vm4, %v1102_v52, -inf }
 0x2ee   : > { %v5592_v60 = vpop.f32.mrf.mxu1  ;;  %1306 = vmax.xlane.f32.xlu0 %v1305_v58  ;;  %1303 = vmax.xlane.f32.xlu1 %v1302_v59  ;;  %v5586_v61 = vpop.f32.mrf.mxu0 }
 0x2f0   : > { %v1105_v62 = vpop.f32.mrf.mxu0  ;;  %v1151_v63 = vpop.f32.mrf.mxu1 }
 0x2f2   : > { %v5587_v0 = vpop.f32.mrf.mxu0  ;;  %v5593_v2 = vpop.f32.mrf.mxu1 }
 0x2f4   : > { %v1194_v7 = vpop.f32.mrf.mxu0  ;;  %v1240_v8 = vpop.f32.mrf.mxu1 }
 0x2f5   : > { %v1311_v13 = vsel %vm1292_vm4, %v1240_v8, -inf  ;;  %v1308_v14 = vsel %vm1292_vm4, %v1194_v7, -inf }
 0x2f6   : > { %v5604_v17 = vpop.f32.mrf.mxu1  ;;  %1312 = vmax.xlane.f32.xlu0 %v1311_v13  ;;  %1309 = vmax.xlane.f32.xlu1 %v1308_v14  ;;  %v5598_v18 = vpop.f32.mrf.mxu0 }
 0x2f8   : > { %v1197_v19 = vpop.f32.mrf.mxu0  ;;  %v1243_v20 = vpop.f32.mrf.mxu1 }
 0x2fa   : > { %v5599_v22 = vpop.f32.mrf.mxu0  ;;  %v5605_v15 = vpop.f32.mrf.mxu1 }
 0x2fc   : > { %v6899_v30 = vpop.f32.mrf.mxu0 }
 0x2fd   : > { %v1314_v32 = vsel %vm1292_vm4, %v6899_v30, -inf }
 0x2fe   : > { %1315 = vmax.xlane.f32.xlu1 %v1314_v32  ;;  %v5610_v33 = vpop.f32.mrf.mxu0 }
 0x300   : > { %v1289_v34 = vpop.f32.mrf.mxu0 }
 0x302   : > { %v5611_v37 = vpop.f32.mrf.mxu0 }
 0x367   : > { %v1295_v43 = vpop.xlane.xlu0 %1294 }
 0x368   : > { %v1317_v44 = vsub.f32 %v964_v31, %v1295_v43 }
 0x36a   : > { %v1325_v45 = vmul.f32 1.442695, %v1317_v44 }
 0x36c   : > { %6178 = vpow2.f32 %v1325_v45 }
 0x36f   : > { %v1301_v46 = vpop.xlane.xlu1 %1300  ;;  %v1298_v47 = vpop.xlane.xlu0 %1297 }
 0x370   : > { %v1319_v48 = vsub.f32 %v1056_v42, %v1301_v46  ;;  %v1318_v49 = vsub.f32 %v1010_v38, %v1298_v47 }
 0x372   : > { %v1329_v50 = vmul.f32 1.442695, %v1319_v48  ;;  %v1327_v58 = vmul.f32 1.442695, %v1318_v49 }
 0x374   : > { %6180 = vpow2.f32 %v1329_v50 }
 0x375   : > { %6182 = vpow2.f32 %v1327_v58  ;;  %v6970_v58 = vpack.c.bf16 %v6834_v1, %v6834_v1 }
 0x377   : > { %v1307_v59 = vpop.xlane.xlu0 %1306  ;;  %v1304_v60 = vpop.xlane.xlu1 %1303 }
 0x378   : > { %v1321_v61 = vsub.f32 %v1148_v53, %v1307_v59  ;;  %v1320_v62 = vsub.f32 %v1102_v52, %v1304_v60 }
 0x379   : > { %v6903_v63 = vpop.eup %6178 }
 0x37a   : > { %v1333_v0 = vmul.f32 1.442695, %v1321_v61  ;;  %v1331_v2 = vmul.f32 1.442695, %v1320_v62  ;;  %v1341_v31 = vsel %vm1292_vm4, %v6903_v63, 0.0 }
 0x37b   : > { %1342 = vadd.xlane.f32.xlu0 %v1341_v31 }
 0x37c   : > { %6184 = vpow2.f32 %v1333_v0  ;;  %v1486_v0 = vsel %vm1392_vm3, %v6970_v58, 0 }
 0x37d   : > { %6186 = vpow2.f32 %v1331_v2 }
 0x37f   : > { %v1313_v42 = vpop.xlane.xlu0 %1312  ;;  %v1310_v38 = vpop.xlane.xlu1 %1309 }
 0x380   : > { %v1323_v13 = vsub.f32 %v1240_v8, %v1313_v42  ;;  %v1322_v14 = vsub.f32 %v1194_v7, %v1310_v38  ;;  %v6986_v42 = vpack.c.bf16 %v6852_v12, %v6852_v12 }
 0x381   : > { %v6907_v17 = vpop.eup %6180 }
 0x382   : > { %v6909_v18 = vpop.eup %6182  ;;  %v1337_v53 = vmul.f32 1.442695, %v1323_v13  ;;  %v1335_v52 = vmul.f32 1.442695, %v1322_v14  ;;  %v1347_v19 = vsel %vm1292_vm4, %v6907_v17, 0.0  ;;  %v1532_v12 = vsel %vm1392_vm3, %v6986_v42, 0 }
 0x383   : > { %1348 = vadd.xlane.f32.xlu0 %v1347_v19  ;;  %v1344_v20 = vsel %vm1292_vm4, %v6909_v18, 0.0 }
 0x384   : > { %6188 = vpow2.f32 %v1337_v53  ;;  %1345 = vadd.xlane.f32.xlu1 %v1344_v20 }
 0x385   : > { %6190 = vpow2.f32 %v1335_v52 }
 0x387   : > { %v1316_v43 = vpop.xlane.xlu1 %1315 }
 0x388   : > { %v1324_v44 = vsub.f32 %v6899_v30, %v1316_v43 }
 0x389   : > { %v6915_v22 = vpop.eup %6184 }
 0x38a   : > { %v6917_v8 = vpop.eup %6186  ;;  %v1353_v7 = vsel %vm1292_vm4, %v6915_v22, 0.0  ;;  %v1339_v45 = vmul.f32 1.442695, %v1324_v44 }
 0x38b   : > { %1354 = vadd.xlane.f32.xlu0 %v1353_v7  ;;  %v1350_v15 = vsel %vm1292_vm4, %v6917_v8, 0.0 }
 0x38c   : > { %1351 = vadd.xlane.f32.xlu1 %v1350_v15  ;;  %6192 = vpow2.f32 %v1339_v45  ;;  %v7026_v45 = vpack.c.bf16 %v6881_v29, %v6881_v29 }
 0x391   : > { %v6923_v32 = vpop.eup %6188 }
 0x392   : > { %v6925_v33 = vpop.eup %6190  ;;  %v1359_v34 = vsel %vm1292_vm4, %v6923_v32, 0.0 }
 0x393   : > { %1360 = vadd.xlane.f32.xlu0 %v1359_v34  ;;  %v1356_v37 = vsel %vm1292_vm4, %v6925_v33, 0.0 }
 0x394   : > { %1357 = vadd.xlane.f32.xlu1 %v1356_v37 }
 0x399   : > { %v6950_v46 = vpop.eup %6192 }
 0x39a   : > { %v1362_v47 = vsel %vm1292_vm4, %v6950_v46, 0.0 }
 0x3a5   : > { %1822 = vrot.lane.b32.xlu1 %v6763_v23, %s6512_s17 }
 0x3a9   : > { %1767 = vrot.lane.b32.xlu1 %v6766_v26, %s6512_s17  ;;  %1770 = vrot.lane.b32.xlu0 %v6756_v16, %s6512_s17 }
 0x3ad   : > { %1874 = vrot.lane.b32.xlu0 %v6768_v27, %s6512_s17 }
 0x3b1   : > { %1871 = vrot.lane.b32.xlu0 %v6788_v40, %s6512_s17 }
 0x3b5   : > { %1978 = vrot.lane.b32.xlu0 %v6790_v41, %s6512_s17 }
 0x3b9   : > { %1975 = vrot.lane.b32.xlu0 %v6815_v55, %s6512_s17 }
 0x3bd   : > { %2082 = vrot.lane.b32.xlu0 %v6817_v56, %s6512_s17 }
 0x3c1   : > { %2079 = vrot.lane.b32.xlu0 %v6847_v10, %s6512_s17 }
 0x3cd   : > { %1363 = vadd.xlane.f32.xlu1 %v1362_v47 }
 0x3de   : > { %1819 = vrot.lane.b32.xlu1 %v6786_v39, %s6512_s17 }
 0x3e2   : > { %1926 = vrot.lane.b32.xlu1 %v6783_v36, %s6512_s17 }
 0x3e6   : > { %1923 = vrot.lane.b32.xlu1 %v6813_v54, %s6512_s17 }
 0x3ea   : > { %2030 = vrot.lane.b32.xlu1 %v6810_v51, %s6512_s17 }
 0x3ee   : > { %2027 = vrot.lane.b32.xlu1 %v6845_v9, %s6512_s17 }
 0x3f2   : > { %2134 = vrot.lane.b32.xlu1 %v6842_v3, %s6512_s17 }
 0x3f6   : > { %2131 = vrot.lane.b32.xlu1 %v6878_v28, %s6512_s17 }
 0x404   : > { %v1343_v30 = vpop.xlane.xlu0 %1342 }
 0x405   : > { %6194 = vrcp.f32 %v1343_v30 }
 0x40c   : > { %v1349_v48 = vpop.xlane.xlu0 %1348 }
 0x40d   : > { %6196 = vrcp.f32 %v1349_v48  ;;  %v1346_v49 = vpop.xlane.xlu1 %1345 }
 0x40e   : > { %6198 = vrcp.f32 %v1346_v49 }
 0x412   : > { %v6195_v50 = vpop.eup %6194 }
 0x413   : > { %v1373_v59 = vmul.f32 %v6195_v50, %v6903_v63  ;;  %v6981_v63 = vpack.c.bf16 %v6876_v25, %v6876_v25 }
 0x414   : > { %v1355_v60 = vpop.xlane.xlu0 %1354 }
 0x415   : > { %6200 = vrcp.f32 %v1355_v60  ;;  %v1352_v61 = vpop.xlane.xlu1 %1351  ;;  %v1381_v62 = vpack.c.bf16 %v1373_v59, %v1373_v59  ;;  %v1578_v25 = vsel %vm1392_vm3, %v6981_v63, 0  ;;  %v1716_v60 = vsel %vm1392_vm3, %v7026_v45, 0 }
 0x416   : > { %6202 = vrcp.f32 %v1352_v61 }
 0x417   : > { %5615 = vmatmul.mubr.msk.bf16.vlgmr.msra.gmra.mxu1 %vm1292_vm4, %v1381_v62 }
 0x418   : > { %5625 = vmatpush3.bf16.msra.mxu1 %v1486_v0  ;;  %5626 = vmatprep.mubr.msk.bf16.mxu1 %vm6511_vm1, %v6510_v4 }
 0x419   : > { %5636 = vmatprep.subr.bf16.mxu1 %v6510_v4 }
 0x41a   : > { %v6197_v1 = vpop.eup %6196 }
 0x41b   : > { %v6199_v2 = vpop.eup %6198  ;;  %v1375_v31 = vmul.f32 %v6197_v1, %v6907_v17  ;;  %v888_v17 = vadd.f32 %v6891_v35, %v6820_v57  ;;  %v7004_v57 = vpack.c.bf16 %v6865_v21, %v6865_v21 }
 0x41c   : > { %v1361_v38 = vpop.xlane.xlu0 %1360  ;;  %v1374_v13 = vmul.f32 %v6199_v2, %v6909_v18 }
 0x41d   : > { %6204 = vrcp.f32 %v1361_v38  ;;  %v1358_v14 = vpop.xlane.xlu1 %1357  ;;  %v1383_v53 = vpack.c.bf16 %v1375_v31, %v1375_v31  ;;  %v7008_v20 = vpack.c.bf16 %v888_v17, %v888_v17  ;;  %v1670_v43 = vsel %vm1392_vm3, %v7004_v57, 0 }
 0x41e   : > { %6206 = vrcp.f32 %v1358_v14  ;;  %v1382_v52 = vpack.c.bf16 %v1374_v13, %v1374_v13 }
 0x41f   : > { %5627 = vmatmul.mubr.msk.bf16.vlgmr.msra.gmra.mxu1 %vm1292_vm4, %v1383_v53  ;;  %v1624_v21 = vsel %vm1392_vm3, %v7008_v20, 0 }
 0x420   : > { %5621 = vmatmul.mubr.msk.bf16.vlgmr.msra.gmra.mxu0 %vm1292_vm4, %v1382_v52  ;;  %5637 = vmatpush3.bf16.msra.mxu1 %v1578_v25  ;;  %v1771_v34 = vpop.permute.xlu0 %1770 }
 0x421   : > { %5631 = vmatpush3.bf16.msra.mxu0 %v1532_v12  ;;  %5632 = vmatprep.mubr.msk.bf16.mxu0 %vm6511_vm1, %v6510_v4  ;;  %v1776_v50 = vsel %vm923_vm2, %v1771_v34, 0  ;;  %v1823_v59 = vpop.permute.xlu1 %1822 }
 0x422   : > { %v6201_v18 = vpop.eup %6200  ;;  %5638 = vmatprep.mubr.msk.bf16.mxu1 %vm6511_vm1, %v6510_v4  ;;  %5642 = vmatprep.subr.bf16.mxu0 %v6510_v4  ;;  %v1828_v17 = vsel %vm923_vm2, %v1823_v59, 0 }
 0x423   : > { %v6203_v19 = vpop.eup %6202  ;;  %5648 = vmatprep.subr.bf16.mxu1 %v6510_v4  ;;  %v1377_v35 = vmul.f32 %v6201_v18, %v6915_v22 }
 0x424   : > { %v1376_v7 = vmul.f32 %v6203_v19, %v6917_v8  ;;  %v1875_v47 = vpop.permute.xlu0 %1874 }
 0x425   : > { %v1385_v15 = vpack.c.bf16 %v1377_v35, %v1377_v35 }
 0x426   : > { %v1384_v37 = vpack.c.bf16 %v1376_v7, %v1376_v7 }
 0x427   : > { %5639 = vmatmul.mubr.msk.bf16.vlgmr.msra.gmra.mxu1 %vm1292_vm4, %v1385_v15 }
 0x428   : > { %5633 = vmatmul.mubr.msk.bf16.vlgmr.msra.gmra.mxu0 %vm1292_vm4, %v1384_v37  ;;  %5649 = vmatpush3.bf16.msra.mxu1 %v1670_v43  ;;  %v1872_v29 = vpop.permute.xlu0 %1871 }
 0x429   : > { %5643 = vmatpush3.bf16.msra.mxu0 %v1624_v21  ;;  %5644 = vmatprep.mubr.msk.bf16.mxu0 %vm6511_vm1, %v6510_v4 }
 0x42a   : > { %v6205_v22 = vpop.eup %6204  ;;  %5650 = vmatprep.mubr.msk.bf16.mxu1 %vm6511_vm1, %v6510_v4  ;;  %5654 = vmatprep.subr.bf16.mxu0 %v6510_v4 }
 0x42b   : > { %v6207_v8 = vpop.eup %6206  ;;  %5660 = vmatprep.subr.bf16.mxu1 %v6510_v4  ;;  %v1379_v44 = vmul.f32 %v6205_v22, %v6923_v32  ;;  %v1768_v32 = vpop.permute.xlu1 %1767 }
 0x42c   : > { %v1378_v30 = vmul.f32 %v6207_v8, %v6925_v33  ;;  %v1880_v33 = vsel %vm923_vm2, %v1875_v47, 0  ;;  %v1979_v61 = vpop.permute.xlu0 %1978 }
 0x42d   : > { %v1387_v48 = vpack.c.bf16 %v1379_v44, %v1379_v44  ;;  %v1984_v0 = vsel %vm923_vm2, %v1979_v61, 0 }
 0x42e   : > { %v1386_v49 = vpack.c.bf16 %v1378_v30, %v1378_v30 }
 0x42f   : > { %5651 = vmatmul.mubr.msk.bf16.vlgmr.msra.gmra.mxu1 %vm1292_vm4, %v1387_v48 }
 0x430   : > { %5645 = vmatmul.mubr.msk.bf16.vlgmr.msra.gmra.mxu0 %vm1292_vm4, %v1386_v49  ;;  %5661 = vmatpush3.bf16.xpose.msra.mxu1 %v1776_v50  ;;  %v1976_v62 = vpop.permute.xlu0 %1975 }
 0x431   : > { %5655 = vmatpush3.bf16.msra.mxu0 %v1716_v60  ;;  %5662 = vmatprep.mubr.msk.bf16.mxu1 %vm6511_vm1, %v6510_v4 }
 0x432   : > { %5672 = vmatprep.subr.bf16.mxu1 %v6510_v4  ;;  %5656 = vmatprep.mubr.msk.bf16.mxu0 %vm6511_vm1, %v6510_v4 }
 0x433   : > { %5666 = vmatprep.subr.bf16.mxu0 %v6510_v4 }
 0x434   : > { %v2083_v1 = vpop.permute.xlu0 %2082 }
 0x435   : > { %v2088_v2 = vsel %vm923_vm2, %v2083_v1, 0 }
 0x437   : > { %5663 = vmatmul.mubr.msk.bf16.vlgmr.msra.gmra.mxu1 %vm923_vm2, %v1768_v32 }
 0x438   : > { %5673 = vmatpush3.bf16.xpose.msra.mxu1 %v1880_v33  ;;  %5674 = vmatprep.mubr.msk.bf16.mxu1 %vm6511_vm1, %v6510_v4  ;;  %v2080_v31 = vpop.permute.xlu0 %2079 }
 0x439   : > { %5684 = vmatprep.subr.bf16.mxu1 %v6510_v4 }
 0x43f   : > { %5675 = vmatmul.mubr.msk.bf16.vlgmr.msra.gmra.mxu1 %vm923_vm2, %v1872_v29 }
 0x440   : > { %5685 = vmatpush3.bf16.xpose.msra.mxu1 %v1984_v0  ;;  %5686 = vmatprep.mubr.msk.bf16.mxu1 %vm6511_vm1, %v6510_v4 }
 0x441   : > { %5696 = vmatprep.subr.bf16.mxu1 %v6510_v4 }
 0x447   : > { %5687 = vmatmul.mubr.msk.bf16.vlgmr.msra.gmra.mxu1 %vm923_vm2, %v1976_v62 }
 0x448   : > { %5697 = vmatpush3.bf16.xpose.msra.mxu1 %v2088_v2  ;;  %5698 = vmatprep.mubr.msk.bf16.mxu1 %vm6511_vm1, %v6510_v4 }
 0x449   : > { %5708 = vmatprep.subr.bf16.mxu1 %v6510_v4 }
 0x44f   : > { %5699 = vmatmul.mubr.msk.bf16.vlgmr.msra.gmra.mxu1 %vm923_vm2, %v2080_v31 }
 0x450   : > { %5710 = vmatprep.mubr.msk.bf16.mxu1 %vm6511_vm1, %v6510_v4 }
 0x456   : > { %v1364_v38 = vpop.xlane.xlu1 %1363 }
 0x457   : > { %6208 = vrcp.f32 %v1364_v38 }
 0x45a   : > { %v1820_v13 = vpop.permute.xlu1 %1819 }
 0x45e   : > { %v1927_v52 = vpop.permute.xlu1 %1926 }
 0x45f   : > { %v1932_v18 = vsel %vm923_vm2, %v1927_v52, 0 }
 0x462   : > { %v1924_v12 = vpop.permute.xlu1 %1923 }
 0x464   : > { %v6209_v14 = vpop.eup %6208 }
 0x465   : > { %v1380_v53 = vmul.f32 %v6209_v14, %v6950_v46 }
 0x466   : > { %v2031_v19 = vpop.permute.xlu1 %2030 }
 0x467   : > { %v1388_v25 = vpack.c.bf16 %v1380_v53, %v1380_v53  ;;  %v2036_v35 = vsel %vm923_vm2, %v2031_v19, 0 }
 0x469   : > { %5657 = vmatmul.mubr.msk.bf16.vlgmr.msra.gmra.mxu0 %vm1292_vm4, %v1388_v25 }
 0x46a   : > { %5667 = vmatpush3.bf16.xpose.msra.mxu0 %v1828_v17  ;;  %5668 = vmatprep.mubr.msk.bf16.mxu0 %vm6511_vm1, %v6510_v4  ;;  %v2028_v46 = vpop.permute.xlu1 %2027 }
 0x46b   : > { %5678 = vmatprep.subr.bf16.mxu0 %v6510_v4 }
 0x46e   : > { %v2135_v7 = vpop.permute.xlu1 %2134 }
 0x46f   : > { %v2140_v15 = vsel %vm923_vm2, %v2135_v7, 0 }
 0x471   : > { %5669 = vmatmul.mubr.msk.bf16.vlgmr.msra.gmra.mxu0 %vm923_vm2, %v1820_v13 }
 0x472   : > { %5679 = vmatpush3.bf16.xpose.msra.mxu0 %v1932_v18  ;;  %5680 = vmatprep.mubr.msk.bf16.mxu0 %vm6511_vm1, %v6510_v4  ;;  %v2132_v34 = vpop.permute.xlu1 %2131 }
 0x473   : > { %5690 = vmatprep.subr.bf16.mxu0 %v6510_v4 }
 0x479   : > { %5681 = vmatmul.mubr.msk.bf16.vlgmr.msra.gmra.mxu0 %vm923_vm2, %v1924_v12 }
 0x47a   : > { %5691 = vmatpush3.bf16.xpose.msra.mxu0 %v2036_v35  ;;  %5692 = vmatprep.mubr.msk.bf16.mxu0 %vm6511_vm1, %v6510_v4 }
 0x47b   : > { %5702 = vmatprep.subr.bf16.mxu0 %v6510_v4 }
 0x481   : > { %5693 = vmatmul.mubr.msk.bf16.vlgmr.msra.gmra.mxu0 %vm923_vm2, %v2028_v46 }
 0x482   : > { %5703 = vmatpush3.bf16.xpose.msra.mxu0 %v2140_v15  ;;  %5704 = vmatprep.mubr.msk.bf16.mxu0 %vm6511_vm1, %v6510_v4 }
 0x483   : > { %5714 = vmatprep.subr.bf16.mxu0 %v6510_v4 }
 0x489   : > { %5705 = vmatmul.mubr.msk.bf16.vlgmr.msra.gmra.mxu0 %vm923_vm2, %v2132_v34 }
 0x48a   : > { %5716 = vmatprep.mubr.msk.bf16.mxu0 %vm6511_vm1, %v6510_v4 }
 0x4d7   : > { %v7082_v37 = vpop.f32.mrf.mxu1 }
 0x4d9   : > { %v5616_v43 = vpop.f32.mrf.mxu1 }
 0x4db   : > { %v1433_v21 = vpop.f32.mrf.mxu1 }
 0x4dd   : > { %v5617_v22 = vpop.f32.mrf.mxu1 }
 0x4df   : > { %v7084_v8 = vpop.f32.mrf.mxu1 }
 0x4e0   : > { %v7086_v44 = vpop.f32.mrf.mxu0 }
 0x4e1   : > { %v1758_v47 = vpack.c.bf16 %v7086_v44, %v7082_v37  ;;  %v5628_v30 = vpop.f32.mrf.mxu1  ;;  %v6149_v44 = vld [vmem:[#allocation8 + $0x10] sm:$0xff]  }
 0x4e2   : > { %v5622_v48 = vpop.f32.mrf.mxu0 }
 0x4e3   : > { %v1525_v49 = vpop.f32.mrf.mxu1 }
 0x4e4   : > { %v1479_v50 = vpop.f32.mrf.mxu0 }
 0x4e5   : > { %v5629_v59 = vpop.f32.mrf.mxu1 }
 0x4e6   : > { %v5623_v60 = vpop.f32.mrf.mxu0 }
 0x4e7   : > { %v7090_v29 = vpop.f32.mrf.mxu1 }
 0x4e8   : > { %v7092_v32 = vpop.f32.mrf.mxu0 }
 0x4e9   : > { %v1759_v33 = vpack.c.bf16 %v7092_v32, %v7084_v8  ;;  %v5640_v61 = vpop.f32.mrf.mxu1  ;;  %v6148_v8 = vld [vmem:[#allocation8 + $0x18] sm:$0xff]  }
 0x4ea   : > { %v5634_v62 = vpop.f32.mrf.mxu0 }
 0x4eb   : > { %v1617_v0 = vpop.f32.mrf.mxu1 }
 0x4ec   : > { %v1571_v1 = vpop.f32.mrf.mxu0 }
 0x4ed   : > { %v5641_v2 = vpop.f32.mrf.mxu1 }
 0x4ee   : > { %v5635_v31 = vpop.f32.mrf.mxu0 }
 0x4ef   : > { %v7096_v38 = vpop.f32.mrf.mxu1 }
 0x4f0   : > { %v7098_v13 = vpop.f32.mrf.mxu0 }
 0x4f1   : > { %v1760_v14 = vpack.c.bf16 %v7098_v13, %v7090_v29  ;;  %v5652_v53 = vpop.f32.mrf.mxu1 }
 0x4f2   : > { %v5646_v52 = vpop.f32.mrf.mxu0 }
 0x4f3   : > { %v1709_v25 = vpop.f32.mrf.mxu1 }
 0x4f4   : > { %v1663_v17 = vpop.f32.mrf.mxu0 }
 0x4f5   : > { %v5653_v12 = vpop.f32.mrf.mxu1 }
 0x4f6   : > { %v5647_v18 = vpop.f32.mrf.mxu0 }
 0x4f7   : > { %v1812_v19 = vpop.f32.mrf.mxu1 }
 0x4f8   : > { %v2182_v46 = vsel %vm1292_vm4, %v1812_v19, -inf }
 0x4f9   : > { %2183 = vmax.xlane.f32.xlu0 %v2182_v46  ;;  %v5664_v35 = vpop.f32.mrf.mxu1 }
 0x4fb   : > { %v1815_v7 = vpop.f32.mrf.mxu1 }
 0x4fd   : > { %v5665_v15 = vpop.f32.mrf.mxu1 }
 0x4ff   : > { %v1916_v34 = vpop.f32.mrf.mxu1 }
 0x500   : > { %v2188_v43 = vsel %vm1292_vm4, %v1916_v34, -inf }
 0x501   : > { %2189 = vmax.xlane.f32.xlu0 %v2188_v43  ;;  %v5676_v21 = vpop.f32.mrf.mxu1 }
 0x503   : > { %v1919_v22 = vpop.f32.mrf.mxu1 }
 0x505   : > { %v5677_v30 = vpop.f32.mrf.mxu1 }
 0x507   : > { %v7104_v48 = vpop.f32.mrf.mxu1 }
 0x508   : > { %v2194_v21 = vsel %vm1292_vm4, %v7104_v48, -inf }
 0x509   : > { %v5688_v49 = vpop.f32.mrf.mxu1 }
 0x50b   : > { %v2023_v50 = vpop.f32.mrf.mxu1 }
 0x50d   : > { %v5689_v59 = vpop.f32.mrf.mxu1 }
 0x50f   : > { %v7106_v60 = vpop.f32.mrf.mxu1 }
 0x510   : > { %v2200_v49 = vsel %vm1292_vm4, %v7106_v60, -inf }
 0x511   : > { %v5700_v61 = vpop.f32.mrf.mxu1 }
 0x513   : > { %v2127_v62 = vpop.f32.mrf.mxu1 }
 0x515   : > { %v5701_v0 = vpop.f32.mrf.mxu1 }
 0x529   : > { %v7108_v1 = vpop.f32.mrf.mxu0 }
 0x52a   : > { %v1761_v2 = vpack.c.bf16 %v7108_v1, %v7096_v38 }
 0x52b   : > { %v5658_v31 = vpop.f32.mrf.mxu0 }
 0x52d   : > { %v1755_v53 = vpop.f32.mrf.mxu0 }
 0x52f   : > { %v5659_v52 = vpop.f32.mrf.mxu0 }
 0x531   : > { %v1864_v25 = vpop.f32.mrf.mxu0 }
 0x532   : > { %v2185_v17 = vsel %vm1292_vm4, %v1864_v25, -inf }
 0x533   : > { %2186 = vmax.xlane.f32.xlu1 %v2185_v17  ;;  %v5670_v12 = vpop.f32.mrf.mxu0 }
 0x535   : > { %v1867_v18 = vpop.f32.mrf.mxu0 }
 0x537   : > { %v5671_v46 = vpop.f32.mrf.mxu0 }
 0x539   : > { %v7113_v35 = vpop.f32.mrf.mxu0 }
 0x53a   : > { %v2191_v7 = vsel %vm1292_vm4, %v7113_v35, -inf }
 0x53b   : > { %2192 = vmax.xlane.f32.xlu0 %v2191_v7  ;;  %v5682_v15 = vpop.f32.mrf.mxu0 }
 0x53d   : > { %v1971_v43 = vpop.f32.mrf.mxu0 }
 0x53f   : > { %2195 = vmax.xlane.f32.xlu0 %v2194_v21  ;;  %v5683_v22 = vpop.f32.mrf.mxu0 }
 0x541   : > { %v7119_v30 = vpop.f32.mrf.mxu0 }
 0x542   : > { %v2197_v50 = vsel %vm1292_vm4, %v7119_v30, -inf }
 0x543   : > { %2201 = vmax.xlane.f32.xlu0 %v2200_v49  ;;  %2198 = vmax.xlane.f32.xlu1 %v2197_v50  ;;  %v5694_v59 = vpop.f32.mrf.mxu0 }
 0x545   : > { %v2075_v61 = vpop.f32.mrf.mxu0 }
 0x547   : > { %v5695_v62 = vpop.f32.mrf.mxu0 }
 0x549   : > { %v7125_v0 = vpop.f32.mrf.mxu0 }
 0x54a   : > { %v2203_v17 = vsel %vm1292_vm4, %v7125_v0, -inf }
 0x54b   : > { %v5706_v31 = vpop.f32.mrf.mxu0 }
 0x54d   : > { %v2179_v53 = vpop.f32.mrf.mxu0 }
 0x54f   : > { %v5707_v52 = vpop.f32.mrf.mxu0 }
 0x554   : > { %2328 = vrot.lane.b32.xlu1 %v6873_v24, %s6512_s17 }
 0x558   : > { %2377 = vrot.lane.b32.xlu1 %v6970_v58, %s6512_s17 }
 0x559   : > { %2279 = vrot.lane.b32.xlu0 %v6849_v11, %s6512_s17 }
 0x57c   : > { %2204 = vmax.xlane.f32.xlu1 %v2203_v17 }
 0x582   : > { %v2184_v12 = vpop.xlane.xlu0 %2183 }
 0x583   : > { %v2206_v18 = vsub.f32 %v1812_v19, %v2184_v12 }
 0x585   : > { %v2214_v46 = vmul.f32 1.442695, %v2206_v18 }
 0x587   : > { %6210 = vpow2.f32 %v2214_v46 }
 0x58a   : > { %v2190_v7 = vpop.xlane.xlu0 %2189 }
 0x58b   : > { %v2208_v15 = vsub.f32 %v1916_v34, %v2190_v7 }
 0x58d   : > { %v2218_v43 = vmul.f32 1.442695, %v2208_v15  ;;  %2426 = vrot.lane.b32.xlu1 %v6986_v42, %s6512_s17 }
 0x58f   : > { %6212 = vpow2.f32 %v2218_v43 }
 0x594   : > { %v7137_v21 = vpop.eup %6210 }
 0x595   : > { %v2230_v22 = vsel %vm1292_vm4, %v7137_v21, 0.0 }
 0x596   : > { %2231 = vadd.xlane.f32.xlu0 %v2230_v22 }
 0x59c   : > { %v7141_v49 = vpop.eup %6212 }
 0x59d   : > { %v2236_v19 = vsel %vm1292_vm4, %v7141_v49, 0.0 }
 0x59e   : > { %2237 = vadd.xlane.f32.xlu0 %v2236_v19 }
 0x5b4   : > { %2475 = vrot.lane.b32.xlu0 %v6981_v63, %s6512_s17 }
 0x5bc   : > { %v2187_v34 = vpop.xlane.xlu1 %2186 }
 0x5bd   : > { %v2207_v50 = vsub.f32 %v1864_v25, %v2187_v34 }
 0x5bf   : > { %v2216_v59 = vmul.f32 1.442695, %v2207_v50 }
 0x5c1   : > { %6214 = vpow2.f32 %v2216_v59 }
 0x5c4   : > { %v2193_v61 = vpop.xlane.xlu0 %2192 }
 0x5c5   : > { %v2209_v50 = vsub.f32 %v7113_v35, %v2193_v61 }
 0x5c7   : > { %v2220_v59 = vmul.f32 1.442695, %v2209_v50 }
 0x5c8   : > { %v2196_v62 = vpop.xlane.xlu0 %2195 }
 0x5c9   : > { %v2210_v31 = vsub.f32 %v7104_v48, %v2196_v62 }
 0x5cb   : > { %v2222_v53 = vmul.f32 1.442695, %v2210_v31 }
 0x5cc   : > { %v2202_v52 = vpop.xlane.xlu0 %2201  ;;  %v2199_v17 = vpop.xlane.xlu1 %2198 }
 0x5cd   : > { %6216 = vpow2.f32 %v2222_v53  ;;  %v2212_v12 = vsub.f32 %v7106_v60, %v2202_v52  ;;  %v2211_v62 = vsub.f32 %v7119_v30, %v2199_v17 }
 0x5ce   : > { %v7149_v18 = vpop.eup %6214 }
 0x5cf   : > { %v2226_v46 = vmul.f32 1.442695, %v2212_v12  ;;  %v2233_v7 = vsel %vm1292_vm4, %v7149_v18, 0.0  ;;  %v2224_v31 = vmul.f32 1.442695, %v2211_v62 }
 0x5d0   : > { %v2280_v15 = vpop.permute.xlu0 %2279  ;;  %v2329_v25 = vpop.permute.xlu1 %2328  ;;  %2234 = vadd.xlane.f32.xlu1 %v2233_v7 }
 0x5d1   : > { %6218 = vpow2.f32 %v2226_v46  ;;  %v2285_v43 = vsel %vm1392_vm3, %v2280_v15, 0  ;;  %v2334_v48 = vsel %vm1392_vm3, %v2329_v25, 0 }
 0x5d2   : > { %5709 = vmatpush3.bf16.msra.mxu1 %v2285_v43  ;;  %5715 = vmatpush3.bf16.msra.mxu0 %v2334_v48  ;;  %6220 = vpow2.f32 %v2220_v59 }
 0x5d3   : > { %5720 = vmatprep.subr.bf16.mxu1 %v6510_v4  ;;  %5726 = vmatprep.subr.bf16.mxu0 %v6510_v4  ;;  %6222 = vpow2.f32 %v2224_v31 }
 0x5d4   : > { %v2378_v52 = vpop.permute.xlu1 %2377 }
 0x5da   : > { %v7157_v60 = vpop.eup %6216 }
 0x5db   : > { %v2242_v22 = vsel %vm1292_vm4, %v7157_v60, 0.0 }
 0x5dc   : > { %2243 = vadd.xlane.f32.xlu0 %v2242_v22 }
 0x5de   : > { %v7161_v19 = vpop.eup %6218 }
 0x5df   : > { %v2248_v34 = vsel %vm1292_vm4, %v7161_v19, 0.0  ;;  %v7175_v53 = vpop.eup %6220 }
 0x5e0   : > { %2249 = vadd.xlane.f32.xlu0 %v2248_v34  ;;  %v2239_v35 = vsel %vm1292_vm4, %v7175_v53, 0.0  ;;  %v7181_v30 = vpop.eup %6222  ;;  %v2383_v34 = vsel %vm1392_vm3, %v2378_v52, 0 }
 0x5e1   : > { %2524 = vrot.lane.b32.xlu1 %v7008_v20, %s6512_s17  ;;  %v2245_v46 = vsel %vm1292_vm4, %v7181_v30, 0.0 }
 0x5f6   : > { %2573 = vrot.lane.b32.xlu0 %v7004_v57, %s6512_s17 }
 0x5fa   : > { %2858 = vrot.lane.b32.xlu0 %v6756_v16, %s6513_s19 }
 0x5fe   : > { %2856 = vrot.lane.b32.xlu0 %v6766_v26, %s6513_s19 }
 0x602   : > { %2958 = vrot.lane.b32.xlu0 %v6768_v27, %s6513_s19 }
 0x605   : > { %2240 = vadd.xlane.f32.xlu1 %v2239_v35  ;;  %v2205_v61 = vpop.xlane.xlu1 %2204 }
 0x606   : > { %v2213_v17 = vsub.f32 %v7125_v0, %v2205_v61  ;;  %2956 = vrot.lane.b32.xlu0 %v6788_v40, %s6513_s19 }
 0x608   : > { %v2228_v12 = vmul.f32 1.442695, %v2213_v17 }
 0x609   : > { %2246 = vadd.xlane.f32.xlu1 %v2245_v46 }
 0x60a   : > { %6224 = vpow2.f32 %v2228_v12  ;;  %3058 = vrot.lane.b32.xlu0 %v6790_v41, %s6513_s19 }
 0x60e   : > { %3056 = vrot.lane.b32.xlu0 %v6815_v55, %s6513_s19 }
 0x612   : > { %3158 = vrot.lane.b32.xlu0 %v6817_v56, %s6513_s19 }
 0x616   : > { %3156 = vrot.lane.b32.xlu0 %v6847_v10, %s6513_s19 }
 0x617   : > { %v7196_v0 = vpop.eup %6224 }
 0x618   : > { %v2251_v7 = vsel %vm1292_vm4, %v7196_v0, 0.0 }
 0x619   : > { %2252 = vadd.xlane.f32.xlu1 %v2251_v7 }
 0x61f   : > { %v2232_v15 = vpop.xlane.xlu0 %2231 }
 0x620   : > { %6226 = vrcp.f32 %v2232_v15 }
 0x627   : > { %v2238_v25 = vpop.xlane.xlu0 %2237 }
 0x628   : > { %6228 = vrcp.f32 %v2238_v25 }
 0x62a   : > { %2622 = vrot.lane.b32.xlu1 %v7026_v45, %s6512_s17 }
 0x62b   : > { %v2476_v59 = vpop.permute.xlu0 %2475 }
 0x62c   : > { %v2481_v31 = vsel %vm1392_vm3, %v2476_v59, 0 }
 0x62d   : > { %v6227_v43 = vpop.eup %6226 }
 0x62e   : > { %2908 = vrot.lane.b32.xlu1 %v6763_v23, %s6513_s19  ;;  %v2262_v48 = vmul.f32 %v6227_v43, %v7137_v21 }
 0x630   : > { %v2270_v22 = vpack.c.bf16 %v2262_v48, %v2262_v48 }
 0x632   : > { %2906 = vrot.lane.b32.xlu1 %v6786_v39, %s6513_s19  ;;  %5711 = vmatmul.mubr.msk.bf16.vlgmr.msra.gmra.mxu1 %vm1292_vm4, %v2270_v22 }
 0x633   : > { %5721 = vmatpush3.bf16.msra.mxu1 %v2383_v34  ;;  %5722 = vmatprep.mubr.msk.bf16.mxu1 %vm6511_vm1, %v6510_v4 }
 0x634   : > { %5732 = vmatprep.subr.bf16.mxu1 %v6510_v4 }
 0x635   : > { %v6229_v50 = vpop.eup %6228 }
 0x636   : > { %3008 = vrot.lane.b32.xlu1 %v6783_v36, %s6513_s19  ;;  %v2264_v21 = vmul.f32 %v6229_v50, %v7141_v49  ;;  %v2427_v49 = vpop.permute.xlu1 %2426 }
 0x637   : > { %v2432_v7 = vsel %vm1392_vm3, %v2427_v49, 0 }
 0x638   : > { %v2272_v62 = vpack.c.bf16 %v2264_v21, %v2264_v21 }
 0x63a   : > { %3006 = vrot.lane.b32.xlu1 %v6813_v54, %s6513_s19  ;;  %5723 = vmatmul.mubr.msk.bf16.vlgmr.msra.gmra.mxu1 %vm1292_vm4, %v2272_v62 }
 0x63b   : > { %5733 = vmatpush3.bf16.msra.mxu1 %v2481_v31  ;;  %5734 = vmatprep.mubr.msk.bf16.mxu1 %vm6511_vm1, %v6510_v4 }
 0x63c   : > { %5744 = vmatprep.subr.bf16.mxu1 %v6510_v4 }
 0x63e   : > { %3108 = vrot.lane.b32.xlu1 %v6810_v51, %s6513_s19 }
 0x642   : > { %3106 = vrot.lane.b32.xlu1 %v6845_v9, %s6513_s19 }
 0x646   : > { %3208 = vrot.lane.b32.xlu1 %v6842_v3, %s6513_s19 }
 0x64a   : > { %3206 = vrot.lane.b32.xlu1 %v6878_v28, %s6513_s19 }
 0x659   : > { %v2235_v52 = vpop.xlane.xlu1 %2234 }
 0x65a   : > { %6230 = vrcp.f32 %v2235_v52 }
 0x65d   : > { %v2525_v21 = vpop.permute.xlu1 %2524 }
 0x665   : > { %v2244_v35 = vpop.xlane.xlu0 %2243 }
 0x666   : > { %6232 = vrcp.f32 %v2244_v35  ;;  %v2530_v35 = vsel %vm1392_vm3, %v2525_v21, 0 }
 0x667   : > { %v6231_v61 = vpop.eup %6230 }
 0x668   : > { %v2263_v17 = vmul.f32 %v6231_v61, %v7149_v18 }
 0x669   : > { %v2250_v12 = vpop.xlane.xlu0 %2249 }
 0x66a   : > { %6234 = vrcp.f32 %v2250_v12  ;;  %v2271_v46 = vpack.c.bf16 %v2263_v17, %v2263_v17 }
 0x66c   : > { %5717 = vmatmul.mubr.msk.bf16.vlgmr.msra.gmra.mxu0 %vm1292_vm4, %v2271_v46  ;;  %v6146_v46 = vld [vmem:[#allocation8 + $0x8] sm:$0xff]  }
 0x66d   : > { %5727 = vmatpush3.bf16.msra.mxu0 %v2432_v7  ;;  %5728 = vmatprep.mubr.msk.bf16.mxu0 %vm6511_vm1, %v6510_v4  ;;  %v2574_v43 = vpop.permute.xlu0 %2573 }
 0x66e   : > { %5738 = vmatprep.subr.bf16.mxu0 %v6510_v4  ;;  %v2579_v18 = vsel %vm1392_vm3, %v2574_v43, 0  ;;  %v6147_v43 = vld [vmem:[#allocation8] sm:$0xff]  }
 0x673   : > { %v6233_v15 = vpop.eup %6232 }
 0x674   : > { %v2266_v25 = vmul.f32 %v6233_v15, %v7157_v60 }
 0x676   : > { %v2274_v48 = vpack.c.bf16 %v2266_v25, %v2266_v25 }
 0x677   : > { %v6235_v22 = vpop.eup %6234 }
 0x678   : > { %5735 = vmatmul.mubr.msk.bf16.vlgmr.msra.gmra.mxu1 %vm1292_vm4, %v2274_v48  ;;  %v2268_v34 = vmul.f32 %v6235_v22, %v7161_v19 }
 0x679   : > { %5745 = vmatpush3.bf16.msra.mxu1 %v2579_v18  ;;  %5746 = vmatprep.mubr.msk.bf16.mxu1 %vm6511_vm1, %v6510_v4 }
 0x67a   : > { %v2276_v50 = vpack.c.bf16 %v2268_v34, %v2268_v34  ;;  %5756 = vmatprep.subr.bf16.mxu1 %v6148_v8 }
 0x680   : > { %5747 = vmatmul.mubr.msk.bf16.vlgmr.msra.gmra.mxu1 %vm1292_vm4, %v2276_v50 }
 0x681   : > { %5757 = vmatpush3.bf16.msra.mxu1 %v6148_v8 }
 0x682   : > { %5758 = vmatprep.subr.bf16.mxu1 %v6149_v44 }
 0x685   : > { %5759 = vmatpush3.bf16.msra.mxu1 %v6149_v44 }
 0x686   : > { %5780 = vmatprep.subr.bf16.mxu1 %v6510_v4 }
 0x68e   : > { %v2241_v59 = vpop.xlane.xlu1 %2240 }
 0x68f   : > { %6236 = vrcp.f32 %v2241_v59 }
 0x692   : > { %v2247_v60 = vpop.xlane.xlu1 %2246 }
 0x693   : > { %6238 = vrcp.f32 %v2247_v60 }
 0x69c   : > { %v6237_v62 = vpop.eup %6236 }
 0x69d   : > { %v2265_v31 = vmul.f32 %v6237_v62, %v7175_v53 }
 0x69f   : > { %v2273_v49 = vpack.c.bf16 %v2265_v31, %v2265_v31 }
 0x6a0   : > { %v6239_v52 = vpop.eup %6238 }
 0x6a1   : > { %5729 = vmatmul.mubr.msk.bf16.vlgmr.msra.gmra.mxu0 %vm1292_vm4, %v2273_v49  ;;  %v2267_v19 = vmul.f32 %v6239_v52, %v7181_v30 }
 0x6a2   : > { %5739 = vmatpush3.bf16.msra.mxu0 %v2530_v35  ;;  %v2253_v61 = vpop.xlane.xlu1 %2252  ;;  %5740 = vmatprep.mubr.msk.bf16.mxu0 %vm6511_vm1, %v6510_v4 }
 0x6a3   : > { %6240 = vrcp.f32 %v2253_v61  ;;  %5750 = vmatprep.subr.bf16.mxu0 %v6510_v4  ;;  %v2275_v53 = vpack.c.bf16 %v2267_v19, %v2267_v19 }
 0x6a6   : > { %v2623_v17 = vpop.permute.xlu1 %2622 }
 0x6a7   : > { %v2628_v12 = vsel %vm1392_vm3, %v2623_v17, 0 }
 0x6a9   : > { %5741 = vmatmul.mubr.msk.bf16.vlgmr.msra.gmra.mxu0 %vm1292_vm4, %v2275_v53 }
 0x6aa   : > { %5751 = vmatpush3.bf16.msra.mxu0 %v2628_v12  ;;  %5752 = vmatprep.mubr.msk.bf16.mxu0 %vm6511_vm1, %v6510_v4  ;;  %v2909_v30 = vpop.permute.xlu1 %2908 }
 0x6ab   : > { %5768 = vmatprep.subr.bf16.mxu0 %v6146_v46  ;;  %v2914_v22 = vsel %vm923_vm2, %v2909_v30, 0 }
 0x6ae   : > { %v2907_v48 = vpop.permute.xlu1 %2906 }
 0x6b0   : > { %v6241_v7 = vpop.eup %6240 }
 0x6b1   : > { %v2269_v15 = vmul.f32 %v6241_v7, %v7196_v0 }
 0x6b2   : > { %v3009_v37 = vpop.permute.xlu1 %3008 }
 0x6b3   : > { %v2277_v25 = vpack.c.bf16 %v2269_v15, %v2269_v15  ;;  %v3014_v29 = vsel %vm923_vm2, %v3009_v37, 0 }
 0x6b5   : > { %5753 = vmatmul.mubr.msk.bf16.vlgmr.msra.gmra.mxu0 %vm1292_vm4, %v2277_v25  ;;  %v2859_v25 = vpop.permute.xlu0 %2858 }
 0x6b6   : > { %5769 = vmatpush3.bf16.msra.mxu0 %v6146_v46  ;;  %5772 = vmatprep.mubr.msk.bf16.mxu0 %vm923_vm2, %v1758_v47  ;;  %v3007_v47 = vpop.permute.xlu1 %3006 }
 0x6b7   : > { %5770 = vmatprep.subr.bf16.mxu0 %v6147_v43 }
 0x6ba   : > { %5771 = vmatpush3.bf16.msra.mxu0 %v6147_v43  ;;  %v3109_v32 = vpop.permute.xlu1 %3108 }
 0x6bb   : > { %5786 = vmatprep.subr.bf16.mxu0 %v6510_v4  ;;  %v3114_v38 = vsel %vm923_vm2, %v3109_v32, 0 }
 0x6bd   : > { %5773 = vmatmul.mubr.msk.bf16.vlgmr.msra.gmra.mxu0 %vm923_vm2, %v1759_v33 }
 0x6be   : > { %5787 = vmatpush3.bf16.xpose.msra.mxu0 %v2914_v22  ;;  %5776 = vmatprep.mubr.msk.bf16.mxu0 %vm923_vm2, %v1760_v14  ;;  %v3107_v33 = vpop.permute.xlu1 %3106  ;;  %v2864_v22 = vsel %vm923_vm2, %v2859_v25, 0 }
 0x6bf   : > { %5798 = vmatprep.subr.bf16.mxu0 %v6510_v4 }
 0x6c2   : > { %v3209_v13 = vpop.permute.xlu1 %3208 }
 0x6c3   : > { %v3214_v14 = vsel %vm923_vm2, %v3209_v13, 0 }
 0x6c5   : > { %5777 = vmatmul.mubr.msk.bf16.gmra.mxu0 %vm923_vm2, %v1761_v2 }
 0x6c6   : > { %5788 = vmatprep.mubr.msk.bf16.mxu0 %vm6511_vm1, %v6510_v4  ;;  %v3207_v1 = vpop.permute.xlu1 %3206 }
 0x6cd   : > { %5789 = vmatmul.mubr.msk.bf16.vlgmr.msra.gmra.mxu0 %vm923_vm2, %v2907_v48 }
 0x6ce   : > { %5799 = vmatpush3.bf16.xpose.msra.mxu0 %v3014_v29  ;;  %5800 = vmatprep.mubr.msk.bf16.mxu0 %vm6511_vm1, %v6510_v4 }
 0x6cf   : > { %5810 = vmatprep.subr.bf16.mxu0 %v6510_v4 }
 0x6d5   : > { %5801 = vmatmul.mubr.msk.bf16.vlgmr.msra.gmra.mxu0 %vm923_vm2, %v3007_v47 }
 0x6d6   : > { %5811 = vmatpush3.bf16.xpose.msra.mxu0 %v3114_v38  ;;  %5812 = vmatprep.mubr.msk.bf16.mxu0 %vm6511_vm1, %v6510_v4 }
 0x6d7   : > { %5822 = vmatprep.subr.bf16.mxu0 %v6510_v4 }
 0x6dd   : > { %5813 = vmatmul.mubr.msk.bf16.vlgmr.msra.gmra.mxu0 %vm923_vm2, %v3107_v33  ;;  %v2857_v33 = vpop.permute.xlu0 %2856 }
 0x6de   : > { %5823 = vmatpush3.bf16.xpose.msra.mxu0 %v3214_v14  ;;  %5824 = vmatprep.mubr.msk.bf16.mxu0 %vm6511_vm1, %v6510_v4 }
 0x6df   : > { %5834 = vmatprep.subr.bf16.mxu0 %v6510_v4 }
 0x6e1   : > { %v2959_v13 = vpop.permute.xlu0 %2958 }
 0x6e5   : > { %5825 = vmatmul.mubr.msk.bf16.vlgmr.msra.gmra.mxu0 %vm923_vm2, %v3207_v1 }
 0x6e6   : > { %5836 = vmatprep.mubr.msk.bf16.mxu0 %vm6511_vm1, %v6510_v4 }
 0x6f2   : > { %v2321_v2 = vpop.f32.mrf.mxu1 }
 0x6f4   : > { %v5712_v0 = vpop.f32.mrf.mxu1 }
 0x6f6   : > { %v2324_v18 = vpop.f32.mrf.mxu1 }
 0x6f7   : > { %v2957_v18 = vpop.permute.xlu0 %2956 }
 0x6f8   : > { %v5713_v34 = vpop.f32.mrf.mxu1 }
 0x6fa   : > { %v2419_v50 = vpop.f32.mrf.mxu1 }
 0x6fc   : > { %v5724_v21 = vpop.f32.mrf.mxu1 }
 0x6fe   : > { %v2422_v59 = vpop.f32.mrf.mxu1 }
 0x6ff   : > { %v2964_v59 = vsel %vm923_vm2, %v2959_v13, 0 }
 0x700   : > { %v5725_v60 = vpop.f32.mrf.mxu1 }
 0x701   : > { %v3059_v60 = vpop.permute.xlu0 %3058 }
 0x72c   : > { %v2370_v62 = vpop.f32.mrf.mxu0 }
 0x72d   : > { %v2670_v31 = vpack.c.bf16 %v2370_v62, %v2321_v2 }
 0x72e   : > { %v5718_v49 = vpop.f32.mrf.mxu0 }
 0x72f   : > { %5760 = vmatprep.mubr.msk.bf16.mxu1 %vm923_vm2, %v2670_v31 }
 0x730   : > { %v2373_v52 = vpop.f32.mrf.mxu0 }
 0x731   : > { %v3057_v52 = vpop.permute.xlu0 %3056 }
 0x732   : > { %v5719_v35 = vpop.f32.mrf.mxu0 }
 0x738   : > { %v2517_v61 = vpop.f32.mrf.mxu1 }
 0x73a   : > { %v5736_v19 = vpop.f32.mrf.mxu1 }
 0x73c   : > { %v2520_v17 = vpop.f32.mrf.mxu1 }
 0x73e   : > { %v5737_v12 = vpop.f32.mrf.mxu1 }
 0x73f   : > { %v3159_v12 = vpop.permute.xlu0 %3158 }
 0x740   : > { %v2615_v53 = vpop.f32.mrf.mxu1 }
 0x742   : > { %v5748_v46 = vpop.f32.mrf.mxu1 }
 0x744   : > { %v2618_v7 = vpop.f32.mrf.mxu1 }
 0x746   : > { %v5749_v15 = vpop.f32.mrf.mxu1 }
 0x747   : > { %v3164_v15 = vsel %vm923_vm2, %v3159_v12, 0 }
 0x761   : > { %v2468_v43 = vpop.f32.mrf.mxu0 }
 0x762   : > { %v2671_v30 = vpack.c.bf16 %v2468_v43, %v2419_v50 }
 0x763   : > { %v5730_v48 = vpop.f32.mrf.mxu0 }
 0x764   : > { %5761 = vmatmul.mubr.msk.bf16.vlgmr.msra.gmra.mxu1 %vm923_vm2, %v2671_v30 }
 0x765   : > { %5781 = vmatpush3.bf16.xpose.msra.mxu1 %v2864_v22  ;;  %v2471_v37 = vpop.f32.mrf.mxu0  ;;  %v3157_v22 = vpop.permute.xlu0 %3156 }
 0x766   : > { %5792 = vmatprep.subr.bf16.mxu1 %v6510_v4 }
 0x767   : > { %v5731_v8 = vpop.f32.mrf.mxu0 }
 0x769   : > { %v2566_v44 = vpop.f32.mrf.mxu0 }
 0x76a   : > { %v2672_v47 = vpack.c.bf16 %v2566_v44, %v2517_v61  ;;  %v3064_v61 = vsel %vm923_vm2, %v3059_v60, 0 }
 0x76b   : > { %v5742_v29 = vpop.f32.mrf.mxu0 }
 0x76c   : > { %5764 = vmatprep.mubr.msk.bf16.mxu1 %vm923_vm2, %v2672_v47 }
 0x76d   : > { %v2569_v32 = vpop.f32.mrf.mxu0 }
 0x76f   : > { %v5743_v38 = vpop.f32.mrf.mxu0 }
 0x775   : > { %v2664_v14 = vpop.f32.mrf.mxu0 }
 0x776   : > { %v2673_v1 = vpack.c.bf16 %v2664_v14, %v2615_v53 }
 0x777   : > { %v5754_v2 = vpop.f32.mrf.mxu0 }
 0x778   : > { %5765 = vmatmul.mubr.msk.bf16.gmra.mxu1 %vm923_vm2, %v2673_v1 }
 0x779   : > { %v2667_v0 = vpop.f32.mrf.mxu0  ;;  %5782 = vmatprep.mubr.msk.bf16.mxu1 %vm6511_vm1, %v6510_v4 }
 0x77b   : > { %v5755_v34 = vpop.f32.mrf.mxu0 }
 0x77d   : > { %v7304_v50 = vpop.f32.mrf.mxu0 }
 0x77f   : > { %v7306_v21 = vpop.f32.mrf.mxu0 }
 0x780   : > { %5783 = vmatmul.mubr.msk.bf16.vlgmr.msra.gmra.mxu1 %vm923_vm2, %v2857_v33 }
 0x781   : > { %5793 = vmatpush3.bf16.xpose.msra.mxu1 %v2964_v59  ;;  %v7310_v62 = vpop.f32.mrf.mxu0  ;;  %5794 = vmatprep.mubr.msk.bf16.mxu1 %vm6511_vm1, %v6510_v4 }
 0x782   : > { %5804 = vmatprep.subr.bf16.mxu1 %v6510_v4 }
 0x783   : > { %v7315_v31 = vpop.f32.mrf.mxu0 }
 0x785   : > { %v7317_v49 = vpop.f32.mrf.mxu0 }
 0x787   : > { %v7319_v35 = vpop.f32.mrf.mxu0 }
 0x788   : > { %5795 = vmatmul.mubr.msk.bf16.vlgmr.msra.gmra.mxu1 %vm923_vm2, %v2957_v18 }
 0x789   : > { %5805 = vmatpush3.bf16.xpose.msra.mxu1 %v3064_v61  ;;  %v7323_v19 = vpop.f32.mrf.mxu0  ;;  %5806 = vmatprep.mubr.msk.bf16.mxu1 %vm6511_vm1, %v6510_v4 }
 0x78a   : > { %5816 = vmatprep.subr.bf16.mxu1 %v6510_v4 }
 0x78b   : > { %v7328_v17 = vpop.f32.mrf.mxu0 }
 0x78d   : > { %v2950_v53 = vpop.f32.mrf.mxu0 }
 0x78e   : > { %v3259_v46 = vsel %vm1292_vm4, %v2950_v53, -inf }
 0x78f   : > { %3260 = vmax.xlane.f32.xlu1 %v3259_v46  ;;  %v5790_v7 = vpop.f32.mrf.mxu0 }
 0x790   : > { %5807 = vmatmul.mubr.msk.bf16.vlgmr.msra.gmra.mxu1 %vm923_vm2, %v3057_v52 }
 0x791   : > { %5817 = vmatpush3.bf16.xpose.msra.mxu1 %v3164_v15  ;;  %v2953_v25 = vpop.f32.mrf.mxu0  ;;  %5818 = vmatprep.mubr.msk.bf16.mxu1 %vm6511_vm1, %v6510_v4 }
 0x792   : > { %5828 = vmatprep.subr.bf16.mxu1 %v6510_v4 }
 0x793   : > { %v5791_v43 = vpop.f32.mrf.mxu0 }
 0x795   : > { %v3050_v30 = vpop.f32.mrf.mxu0 }
 0x796   : > { %v3265_v48 = vsel %vm1292_vm4, %v3050_v30, -inf }
 0x797   : > { %3266 = vmax.xlane.f32.xlu0 %v3265_v48  ;;  %v5802_v37 = vpop.f32.mrf.mxu0 }
 0x798   : > { %5819 = vmatmul.mubr.msk.bf16.vlgmr.msra.gmra.mxu1 %vm923_vm2, %v3157_v22 }
 0x799   : > { %v3053_v8 = vpop.f32.mrf.mxu0  ;;  %5830 = vmatprep.mubr.msk.bf16.mxu1 %vm6511_vm1, %v6510_v4 }
 0x79b   : > { %v5803_v44 = vpop.f32.mrf.mxu0 }
 0x79d   : > { %v3150_v47 = vpop.f32.mrf.mxu0 }
 0x79e   : > { %v3271_v29 = vsel %vm1292_vm4, %v3150_v47, -inf }
 0x79f   : > { %3272 = vmax.xlane.f32.xlu1 %v3271_v29  ;;  %v5814_v32 = vpop.f32.mrf.mxu0 }
 0x7a1   : > { %v3153_v33 = vpop.f32.mrf.mxu0 }
 0x7a3   : > { %v5815_v38 = vpop.f32.mrf.mxu0 }
 0x7a5   : > { %v3250_v13 = vpop.f32.mrf.mxu0 }
 0x7a6   : > { %v3277_v14 = vsel %vm1292_vm4, %v3250_v13, -inf }
 0x7a7   : > { %3278 = vmax.xlane.f32.xlu1 %v3277_v14  ;;  %v5826_v1 = vpop.f32.mrf.mxu0 }
 0x7a9   : > { %v3253_v2 = vpop.f32.mrf.mxu0 }
 0x7ab   : > { %v5827_v0 = vpop.f32.mrf.mxu0 }
 0x818   : > { %v3261_v18 = vpop.xlane.xlu1 %3260 }
 0x819   : > { %v3281_v34 = vsub.f32 %v2950_v53, %v3261_v18 }
 0x81b   : > { %v3290_v59 = vmul.f32 1.442695, %v3281_v34 }
 0x81d   : > { %6242 = vpow2.f32 %v3290_v59 }
 0x820   : > { %v3267_v60 = vpop.xlane.xlu0 %3266 }
 0x821   : > { %v3283_v52 = vsub.f32 %v3050_v30, %v3267_v60 }
 0x823   : > { %v3294_v61 = vmul.f32 1.442695, %v3283_v52 }
 0x824   : > { %v7344_v15 = vpop.f32.mrf.mxu1 }
 0x825   : > { %6244 = vpow2.f32 %v3294_v61 }
 0x826   : > { %v7348_v48 = vpop.f32.mrf.mxu1 }
 0x828   : > { %v3273_v12 = vpop.xlane.xlu1 %3272  ;;  %v7352_v30 = vpop.f32.mrf.mxu1 }
 0x829   : > { %v3285_v46 = vsub.f32 %v3150_v47, %v3273_v12 }
 0x82a   : > { %v7342_v7 = vpop.eup %6242  ;;  %v7356_v47 = vpop.f32.mrf.mxu1 }
 0x82b   : > { %v3298_v25 = vmul.f32 1.442695, %v3285_v46  ;;  %v3307_v43 = vsel %vm1292_vm4, %v7342_v7, 0.0 }
 0x82c   : > { %3308 = vadd.xlane.f32.xlu1 %v3307_v43 }
 0x82d   : > { %6246 = vpow2.f32 %v3298_v25 }
 0x830   : > { %v3279_v53 = vpop.xlane.xlu1 %3278 }
 0x831   : > { %v3287_v22 = vsub.f32 %v3250_v13, %v3279_v53 }
 0x832   : > { %v7350_v37 = vpop.eup %6244 }
 0x833   : > { %v3302_v8 = vmul.f32 1.442695, %v3287_v22  ;;  %v3313_v44 = vsel %vm1292_vm4, %v7350_v37, 0.0 }
 0x834   : > { %3314 = vadd.xlane.f32.xlu1 %v3313_v44 }
 0x835   : > { %6248 = vpow2.f32 %v3302_v8 }
 0x838   : > { %v7358_v29 = vpop.f32.mrf.mxu1 }
 0x83a   : > { %v7360_v32 = vpop.eup %6246  ;;  %v7362_v33 = vpop.f32.mrf.mxu1 }
 0x83b   : > { %v3319_v38 = vsel %vm1292_vm4, %v7360_v32, 0.0 }
 0x83c   : > { %v7366_v13 = vpop.f32.mrf.mxu1  ;;  %3320 = vadd.xlane.f32.xlu1 %v3319_v38 }
 0x83e   : > { %v7368_v14 = vpop.f32.mrf.mxu1 }
 0x840   : > { %v2900_v1 = vpop.f32.mrf.mxu1 }
 0x841   : > { %v3256_v2 = vsel %vm1292_vm4, %v2900_v1, -inf }
 0x842   : > { %v7371_v0 = vpop.eup %6248  ;;  %v5784_v18 = vpop.f32.mrf.mxu1  ;;  %3257 = vmax.xlane.f32.xlu0 %v3256_v2 }
 0x843   : > { %v3325_v34 = vsel %vm1292_vm4, %v7371_v0, 0.0 }
 0x844   : > { %v2903_v59 = vpop.f32.mrf.mxu1  ;;  %3326 = vadd.xlane.f32.xlu1 %v3325_v34 }
 0x846   : > { %v5785_v60 = vpop.f32.mrf.mxu1 }
 0x848   : > { %v3000_v52 = vpop.f32.mrf.mxu1 }
 0x849   : > { %v3262_v61 = vsel %vm1292_vm4, %v3000_v52, -inf }
 0x84a   : > { %v5796_v12 = vpop.f32.mrf.mxu1  ;;  %3263 = vmax.xlane.f32.xlu0 %v3262_v61 }
 0x84c   : > { %v3003_v46 = vpop.f32.mrf.mxu1 }
 0x84e   : > { %v5797_v25 = vpop.f32.mrf.mxu1 }
 0x850   : > { %v7376_v43 = vpop.f32.mrf.mxu1 }
 0x851   : > { %v3268_v53 = vsel %vm1292_vm4, %v7376_v43, -inf }
 0x852   : > { %v5808_v22 = vpop.f32.mrf.mxu1  ;;  %3269 = vmax.xlane.f32.xlu0 %v3268_v53 }
 0x854   : > { %v3103_v8 = vpop.f32.mrf.mxu1 }
 0x855   : > { %3400 = vrot.lane.b32.xlu1 %v6873_v24, %s6513_s19 }
 0x856   : > { %v5809_v44 = vpop.f32.mrf.mxu1 }
 0x858   : > { %v7382_v38 = vpop.f32.mrf.mxu1 }
 0x859   : > { %3448 = vrot.lane.b32.xlu1 %v6970_v58, %s6513_s19  ;;  %v3274_v2 = vsel %vm1292_vm4, %v7382_v38, -inf }
 0x85a   : > { %v5820_v18 = vpop.f32.mrf.mxu1  ;;  %3275 = vmax.xlane.f32.xlu0 %v3274_v2 }
 0x85c   : > { %v3203_v34 = vpop.f32.mrf.mxu1 }
 0x85d   : > { %3496 = vrot.lane.b32.xlu1 %v6986_v42, %s6513_s19 }
 0x85e   : > { %v5821_v59 = vpop.f32.mrf.mxu1 }
 0x861   : > { %3592 = vrot.lane.b32.xlu1 %v7008_v20, %s6513_s19 }
 0x865   : > { %3688 = vrot.lane.b32.xlu1 %v7026_v45, %s6513_s19 }
 0x869   : > { %3841 = vrot.lane.b32.xlu1 %v6766_v26, %s6514_s18 }
 0x86d   : > { %3891 = vrot.lane.b32.xlu1 %v6786_v39, %s6514_s18 }
 0x870   : > { %3352 = vrot.lane.b32.xlu0 %v6849_v11, %s6513_s19 }
 0x871   : > { %3993 = vrot.lane.b32.xlu1 %v6783_v36, %s6514_s18 }
 0x875   : > { %3991 = vrot.lane.b32.xlu1 %v6813_v54, %s6514_s18 }
 0x879   : > { %4093 = vrot.lane.b32.xlu1 %v6810_v51, %s6514_s18 }
 0x87d   : > { %4091 = vrot.lane.b32.xlu1 %v6845_v9, %s6514_s18 }
 0x881   : > { %4193 = vrot.lane.b32.xlu1 %v6842_v3, %s6514_s18 }
 0x885   : > { %4191 = vrot.lane.b32.xlu1 %v6878_v28, %s6514_s18 }
 0x8b5   : > { %v3309_v26 = vpop.xlane.xlu1 %3308 }
 0x8b6   : > { %6250 = vrcp.f32 %v3309_v26 }
 0x8bd   : > { %v3315_v39 = vpop.xlane.xlu1 %3314 }
 0x8be   : > { %6252 = vrcp.f32 %v3315_v39 }
 0x8c3   : > { %v6251_v54 = vpop.eup %6250 }
 0x8c4   : > { %v3337_v51 = vmul.f32 %v6251_v54, %v7342_v7 }
 0x8c5   : > { %v3321_v36 = vpop.xlane.xlu1 %3320 }
 0x8c6   : > { %6254 = vrcp.f32 %v3321_v36  ;;  %v3345_v53 = vpack.c.bf16 %v3337_v51, %v3337_v51 }
 0x8cb   : > { %v3258_v60 = vpop.xlane.xlu0 %3257  ;;  %v6253_v22 = vpop.eup %6252 }
 0x8cc   : > { %v3280_v61 = vsub.f32 %v2900_v1, %v3258_v60  ;;  %v3339_v7 = vmul.f32 %v6253_v22, %v7350_v37 }
 0x8cd   : > { %v3327_v12 = vpop.xlane.xlu1 %3326 }
 0x8ce   : > { %v3288_v46 = vmul.f32 1.442695, %v3280_v61  ;;  %v3347_v18 = vpack.c.bf16 %v3339_v7, %v3339_v7 }
 0x8d0   : > { %6256 = vpow2.f32 %v3288_v46 }
 0x8d1   : > { %v3401_v9 = vpop.permute.xlu1 %3400  ;;  %6258 = vrcp.f32 %v3327_v12 }
 0x8d2   : > { %v3406_v3 = vsel %vm1392_vm3, %v3401_v9, 0 }
 0x8d3   : > { %v3264_v25 = vpop.xlane.xlu0 %3263  ;;  %5835 = vmatpush3.bf16.msra.mxu0 %v3406_v3 }
 0x8d4   : > { %v3282_v28 = vsub.f32 %v3000_v52, %v3264_v25  ;;  %5846 = vmatprep.subr.bf16.mxu0 %v6510_v4  ;;  %v6255_v52 = vpop.eup %6254 }
 0x8d5   : > { %v7415_v8 = vpop.permute.xlu1 %3448  ;;  %v3341_v37 = vmul.f32 %v6255_v52, %v7360_v32 }
 0x8d6   : > { %v3292_v1 = vmul.f32 1.442695, %v3282_v28  ;;  %5837 = vmatmul.mubr.msk.bf16.vlgmr.msra.gmra.mxu0 %vm1292_vm4, %v3345_v53 }
 0x8d7   : > { %5848 = vmatprep.mubr.msk.bf16.mxu0 %vm6511_vm1, %v6510_v4  ;;  %v3349_v12 = vpack.c.bf16 %v3341_v37, %v3341_v37 }
 0x8d8   : > { %6260 = vpow2.f32 %v3292_v1 }
 0x8d9   : > { %v3497_v44 = vpop.permute.xlu1 %3496 }
 0x8da   : > { %v3502_v2 = vsel %vm1392_vm3, %v3497_v44, 0 }
 0x8db   : > { %5847 = vmatpush3.bf16.msra.mxu0 %v3502_v2  ;;  %v3270_v36 = vpop.xlane.xlu0 %3269 }
 0x8dc   : > { %5858 = vmatprep.subr.bf16.mxu0 %v6510_v4 }
 0x8dd   : > { %v6257_v34 = vpop.eup %6256  ;;  %v3593_v59 = vpop.permute.xlu1 %3592 }
 0x8de   : > { %v3598_v26 = vsel %vm1392_vm3, %v3593_v59, 0  ;;  %5849 = vmatmul.mubr.msk.bf16.vlgmr.msra.gmra.mxu0 %vm1292_vm4, %v3347_v18  ;;  %v3304_v39 = vsel %vm1292_vm4, %v6257_v34, 0.0  ;;  %v6259_v54 = vpop.eup %6258 }
 0x8df   : > { %3305 = vadd.xlane.f32.xlu0 %v3304_v39  ;;  %5859 = vmatpush3.bf16.msra.mxu0 %v3598_v26  ;;  %v3343_v25 = vmul.f32 %v6259_v54, %v7371_v0  ;;  %v3284_v0 = vsub.f32 %v7376_v43, %v3270_v36 }
 0x8e0   : > { %5860 = vmatprep.mubr.msk.bf16.mxu0 %vm6511_vm1, %v6510_v4  ;;  %5870 = vmatprep.subr.bf16.mxu0 %v6510_v4 }
 0x8e1   : > { %v3689_v60 = vpop.permute.xlu1 %3688  ;;  %v3351_v32 = vpack.c.bf16 %v3343_v25, %v3343_v25  ;;  %v3296_v53 = vmul.f32 1.442695, %v3284_v0 }
 0x8e2   : > { %v3694_v51 = vsel %vm1392_vm3, %v3689_v60, 0 }
 0x8e3   : > { %v3276_v61 = vpop.xlane.xlu0 %3275  ;;  %6262 = vpow2.f32 %v3296_v53 }
 0x8e4   : > { %v3286_v22 = vsub.f32 %v7382_v38, %v3276_v61 }
 0x8e5   : > { %v6261_v46 = vpop.eup %6260 }
 0x8e6   : > { %5861 = vmatmul.mubr.msk.bf16.vlgmr.msra.gmra.mxu0 %vm1292_vm4, %v3349_v12  ;;  %v3310_v9 = vsel %vm1292_vm4, %v6261_v46, 0.0  ;;  %v3300_v1 = vmul.f32 1.442695, %v3286_v22 }
 0x8e7   : > { %5871 = vmatpush3.bf16.msra.mxu0 %v3694_v51  ;;  %3311 = vadd.xlane.f32.xlu0 %v3310_v9  ;;  %v3353_v3 = vpop.permute.xlu0 %3352  ;;  %v3842_v9 = vpop.permute.xlu1 %3841 }
 0x8e8   : > { %v3358_v28 = vsel %vm1392_vm3, %v3353_v3, 0  ;;  %5872 = vmatprep.mubr.msk.bf16.mxu0 %vm6511_vm1, %v6510_v4  ;;  %5888 = vmatprep.subr.bf16.mxu0 %v6510_v4  ;;  %6264 = vpow2.f32 %v3300_v1 }
 0x8e9   : > { %5829 = vmatpush3.bf16.msra.mxu1 %v3358_v28 }
 0x8ea   : > { %5840 = vmatprep.subr.bf16.mxu1 %v6510_v4 }
 0x8eb   : > { %v3892_v0 = vpop.permute.xlu1 %3891 }
 0x8ee   : > { %5873 = vmatmul.mubr.msk.bf16.vlgmr.msra.gmra.mxu0 %vm1292_vm4, %v3351_v32 }
 0x8ef   : > { %5890 = vmatprep.mubr.msk.bf16.mxu0 %vm6511_vm1, %v6510_v4 }
 0x8f0   : > { %v6263_v7 = vpop.eup %6262 }
 0x8f1   : > { %v3316_v44 = vsel %vm1292_vm4, %v6263_v7, 0.0 }
 0x8f5   : > { %v7447_v2 = vpop.eup %6264 }
 0x8f6   : > { %v3322_v52 = vsel %vm1292_vm4, %v7447_v2, 0.0 }
 0x8fd   : > { %3544 = vrot.lane.b32.xlu0 %v6981_v63, %s6513_s19 }
 0x91c   : > { %3317 = vadd.xlane.f32.xlu0 %v3316_v44 }
 0x920   : > { %3323 = vadd.xlane.f32.xlu0 %v3322_v52 }
 0x936   : > { %3640 = vrot.lane.b32.xlu0 %v7004_v57, %s6513_s19 }
 0x93a   : > { %3843 = vrot.lane.b32.xlu0 %v6756_v16, %s6514_s18 }
 0x93e   : > { %3893 = vrot.lane.b32.xlu0 %v6763_v23, %s6514_s18 }
 0x942   : > { %3943 = vrot.lane.b32.xlu0 %v6768_v27, %s6514_s18 }
 0x946   : > { %3941 = vrot.lane.b32.xlu0 %v6788_v40, %s6514_s18  ;;  %v3454_v40 = vsel %vm1392_vm3, %v7415_v8, 0 }
 0x94a   : > { %4043 = vrot.lane.b32.xlu0 %v6790_v41, %s6514_s18 }
 0x94e   : > { %4041 = vrot.lane.b32.xlu0 %v6815_v55, %s6514_s18 }
 0x952   : > { %4143 = vrot.lane.b32.xlu0 %v6817_v56, %s6514_s18 }
 0x956   : > { %4141 = vrot.lane.b32.xlu0 %v6847_v10, %s6514_s18 }
 0x968   : > { %v3306_v16 = vpop.xlane.xlu0 %3305 }
 0x969   : > { %6266 = vrcp.f32 %v3306_v16 }
 0x970   : > { %v3312_v23 = vpop.xlane.xlu0 %3311 }
 0x971   : > { %6268 = vrcp.f32 %v3312_v23 }
 0x974   : > { %v3545_v56 = vpop.permute.xlu0 %3544 }
 0x975   : > { %v3550_v18 = vsel %vm1392_vm3, %v3545_v56, 0 }
 0x976   : > { %v6267_v27 = vpop.eup %6266 }
 0x977   : > { %v3336_v43 = vmul.f32 %v6267_v27, %v6257_v34 }
 0x979   : > { %v3344_v38 = vpack.c.bf16 %v3336_v43, %v3336_v43  ;;  %v3994_v43 = vpop.permute.xlu1 %3993 }
 0x97b   : > { %5831 = vmatmul.mubr.msk.bf16.vlgmr.msra.gmra.mxu1 %vm1292_vm4, %v3344_v38 }
 0x97c   : > { %5841 = vmatpush3.bf16.msra.mxu1 %v3454_v40  ;;  %5842 = vmatprep.mubr.msk.bf16.mxu1 %vm6511_vm1, %v6510_v4 }
 0x97d   : > { %5852 = vmatprep.subr.bf16.mxu1 %v6510_v4  ;;  %v3992_v56 = vpop.permute.xlu1 %3991 }
 0x97e   : > { %v6269_v41 = vpop.eup %6268 }
 0x97f   : > { %v3338_v55 = vmul.f32 %v6269_v41, %v6261_v46 }
 0x981   : > { %v3346_v10 = vpack.c.bf16 %v3338_v55, %v3338_v55 }
 0x983   : > { %5843 = vmatmul.mubr.msk.bf16.vlgmr.msra.gmra.mxu1 %vm1292_vm4, %v3346_v10 }
 0x984   : > { %5853 = vmatpush3.bf16.msra.mxu1 %v3550_v18  ;;  %5854 = vmatprep.mubr.msk.bf16.mxu1 %vm6511_vm1, %v6510_v4  ;;  %v6151_v18 = vld [vmem:[#allocation8 + $0x20] sm:$0xff]  }
 0x985   : > { %5864 = vmatprep.subr.bf16.mxu1 %v6510_v4 }
 0x996   : > { %v7480_v8 = vpop.f32.mrf.mxu0 }
 0x998   : > { %v5838_v34 = vpop.f32.mrf.mxu0 }
 0x999   : > { %v4094_v34 = vpop.permute.xlu1 %4093 }
 0x99a   : > { %v3445_v59 = vpop.f32.mrf.mxu0 }
 0x99c   : > { %v5839_v26 = vpop.f32.mrf.mxu0 }
 0x99d   : > { %v4092_v59 = vpop.permute.xlu1 %4091  ;;  %v4099_v26 = vsel %vm923_vm2, %v4094_v34, 0 }
 0x99e   : > { %v7482_v39 = vpop.f32.mrf.mxu0 }
 0x9a0   : > { %v5850_v36 = vpop.f32.mrf.mxu0 }
 0x9a1   : > { %v4194_v36 = vpop.permute.xlu1 %4193 }
 0x9a2   : > { %v3541_v37 = vpop.f32.mrf.mxu0 }
 0x9a3   : > { %v4199_v37 = vsel %vm923_vm2, %v4194_v36, 0 }
 0x9a4   : > { %v5851_v60 = vpop.f32.mrf.mxu0 }
 0x9a5   : > { %v3318_v61 = vpop.xlane.xlu0 %3317  ;;  %v4192_v60 = vpop.permute.xlu1 %4191 }
 0x9a6   : > { %6270 = vrcp.f32 %v3318_v61  ;;  %v7484_v54 = vpop.f32.mrf.mxu0 }
 0x9a8   : > { %v5862_v12 = vpop.f32.mrf.mxu0 }
 0x9a9   : > { %v3324_v46 = vpop.xlane.xlu0 %3323 }
 0x9aa   : > { %6272 = vrcp.f32 %v3324_v46  ;;  %v3637_v51 = vpop.f32.mrf.mxu0 }
 0x9ac   : > { %v5863_v3 = vpop.f32.mrf.mxu0 }
 0x9ad   : > { %v3641_v25 = vpop.permute.xlu0 %3640 }
 0x9ae   : > { %v7486_v28 = vpop.f32.mrf.mxu0  ;;  %v3646_v40 = vsel %vm1392_vm3, %v3641_v25, 0 }
 0x9b0   : > { %v5874_v32 = vpop.f32.mrf.mxu0 }
 0x9b1   : > { %v3844_v53 = vpop.permute.xlu0 %3843 }
 0x9b2   : > { %v3849_v22 = vsel %vm923_vm2, %v3844_v53, 0  ;;  %v3733_v1 = vpop.f32.mrf.mxu0 }
 0x9b3   : > { %v6271_v44 = vpop.eup %6270  ;;  %5889 = vmatpush3.bf16.xpose.msra.mxu0 %v3849_v22 }
 0x9b4   : > { %v3340_v52 = vmul.f32 %v6271_v44, %v6263_v7  ;;  %v5875_v16 = vpop.f32.mrf.mxu0  ;;  %5894 = vmatprep.subr.bf16.mxu0 %v6510_v4  ;;  %v6150_v7 = vld [vmem:[#allocation8 + $0x28] sm:$0xff]  }
 0x9b5   : > { %v3894_v38 = vpop.permute.xlu0 %3893 }
 0x9b6   : > { %v3348_v23 = vpack.c.bf16 %v3340_v52, %v3340_v52  ;;  %v3899_v55 = vsel %vm923_vm2, %v3894_v38, 0 }
 0x9b7   : > { %v6273_v27 = vpop.eup %6272 }
 0x9b8   : > { %5855 = vmatmul.mubr.msk.bf16.vlgmr.msra.gmra.mxu1 %vm1292_vm4, %v3348_v23  ;;  %v3342_v41 = vmul.f32 %v6273_v27, %v7447_v2  ;;  %v3999_v2 = vsel %vm923_vm2, %v3994_v43, 0 }
 0x9b9   : > { %5865 = vmatpush3.bf16.msra.mxu1 %v3646_v40  ;;  %5866 = vmatprep.mubr.msk.bf16.mxu1 %vm6511_vm1, %v6510_v4  ;;  %v3944_v3 = vpop.permute.xlu0 %3943 }
 0x9ba   : > { %5891 = vmatmul.mubr.msk.bf16.vlgmr.msra.gmra.mxu0 %vm923_vm2, %v3842_v9  ;;  %v3350_v10 = vpack.c.bf16 %v3342_v41, %v3342_v41  ;;  %5876 = vmatprep.subr.bf16.mxu1 %v6150_v7  ;;  %v3949_v53 = vsel %vm923_vm2, %v3944_v3, 0 }
 0x9bb   : > { %5895 = vmatpush3.bf16.xpose.msra.mxu0 %v3899_v55  ;;  %5896 = vmatprep.mubr.msk.bf16.mxu0 %vm6511_vm1, %v6510_v4 }
 0x9bc   : > { %5906 = vmatprep.subr.bf16.mxu0 %v6510_v4 }
 0x9bd   : > { %v3942_v43 = vpop.permute.xlu0 %3941 }
 0x9c0   : > { %5867 = vmatmul.mubr.msk.bf16.vlgmr.msra.gmra.mxu1 %vm1292_vm4, %v3350_v10 }
 0x9c1   : > { %5877 = vmatpush3.bf16.msra.mxu1 %v6150_v7  ;;  %v4044_v10 = vpop.permute.xlu0 %4043 }
 0x9c2   : > { %5897 = vmatmul.mubr.msk.bf16.vlgmr.msra.gmra.mxu0 %vm923_vm2, %v3892_v0  ;;  %5878 = vmatprep.subr.bf16.mxu1 %v6151_v18 }
 0x9c3   : > { %5907 = vmatpush3.bf16.xpose.msra.mxu0 %v3999_v2  ;;  %5908 = vmatprep.mubr.msk.bf16.mxu0 %vm6511_vm1, %v6510_v4 }
 0x9c4   : > { %5918 = vmatprep.subr.bf16.mxu0 %v6510_v4 }
 0x9c5   : > { %5879 = vmatpush3.bf16.msra.mxu1 %v6151_v18 }
 0x9c6   : > { %5900 = vmatprep.subr.bf16.mxu1 %v6510_v4 }
 0x9ca   : > { %5909 = vmatmul.mubr.msk.bf16.vlgmr.msra.gmra.mxu0 %vm923_vm2, %v3992_v56 }
 0x9cb   : > { %5919 = vmatpush3.bf16.xpose.msra.mxu0 %v4099_v26  ;;  %5920 = vmatprep.mubr.msk.bf16.mxu0 %vm6511_vm1, %v6510_v4 }
 0x9cc   : > { %5930 = vmatprep.subr.bf16.mxu0 %v6510_v4 }
 0x9d2   : > { %5921 = vmatmul.mubr.msk.bf16.vlgmr.msra.gmra.mxu0 %vm923_vm2, %v4092_v59 }
 0x9d3   : > { %5931 = vmatpush3.bf16.xpose.msra.mxu0 %v4199_v37  ;;  %5932 = vmatprep.mubr.msk.bf16.mxu0 %vm6511_vm1, %v6510_v4  ;;  %v4042_v37 = vpop.permute.xlu0 %4041 }
 0x9d4   : > { %5942 = vmatprep.subr.bf16.mxu0 %v6510_v4 }
 0x9da   : > { %5933 = vmatmul.mubr.msk.bf16.vlgmr.msra.gmra.mxu0 %vm923_vm2, %v4192_v60 }
 0x9db   : > { %5944 = vmatprep.mubr.msk.bf16.mxu0 %vm6511_vm1, %v6510_v4 }
 0xa3b   : > { %v3394_v61 = vpop.f32.mrf.mxu1 }
 0xa3c   : > { %v3736_v12 = vpack.c.bf16 %v7480_v8, %v3394_v61 }
 0xa3d   : > { %v5832_v46 = vpop.f32.mrf.mxu1 }
 0xa3e   : > { %5880 = vmatprep.mubr.msk.bf16.mxu1 %vm923_vm2, %v3736_v12 }
 0xa3f   : > { %v3397_v51 = vpop.f32.mrf.mxu1 }
 0xa40   : > { %v4144_v51 = vpop.permute.xlu0 %4143 }
 0xa41   : > { %v5833_v9 = vpop.f32.mrf.mxu1 }
 0xa43   : > { %v3490_v25 = vpop.f32.mrf.mxu1 }
 0xa44   : > { %v3737_v32 = vpack.c.bf16 %v7482_v39, %v3490_v25  ;;  %v4149_v25 = vsel %vm923_vm2, %v4144_v51, 0 }
 0xa45   : > { %v5844_v0 = vpop.f32.mrf.mxu1 }
 0xa46   : > { %5881 = vmatmul.mubr.msk.bf16.vlgmr.msra.gmra.mxu1 %vm923_vm2, %v3737_v32 }
 0xa47   : > { %5901 = vmatpush3.bf16.xpose.msra.mxu1 %v3949_v53  ;;  %v3493_v22 = vpop.f32.mrf.mxu1 }
 0xa48   : > { %5912 = vmatprep.subr.bf16.mxu1 %v6510_v4 }
 0xa49   : > { %v5845_v1 = vpop.f32.mrf.mxu1 }
 0xa4a   : > { %v4142_v1 = vpop.permute.xlu0 %4141 }
 0xa78   : > { %v3586_v8 = vpop.f32.mrf.mxu1 }
 0xa79   : > { %v3738_v44 = vpack.c.bf16 %v7484_v54, %v3586_v8 }
 0xa7a   : > { %v5856_v52 = vpop.f32.mrf.mxu1  ;;  %v7527_v16 = vpop.f32.mrf.mxu0 }
 0xa7b   : > { %5884 = vmatprep.mubr.msk.bf16.mxu1 %vm923_vm2, %v3738_v44  ;;  %v4241_v39 = vsel %vm1292_vm4, %v7527_v16, -inf }
 0xa7c   : > { %v3589_v23 = vpop.f32.mrf.mxu1  ;;  %4242 = vmax.xlane.f32.xlu0 %v4241_v39  ;;  %v5892_v27 = vpop.f32.mrf.mxu0 }
 0xa7d   : > { %v2834_v27 = vadd.f32 %v7304_v50, %v7344_v15  ;;  %v2829_v50 = vadd.f32 %v7315_v31, %v7356_v47 }
 0xa7e   : > { %v5857_v38 = vpop.f32.mrf.mxu1  ;;  %v3888_v40 = vpop.f32.mrf.mxu0 }
 0xa80   : > { %v3682_v41 = vpop.f32.mrf.mxu1  ;;  %v5893_v55 = vpop.f32.mrf.mxu0 }
 0xa81   : > { %v3739_v7 = vpack.c.bf16 %v7486_v28, %v3682_v41  ;;  %v4049_v28 = vsel %vm923_vm2, %v4044_v10, 0  ;;  %v2826_v41 = vadd.f32 %v7306_v21, %v7348_v48  ;;  %v2837_v10 = vadd.f32 %v7310_v62, %v7352_v30 }
 0xa82   : > { %v5868_v56 = vpop.f32.mrf.mxu1  ;;  %v3935_v54 = vpop.f32.mrf.mxu0 }
 0xa83   : > { %5885 = vmatmul.mubr.msk.bf16.gmra.mxu1 %vm923_vm2, %v3739_v7  ;;  %v4244_v18 = vsel %vm1292_vm4, %v3935_v54, -inf }
 0xa84   : > { %v3685_v2 = vpop.f32.mrf.mxu1  ;;  %4245 = vmax.xlane.f32.xlu1 %v4244_v18  ;;  %v5898_v34 = vpop.f32.mrf.mxu0  ;;  %5902 = vmatprep.mubr.msk.bf16.mxu1 %vm6511_vm1, %v6510_v4 }
 0xa86   : > { %v5869_v59 = vpop.f32.mrf.mxu1  ;;  %v3938_v26 = vpop.f32.mrf.mxu0 }
 0xa88   : > { %v5899_v36 = vpop.f32.mrf.mxu0 }
 0xa8a   : > { %v4035_v60 = vpop.f32.mrf.mxu0 }
 0xa8b   : > { %5903 = vmatmul.mubr.msk.bf16.vlgmr.msra.gmra.mxu1 %vm923_vm2, %v3942_v43  ;;  %v4250_v61 = vsel %vm1292_vm4, %v4035_v60, -inf }
 0xa8c   : > { %5913 = vmatpush3.bf16.xpose.msra.mxu1 %v4049_v28  ;;  %4251 = vmax.xlane.f32.xlu0 %v4250_v61  ;;  %v5910_v12 = vpop.f32.mrf.mxu0 }
 0xa8d   : > { %5914 = vmatprep.mubr.msk.bf16.mxu1 %vm6511_vm1, %v6510_v4  ;;  %5924 = vmatprep.subr.bf16.mxu1 %v6510_v4 }
 0xa8e   : > { %v4038_v46 = vpop.f32.mrf.mxu0 }
 0xa90   : > { %v5911_v9 = vpop.f32.mrf.mxu0 }
 0xa92   : > { %v4135_v3 = vpop.f32.mrf.mxu0 }
 0xa93   : > { %5915 = vmatmul.mubr.msk.bf16.vlgmr.msra.gmra.mxu1 %vm923_vm2, %v4042_v37  ;;  %v4256_v32 = vsel %vm1292_vm4, %v4135_v3, -inf }
 0xa94   : > { %5925 = vmatpush3.bf16.xpose.msra.mxu1 %v4149_v25  ;;  %4257 = vmax.xlane.f32.xlu1 %v4256_v32  ;;  %v5922_v0 = vpop.f32.mrf.mxu0 }
 0xa95   : > { %5926 = vmatprep.mubr.msk.bf16.mxu1 %vm6511_vm1, %v6510_v4  ;;  %5936 = vmatprep.subr.bf16.mxu1 %v6510_v4 }
 0xa96   : > { %v4138_v53 = vpop.f32.mrf.mxu0 }
 0xa97   : > { %v2850_v53 = vadd.f32 %v7317_v49, %v7358_v29 }
 0xa98   : > { %v5923_v22 = vpop.f32.mrf.mxu0 }
 0xa9a   : > { %v4235_v8 = vpop.f32.mrf.mxu0 }
 0xa9b   : > { %5927 = vmatmul.mubr.msk.bf16.vlgmr.msra.gmra.mxu1 %vm923_vm2, %v4142_v1  ;;  %v4262_v44 = vsel %vm1292_vm4, %v4235_v8, -inf  ;;  %v2842_v1 = vadd.f32 %v7319_v35, %v7362_v33 }
 0xa9c   : > { %4263 = vmax.xlane.f32.xlu1 %v4262_v44  ;;  %v5934_v52 = vpop.f32.mrf.mxu0  ;;  %5938 = vmatprep.mubr.msk.bf16.mxu1 %vm6511_vm1, %v6510_v4 }
 0xa9d   : > { %v2853_v52 = vadd.f32 %v7323_v19, %v7366_v13 }
 0xa9e   : > { %v4238_v39 = vpop.f32.mrf.mxu0 }
 0xaa0   : > { %v5935_v23 = vpop.f32.mrf.mxu0 }
 0xb05   : > { %v4243_v43 = vpop.xlane.xlu0 %4242 }
 0xb06   : > { %v4265_v38 = vsub.f32 %v7527_v16, %v4243_v43  ;;  %v5882_v40 = vpop.f32.mrf.mxu1 }
 0xb07   : > { %v7558_v55 = vadd.f32 %v5882_v40, %v2834_v27  ;;  %v2845_v27 = vadd.f32 %v7328_v17, %v7368_v14 }
 0xb08   : > { %v4273_v7 = vmul.f32 1.442695, %v4265_v38  ;;  %v3802_v56 = vpop.f32.mrf.mxu1 }
 0xb09   : > { %v7562_v18 = vadd.f32 %v3802_v56, %v2826_v41 }
 0xb0a   : > { %6274 = vpow2.f32 %v4273_v7  ;;  %v5883_v2 = vpop.f32.mrf.mxu1 }
 0xb0b   : > { %v7566_v15 = vadd.f32 %v5883_v2, %v2837_v10 }
 0xb0c   : > { %v3805_v16 = vpop.f32.mrf.mxu1 }
 0xb0d   : > { %v7568_v34 = vadd.f32 %v3805_v16, %v2829_v50  ;;  %v4246_v21 = vpop.xlane.xlu1 %4245 }
 0xb0e   : > { %v4266_v48 = vsub.f32 %v3935_v54, %v4246_v21 }
 0xb10   : > { %v4275_v59 = vmul.f32 1.442695, %v4266_v48 }
 0xb12   : > { %6276 = vpow2.f32 %v4275_v59 }
 0xb15   : > { %v4252_v26 = vpop.xlane.xlu0 %4251 }
 0xb16   : > { %v4268_v36 = vsub.f32 %v4035_v60, %v4252_v26 }
 0xb17   : > { %v7570_v37 = vpop.eup %6274 }
 0xb18   : > { %v4279_v62 = vmul.f32 1.442695, %v4268_v36  ;;  %v4289_v30 = vsel %vm1292_vm4, %v7570_v37, 0.0 }
 0xb19   : > { %4290 = vadd.xlane.f32.xlu0 %v4289_v30 }
 0xb1a   : > { %6278 = vpow2.f32 %v4279_v62 }
 0xb1d   : > { %v4258_v31 = vpop.xlane.xlu1 %4257 }
 0xb1e   : > { %v4270_v47 = vsub.f32 %v4135_v3, %v4258_v31 }
 0xb1f   : > { %v6277_v28 = vpop.eup %6276 }
 0xb20   : > { %v4283_v61 = vmul.f32 1.442695, %v4270_v47  ;;  %v4292_v12 = vsel %vm1292_vm4, %v6277_v28, 0.0 }
 0xb21   : > { %4293 = vadd.xlane.f32.xlu1 %v4292_v12 }
 0xb22   : > { %6280 = vpow2.f32 %v4283_v61 }
 0xb25   : > { %v4264_v54 = vpop.xlane.xlu1 %4263 }
 0xb26   : > { %v4272_v46 = vsub.f32 %v4235_v8, %v4264_v54 }
 0xb27   : > { %v7575_v51 = vpop.eup %6278 }
 0xb28   : > { %v4287_v60 = vmul.f32 1.442695, %v4272_v46  ;;  %v4298_v9 = vsel %vm1292_vm4, %v7575_v51, 0.0 }
 0xb29   : > { %4299 = vadd.xlane.f32.xlu1 %v4298_v9 }
 0xb2a   : > { %6282 = vpow2.f32 %v4287_v60 }
 0xb2f   : > { %v7579_v25 = vpop.eup %6280 }
 0xb30   : > { %v4304_v3 = vsel %vm1292_vm4, %v7579_v25, 0.0 }
 0xb31   : > { %4305 = vadd.xlane.f32.xlu1 %v4304_v3 }
 0xb37   : > { %v7583_v32 = vpop.eup %6282 }
 0xb38   : > { %v4310_v0 = vsel %vm1292_vm4, %v7583_v32, 0.0 }
 0xb39   : > { %4311 = vadd.xlane.f32.xlu1 %v4310_v0 }
 0xb43   : > { %v5886_v22 = vpop.f32.mrf.mxu1 }
 0xb44   : > { %v7591_v8 = vadd.f32 %v5886_v22, %v2850_v53 }
 0xb45   : > { %v3818_v44 = vpop.f32.mrf.mxu1 }
 0xb46   : > { %v7595_v39 = vadd.f32 %v3818_v44, %v2842_v1 }
 0xb47   : > { %v5887_v23 = vpop.f32.mrf.mxu1 }
 0xb48   : > { %v7599_v43 = vadd.f32 %v5887_v23, %v2853_v52 }
 0xb49   : > { %v3821_v38 = vpop.f32.mrf.mxu1 }
 0xb4a   : > { %v7601_v49 = vadd.f32 %v3821_v38, %v2845_v27  ;;  %4385 = vrot.lane.b32.xlu1 %v6873_v24, %s6514_s18 }
 0xb4b   : > { %v3985_v35 = vpop.f32.mrf.mxu1 }
 0xb4c   : > { %v4247_v29 = vsel %vm1292_vm4, %v3985_v35, -inf }
 0xb4d   : > { %v5904_v33 = vpop.f32.mrf.mxu1  ;;  %4248 = vmax.xlane.f32.xlu0 %v4247_v29 }
 0xb4e   : > { %4433 = vrot.lane.b32.xlu1 %v6970_v58, %s6514_s18 }
 0xb4f   : > { %v3988_v19 = vpop.f32.mrf.mxu1 }
 0xb51   : > { %v5905_v13 = vpop.f32.mrf.mxu1 }
 0xb52   : > { %4481 = vrot.lane.b32.xlu1 %v6986_v42, %s6514_s18 }
 0xb53   : > { %v7610_v17 = vpop.f32.mrf.mxu1 }
 0xb54   : > { %v4253_v14 = vsel %vm1292_vm4, %v7610_v17, -inf }
 0xb55   : > { %v5916_v40 = vpop.f32.mrf.mxu1  ;;  %4254 = vmax.xlane.f32.xlu0 %v4253_v14 }
 0xb56   : > { %4577 = vrot.lane.b32.xlu1 %v7008_v20, %s6514_s18 }
 0xb57   : > { %v4088_v24 = vpop.f32.mrf.mxu1 }
 0xb59   : > { %v5917_v41 = vpop.f32.mrf.mxu1 }
 0xb5a   : > { %4673 = vrot.lane.b32.xlu1 %v7026_v45, %s6514_s18 }
 0xb5b   : > { %v7618_v58 = vpop.f32.mrf.mxu1 }
 0xb5c   : > { %v4259_v42 = vsel %vm1292_vm4, %v7618_v58, -inf }
 0xb5d   : > { %v5928_v7 = vpop.f32.mrf.mxu1  ;;  %4260 = vmax.xlane.f32.xlu0 %v4259_v42 }
 0xb5f   : > { %v4188_v56 = vpop.f32.mrf.mxu1 }
 0xb60   : > { %v6153_v56 = vld [vmem:[#allocation8 + $0x30] sm:$0xff]  }
 0xb61   : > { %v5929_v10 = vpop.f32.mrf.mxu1 }
 0xb73   : > { %4337 = vrot.lane.b32.xlu0 %v6849_v11, %s6514_s18 }
 0xba2   : > { %v4291_v61 = vpop.xlane.xlu0 %4290 }
 0xbaa   : > { %v4294_v2 = vpop.xlane.xlu1 %4293 }
 0xbab   : > { %6284 = vrcp.f32 %v4294_v2 }
 0xbb2   : > { %v4300_v20 = vpop.xlane.xlu1 %4299 }
 0xbb3   : > { %6286 = vrcp.f32 %v4300_v20 }
 0xbb8   : > { %v6285_v16 = vpop.eup %6284 }
 0xbb9   : > { %v4322_v45 = vmul.f32 %v6285_v16, %v6277_v28 }
 0xbba   : > { %v4306_v50 = vpop.xlane.xlu1 %4305 }
 0xbbb   : > { %6288 = vrcp.f32 %v4306_v50  ;;  %v4330_v26 = vpack.c.bf16 %v4322_v45, %v4322_v45 }
 0xbc0   : > { %v6287_v36 = vpop.eup %6286 }
 0xbc1   : > { %v4324_v11 = vmul.f32 %v6287_v36, %v7575_v51 }
 0xbc2   : > { %v4312_v21 = vpop.xlane.xlu1 %4311 }
 0xbc3   : > { %6290 = vrcp.f32 %v4312_v21  ;;  %v4332_v47 = vpack.c.bf16 %v4324_v11, %v4324_v11 }
 0xbc4   : > { %6292 = vrcp.f32 %v4291_v61 }
 0xbc6   : > { %v4386_v48 = vpop.permute.xlu1 %4385 }
 0xbc7   : > { %v4391_v59 = vsel %vm1392_vm3, %v4386_v48, 0 }
 0xbc8   : > { %5943 = vmatpush3.bf16.msra.mxu0 %v4391_v59  ;;  %v6289_v28 = vpop.eup %6288 }
 0xbc9   : > { %5954 = vmatprep.subr.bf16.mxu0 %v6510_v4  ;;  %v4326_v46 = vmul.f32 %v6289_v28, %v7579_v25 }
 0xbca   : > { %v4434_v62 = vpop.permute.xlu1 %4433 }
 0xbcb   : > { %5945 = vmatmul.mubr.msk.bf16.vlgmr.msra.gmra.mxu0 %vm1292_vm4, %v4330_v26  ;;  %v4334_v3 = vpack.c.bf16 %v4326_v46, %v4326_v46 }
 0xbcc   : > { %5956 = vmatprep.mubr.msk.bf16.mxu0 %vm6511_vm1, %v6510_v4 }
 0xbce   : > { %v4482_v30 = vpop.permute.xlu1 %4481 }
 0xbcf   : > { %v4487_v31 = vsel %vm1392_vm3, %v4482_v30, 0 }
 0xbd0   : > { %5955 = vmatpush3.bf16.msra.mxu0 %v4487_v31  ;;  %v6291_v53 = vpop.eup %6290 }
 0xbd1   : > { %5966 = vmatprep.subr.bf16.mxu0 %v6510_v4  ;;  %v4328_v25 = vmul.f32 %v6291_v53, %v7583_v32  ;;  %v6293_v52 = vpop.eup %6292  ;;  %v4439_v32 = vsel %vm1392_vm3, %v4434_v62, 0 }
 0xbd2   : > { %v4578_v12 = vpop.permute.xlu1 %4577  ;;  %v4321_v38 = vmul.f32 %v6293_v52, %v7570_v37 }
 0xbd3   : > { %v4583_v54 = vsel %vm1392_vm3, %v4578_v12, 0  ;;  %5957 = vmatmul.mubr.msk.bf16.vlgmr.msra.gmra.mxu0 %vm1292_vm4, %v4332_v47  ;;  %v4336_v1 = vpack.c.bf16 %v4328_v25, %v4328_v25 }
 0xbd4   : > { %5967 = vmatpush3.bf16.msra.mxu0 %v4583_v54  ;;  %5968 = vmatprep.mubr.msk.bf16.mxu0 %vm6511_vm1, %v6510_v4  ;;  %v4329_v19 = vpack.c.bf16 %v4321_v38, %v4321_v38  ;;  %v6154_v38 = vld [vmem:[#allocation10 + $0x38] sm:$0xff]  }
 0xbd5   : > { %5978 = vmatprep.subr.bf16.mxu0 %v6510_v4 }
 0xbd6   : > { %v4249_v51 = vpop.xlane.xlu0 %4248  ;;  %v4674_v9 = vpop.permute.xlu1 %4673 }
 0xbd7   : > { %v4267_v60 = vsub.f32 %v3985_v35, %v4249_v51  ;;  %v4679_v22 = vsel %vm1392_vm3, %v4674_v9, 0 }
 0xbd9   : > { %v4277_v0 = vmul.f32 1.442695, %v4267_v60 }
 0xbdb   : > { %6294 = vpow2.f32 %v4277_v0  ;;  %5969 = vmatmul.mubr.msk.bf16.vlgmr.msra.gmra.mxu0 %vm1292_vm4, %v4334_v3 }
 0xbdc   : > { %5979 = vmatpush3.bf16.msra.mxu0 %v4679_v22  ;;  %5980 = vmatprep.mubr.msk.bf16.mxu0 %vm6511_vm1, %v6510_v4 }
 0xbde   : > { %v4255_v44 = vpop.xlane.xlu0 %4254 }
 0xbdf   : > { %v4269_v37 = vsub.f32 %v7610_v17, %v4255_v44 }
 0xbe1   : > { %v4281_v13 = vmul.f32 1.442695, %v4269_v37  ;;  %v6156_v37 = vld [vmem:[#allocation10 + $0x28] sm:$0xff]  }
 0xbe3   : > { %5981 = vmatmul.mubr.msk.bf16.vlgmr.msra.gmra.mxu0 %vm1292_vm4, %v4336_v1  ;;  %6296 = vpow2.f32 %v4281_v13 }
 0xbe6   : > { %v4261_v23 = vpop.xlane.xlu0 %4260 }
 0xbe7   : > { %v4271_v14 = vsub.f32 %v7618_v58, %v4261_v23 }
 0xbe8   : > { %v6295_v27 = vpop.eup %6294 }
 0xbe9   : > { %v4295_v35 = vsel %vm1292_vm4, %v6295_v27, 0.0  ;;  %v4285_v40 = vmul.f32 1.442695, %v4271_v14  ;;  %v6158_v14 = vld [vmem:[#allocation10 + $0x18] sm:$0xff]  }
 0xbea   : > { %4296 = vadd.xlane.f32.xlu0 %v4295_v35  ;;  %v4338_v29 = vpop.permute.xlu0 %4337 }
 0xbeb   : > { %v4343_v33 = vsel %vm1392_vm3, %v4338_v29, 0  ;;  %6298 = vpow2.f32 %v4285_v40 }
 0xbec   : > { %5937 = vmatpush3.bf16.msra.mxu1 %v4343_v33  ;;  %v6155_v33 = vld [vmem:[#allocation10 + $0x30] sm:$0xff]  }
 0xbed   : > { %5948 = vmatprep.subr.bf16.mxu1 %v6510_v4 }
 0xbef   : > { %5939 = vmatmul.mubr.msk.bf16.vlgmr.msra.gmra.mxu1 %vm1292_vm4, %v4329_v19 }
 0xbf0   : > { %5949 = vmatpush3.bf16.msra.mxu1 %v4439_v32  ;;  %5950 = vmatprep.mubr.msk.bf16.mxu1 %vm6511_vm1, %v6510_v4  ;;  %v6297_v24 = vpop.eup %6296 }
 0xbf1   : > { %5960 = vmatprep.subr.bf16.mxu1 %v6510_v4  ;;  %v4301_v41 = vsel %vm1292_vm4, %v6297_v24, 0.0 }
 0xbf8   : > { %v6299_v42 = vpop.eup %6298 }
 0xbf9   : > { %v4307_v7 = vsel %vm1292_vm4, %v6299_v42, 0.0 }
 0xc00   : > { %4529 = vrot.lane.b32.xlu0 %v6981_v63, %s6514_s18  ;;  %v6152_v63 = vld [vmem:[#allocation8 + $0x38] sm:$0xff]  }
 0xc01   : > { %5984 = vmatprep.subr.bf16.mxu0 %v6152_v63 }
 0xc02   : > { %5985 = vmatpush3.bf16.msra.mxu0 %v6152_v63 }
 0xc03   : > { %5986 = vmatprep.subr.bf16.mxu0 %v6153_v56 }
 0xc06   : > { %5987 = vmatpush3.bf16.msra.mxu0 %v6153_v56 }
 0xc07   : > { %5996 = vmatprep.subr.bf16.mxu0 %v6154_v38 }
 0xc1f   : > { %4302 = vadd.xlane.f32.xlu0 %v4301_v41 }
 0xc23   : > { %4308 = vadd.xlane.f32.xlu0 %v4307_v7 }
 0xc39   : > { %4625 = vrot.lane.b32.xlu0 %v7004_v57, %s6514_s18 }
 0xc73   : > { %v4297_v17 = vpop.xlane.xlu0 %4296 }
 0xc74   : > { %6300 = vrcp.f32 %v4297_v17 }
 0xc77   : > { %v4530_v2 = vpop.permute.xlu0 %4529 }
 0xc78   : > { %v4535_v50 = vsel %vm1392_vm3, %v4530_v2, 0  ;;  %v6159_v2 = vld [vmem:[#allocation10 + $0x10] sm:$0xff]  }
 0xc81   : > { %v6301_v58 = vpop.eup %6300 }
 0xc82   : > { %v4323_v10 = vmul.f32 %v6301_v58, %v6295_v27 }
 0xc84   : > { %v4331_v20 = vpack.c.bf16 %v4323_v10, %v4323_v10 }
 0xc86   : > { %5951 = vmatmul.mubr.msk.bf16.vlgmr.msra.gmra.mxu1 %vm1292_vm4, %v4331_v20  ;;  %v6160_v20 = vld [vmem:[#allocation10 + $0x8] sm:$0xff]  }
 0xc87   : > { %5961 = vmatpush3.bf16.msra.mxu1 %v4535_v50  ;;  %5962 = vmatprep.mubr.msk.bf16.mxu1 %vm6511_vm1, %v6510_v4  ;;  %v6161_v50 = vld [vmem:[#allocation10] sm:$0xff]  }
 0xc88   : > { %5972 = vmatprep.subr.bf16.mxu1 %v6510_v4 }
 0xc8b   : > { %v4427_v57 = vpop.f32.mrf.mxu0 }
 0xc8d   : > { %v5946_v16 = vpop.f32.mrf.mxu0 }
 0xc8f   : > { %v4430_v21 = vpop.f32.mrf.mxu0 }
 0xc91   : > { %v5947_v45 = vpop.f32.mrf.mxu0 }
 0xc92   : > { %v5334_v45 = vld [vmem:[%s7720_s6] ss:$0 sm:$0xff] }
 0xc93   : > { %v4523_v48 = vpop.f32.mrf.mxu0 }
 0xc95   : > { %v5958_v59 = vpop.f32.mrf.mxu0 }
 0xc97   : > { %v4526_v26 = vpop.f32.mrf.mxu0 }
 0xc99   : > { %v5959_v36 = vpop.f32.mrf.mxu0 }
 0xc9b   : > { %v4619_v62 = vpop.f32.mrf.mxu0 }
 0xc9d   : > { %v5970_v11 = vpop.f32.mrf.mxu0 }
 0xc9f   : > { %v4622_v30 = vpop.f32.mrf.mxu0 }
 0xca1   : > { %v5971_v31 = vpop.f32.mrf.mxu0 }
 0xca3   : > { %v4715_v47 = vpop.f32.mrf.mxu0 }
 0xca5   : > { %v5982_v28 = vpop.f32.mrf.mxu0 }
 0xca7   : > { %v4718_v61 = vpop.f32.mrf.mxu0 }
 0xca8   : > { %v4303_v12 = vpop.xlane.xlu0 %4302 }
 0xca9   : > { %6302 = vrcp.f32 %v4303_v12  ;;  %v5983_v54 = vpop.f32.mrf.mxu0 }
 0xcac   : > { %v4309_v46 = vpop.xlane.xlu0 %4308 }
 0xcad   : > { %6304 = vrcp.f32 %v4309_v46 }
 0xcaf   : > { %v4379_v51 = vpop.f32.mrf.mxu1 }
 0xcb0   : > { %v4721_v60 = vpack.c.bf16 %v4427_v57, %v4379_v51  ;;  %v4626_v25 = vpop.permute.xlu0 %4625 }
 0xcb1   : > { %v5940_v9 = vpop.f32.mrf.mxu1  ;;  %v4631_v52 = vsel %vm1392_vm3, %v4626_v25, 0 }
 0xcb2   : > { %5988 = vmatprep.mubr.msk.bf16.mxu0 %vm923_vm2, %v4721_v60 }
 0xcb3   : > { %v4382_v3 = vpop.f32.mrf.mxu1 }
 0xcb5   : > { %v5941_v0 = vpop.f32.mrf.mxu1 }
 0xcb6   : > { %v6303_v53 = vpop.eup %6302 }
 0xcb7   : > { %v4325_v22 = vmul.f32 %v6303_v53, %v6297_v24 }
 0xcb9   : > { %v4333_v1 = vpack.c.bf16 %v4325_v22, %v4325_v22 }
 0xcba   : > { %v6305_v44 = vpop.eup %6304 }
 0xcbb   : > { %5963 = vmatmul.mubr.msk.bf16.vlgmr.msra.gmra.mxu1 %vm1292_vm4, %v4333_v1  ;;  %v4327_v23 = vmul.f32 %v6305_v44, %v6299_v42 }
 0xcbc   : > { %5973 = vmatpush3.bf16.msra.mxu1 %v4631_v52  ;;  %5974 = vmatprep.mubr.msk.bf16.mxu1 %vm6511_vm1, %v6510_v4  ;;  %v6157_v4 = vld [vmem:[#allocation10 + $0x20] sm:$0xff]  }
 0xcbd   : > { %v4335_v27 = vpack.c.bf16 %v4327_v23, %v4327_v23 }
 0xcc3   : > { %5975 = vmatmul.mubr.msk.bf16.vlgmr.msra.gmra.mxu1 %vm1292_vm4, %v4335_v27  ;;  %v5344_v27 = vld [vmem:[%s7723_s9] ss:$0 sm:$0xff] }
 0xd46   : > { %v4475_v35 = vpop.f32.mrf.mxu1 }
 0xd47   : > { %v4722_v29 = vpack.c.bf16 %v4523_v48, %v4475_v35 }
 0xd48   : > { %v5952_v19 = vpop.f32.mrf.mxu1 }
 0xd49   : > { %5989 = vmatmul.mubr.msk.bf16.vlgmr.msra.gmra.mxu0 %vm923_vm2, %v4722_v29 }
 0xd4a   : > { %v4478_v32 = vpop.f32.mrf.mxu1  ;;  %5997 = vmatpush3.bf16.msra.mxu0 %v6154_v38 }
 0xd4b   : > { %5998 = vmatprep.subr.bf16.mxu0 %v6155_v33 }
 0xd4c   : > { %v5953_v13 = vpop.f32.mrf.mxu1 }
 0xd4e   : > { %5999 = vmatpush3.bf16.msra.mxu0 %v6155_v33 }
 0xd4f   : > { %6000 = vmatprep.subr.bf16.mxu0 %v6156_v37 }
 0xd52   : > { %6001 = vmatpush3.bf16.msra.mxu0 %v6156_v37 }
 0xd53   : > { %6002 = vmatprep.subr.bf16.mxu0 %v6157_v4 }
 0xd56   : > { %6003 = vmatpush3.bf16.msra.mxu0 %v6157_v4 }
 0xd57   : > { %6004 = vmatprep.subr.bf16.mxu0 %v6158_v14 }
 0xd5a   : > { %6005 = vmatpush3.bf16.msra.mxu0 %v6158_v14 }
 0xd5b   : > { %6006 = vmatprep.subr.bf16.mxu0 %v6159_v2 }
 0xd5e   : > { %6007 = vmatpush3.bf16.msra.mxu0 %v6159_v2 }
 0xd5f   : > { %6008 = vmatprep.subr.bf16.mxu0 %v6160_v20 }
 0xd62   : > { %6009 = vmatpush3.bf16.msra.mxu0 %v6160_v20 }
 0xd63   : > { %6010 = vmatprep.subr.bf16.mxu0 %v6161_v50 }
 0xd66   : > { %6011 = vmatpush3.bf16.msra.mxu0 %v6161_v50 }
 0xd7b   : > { %v4571_v40 = vpop.f32.mrf.mxu1 }
 0xd7c   : > { %v4723_v24 = vpack.c.bf16 %v4619_v62, %v4571_v40 }
 0xd7d   : > { %v5964_v41 = vpop.f32.mrf.mxu1 }
 0xd7e   : > { %5992 = vmatprep.mubr.msk.bf16.mxu0 %vm923_vm2, %v4723_v24 }
 0xd7f   : > { %v4574_v42 = vpop.f32.mrf.mxu1 }
 0xd81   : > { %v5965_v7 = vpop.f32.mrf.mxu1 }
 0xd83   : > { %v4667_v63 = vpop.f32.mrf.mxu1 }
 0xd84   : > { %v4724_v56 = vpack.c.bf16 %v4715_v47, %v4667_v63 }
 0xd85   : > { %v5976_v17 = vpop.f32.mrf.mxu1 }
 0xd86   : > { %5993 = vmatmul.mubr.msk.bf16.gmra.mxu0 %vm923_vm2, %v4724_v56 }
 0xd87   : > { %v4670_v58 = vpop.f32.mrf.mxu1 }
 0xd89   : > { %v5977_v10 = vpop.f32.mrf.mxu1 }
 0xe09   : > { %v5990_v57 = vpop.f32.mrf.mxu0 }
 0xe0a   : > { %v4820_v21 = vadd.f32 %v5990_v57, %v7558_v55 }
 0xe0b   : > { %v4787_v16 = vpop.f32.mrf.mxu0 }
 0xe0c   : > { %v4818_v59 = vadd.f32 %v4787_v16, %v7562_v18  ;;  %v4835_v62 = vadd.f32 %v5334_v45, %v4820_v21  ;;  %v5345_v16 = vld [vmem:[#allocation2] ss:$0 sm:$0xff] }
 0xe0d   : > { %v5991_v48 = vpop.f32.mrf.mxu0 }
 0xe0e   : > { %v4821_v26 = vadd.f32 %v5991_v48, %v7566_v15  ;;  %v4833_v31 = vadd.f32 %v5334_v45, %v4818_v59 }
 0xe0f   : > { %v4790_v36 = vpop.f32.mrf.mxu0 }
 0xe10   : > { %v4836_v11 = vadd.f32 %v5334_v45, %v4821_v26  ;;  %v4819_v30 = vadd.f32 %v4790_v36, %v7568_v34  ;;  %v5047_v36 = vand.u32 127, %v618_v5 }
 0xe12   : > { %v4842_v47 = vpack.c.bf16 %v4836_v11, %v4835_v62  ;;  %v4834_v28 = vadd.f32 %v5334_v45, %v4819_v30  ;;  %v5050_v30 = vsub.s32 %v5047_v36, %v6740_v6 }
 0xe14   : > { %v4841_v61 = vpack.c.bf16 %v4834_v28, %v4833_v31 }
 0xe16   : > { %6012 = vmatprep.mubr.bf16.mxu0 %v4841_v61 }
 0xe17   : > { %6013 = vmatmul.mubr.bf16.vlgmr.msra.gmra.mxu0 %v4842_v47 }
 0xe46   : > { %v5994_v55 = vpop.f32.mrf.mxu0 }
 0xe47   : > { %v4824_v54 = vadd.f32 %v5994_v55, %v7591_v8  ;;  %v5335_v8 = vld [vmem:[%s7722_s8] ss:$0 sm:$0xff] }
 0xe48   : > { %v4803_v12 = vpop.f32.mrf.mxu0 }
 0xe49   : > { %v4822_v18 = vadd.f32 %v4803_v12, %v7595_v39  ;;  %v4839_v60 = vadd.f32 %v5334_v45, %v4824_v54 }
 0xe4a   : > { %v5995_v46 = vpop.f32.mrf.mxu0 }
 0xe4b   : > { %v4825_v15 = vadd.f32 %v5995_v46, %v7599_v43  ;;  %v4837_v3 = vadd.f32 %v5334_v45, %v4822_v18 }
 0xe4c   : > { %v4806_v51 = vpop.f32.mrf.mxu0 }
 0xe4d   : > { %v4840_v9 = vadd.f32 %v5334_v45, %v4825_v15  ;;  %v4823_v34 = vadd.f32 %v4806_v51, %v7601_v49 }
 0xe4f   : > { %v4844_v0 = vpack.c.bf16 %v4840_v9, %v4839_v60  ;;  %v4838_v53 = vadd.f32 %v5334_v45, %v4823_v34 }
 0xe51   : > { %v4843_v22 = vpack.c.bf16 %v4838_v53, %v4837_v3 }
 0xe53   : > { %6016 = vmatprep.mubr.bf16.mxu0 %v4843_v22 }
 0xe54   : > { %6017 = vmatmul.mubr.bf16.gmra.mxu0 %v4844_v0 }
 0xed7   : > { %v6014_v25 = vpop.f32.mrf.mxu0 }
 0xed8   : > { %v4959_v1 = vadd.f32 %v6014_v25, %v5335_v8 }
 0xed9   : > { %v4950_v39 = vpop.f32.mrf.mxu0 }
 0xeda   : > { %6306 = vtanh.f32 %v4959_v1  ;;  %v4951_v43 = vadd.f32 %v5335_v8, %v4950_v39 }
 0xedb   : > { %v6015_v44 = vpop.f32.mrf.mxu0 }
 0xedc   : > { %6308 = vtanh.f32 %v4951_v43  ;;  %v4962_v52 = vadd.f32 %v6015_v44, %v5335_v8 }
 0xedd   : > { %v4953_v23 = vpop.f32.mrf.mxu0 }
 0xede   : > { %v4954_v49 = vadd.f32 %v5335_v8, %v4953_v23  ;;  %6310 = vtanh.f32 %v4962_v52 }
 0xee0   : > { %6312 = vtanh.f32 %v4954_v49 }
 0xee7   : > { %v6307_v38 = vpop.eup %6306 }
 0xee8   : > { %v4998_v35 = vmul.f32 %v6307_v38, %v5344_v27 }
 0xee9   : > { %v6309_v29 = vpop.eup %6308 }
 0xeea   : > { %5008 = vadd.xlane.f32.xlu0 %v4998_v35  ;;  %v4996_v19 = vmul.f32 %v6309_v29, %v5344_v27 }
 0xeeb   : > { %v6311_v33 = vpop.eup %6310 }
 0xeec   : > { %v4999_v13 = vmul.f32 %v6311_v33, %v5344_v27 }
 0xeed   : > { %v6313_v32 = vpop.eup %6312 }
 0xeee   : > { %5004 = vadd.xlane.f32.xlu0 %v4996_v19  ;;  %v4997_v37 = vmul.f32 %v6313_v32, %v5344_v27 }
 0xef0   : > { %5006 = vadd.xlane.f32.xlu1 %v4997_v37 }
 0xef2   : > { %5010 = vadd.xlane.f32.xlu0 %v4999_v13 }
 0xf14   : > { %v6018_v4 = vpop.f32.mrf.mxu0 }
 0xf15   : > { %v4975_v14 = vadd.f32 %v6018_v4, %v5335_v8 }
 0xf16   : > { %v4966_v40 = vpop.f32.mrf.mxu0 }
 0xf17   : > { %6314 = vtanh.f32 %v4975_v14  ;;  %v4967_v24 = vadd.f32 %v5335_v8, %v4966_v40 }
 0xf18   : > { %v6019_v41 = vpop.f32.mrf.mxu0 }
 0xf19   : > { %6316 = vtanh.f32 %v4967_v24  ;;  %v4978_v7 = vadd.f32 %v6019_v41, %v5335_v8 }
 0xf1a   : > { %v4969_v42 = vpop.f32.mrf.mxu0 }
 0xf1b   : > { %v4970_v63 = vadd.f32 %v5335_v8, %v4969_v42 }
 0xf1d   : > { %6318 = vtanh.f32 %v4970_v63 }
 0xf1e   : > { %6320 = vtanh.f32 %v4978_v7 }
 0xf24   : > { %v6315_v56 = vpop.eup %6314 }
 0xf25   : > { %v5002_v17 = vmul.f32 %v6315_v56, %v5344_v27 }
 0xf26   : > { %v6317_v58 = vpop.eup %6316 }
 0xf27   : > { %5016 = vadd.xlane.f32.xlu0 %v5002_v17  ;;  %v5000_v10 = vmul.f32 %v6317_v58, %v5344_v27 }
 0xf2a   : > { %v6319_v2 = vpop.eup %6318 }
 0xf2b   : > { %5012 = vadd.xlane.f32.xlu0 %v5000_v10  ;;  %v5001_v20 = vmul.f32 %v6319_v2, %v5344_v27  ;;  %v6321_v50 = vpop.eup %6320 }
 0xf2c   : > { %v5003_v57 = vmul.f32 %v6321_v50, %v5344_v27 }
 0xf2d   : > { %5014 = vadd.xlane.f32.xlu1 %v5001_v20 }
 0xf31   : > { %5018 = vadd.xlane.f32.xlu1 %v5003_v57 }
 0xf41   : > { %5027 = vperm.xlu0 %6112, %v5345_v16  }
 0xf73   : > { %v5009_v21 = vpop.xlane.xlu0 %5008 }
 0xf77   : > { %v5005_v45 = vpop.xlane.xlu0 %5004 }
 0xf79   : > { %v5007_v26 = vpop.xlane.xlu1 %5006 }
 0xf7b   : > { %v5011_v48 = vpop.xlane.xlu0 %5010 }
 0xfb0   : > { %v5017_v59 = vpop.xlane.xlu0 %5016 }
 0xfb4   : > { %v5013_v62 = vpop.xlane.xlu0 %5012 }
 0xfb6   : > { %v5015_v11 = vpop.xlane.xlu1 %5014 }
 0xfba   : > { %v5019_v51 = vpop.xlane.xlu1 %5018 }
 0xfbc   : > { %v5028_v31 = vpop.permute.xlu0 %5027 }
 0xfbd   : > { %v5030_v47 = vadd.f32 %v5028_v31, %v5005_v45  ;;  %v5031_v28 = vadd.f32 %v5028_v31, %v5007_v26  ;;  %v5032_v61 = vadd.f32 %v5028_v31, %v5009_v21  ;;  %v5033_v55 = vadd.f32 %v5028_v31, %v5011_v48 }
 0xfbe   : > { %v5034_v12 = vadd.f32 %v5028_v31, %v5013_v62  ;;  %v5035_v54 = vadd.f32 %v5028_v31, %v5015_v11  ;;  %v5036_v5 = vadd.f32 %v5028_v31, %v5017_v59  ;;  %v5037_v60 = vadd.f32 %v5028_v31, %v5019_v51 }
 0xfbf   : > { %v5051_v46 = vrot.slane %v5030_v47, %v5050_v30  ;;  %v5055_v18 = vrot.slane %v5031_v28, %v5050_v30  ;;  %v5059_v15 = vrot.slane %v5032_v61, %v5050_v30  ;;  %v5063_v9 = vrot.slane %v5033_v55, %v5050_v30 }
 0xfc0   : > { %v5067_v34 = vrot.slane %v5034_v12, %v5050_v30  ;;  %v5071_v0 = vrot.slane %v5035_v54, %v5050_v30  ;;  %v5075_v22 = vrot.slane %v5036_v5, %v5050_v30  ;;  %v5079_v25 = vrot.slane %v5037_v60, %v5050_v30 }
 0xfc1   : > { %v5081_v6 = vsel %vm5080_vm5, %v5055_v18, %v5051_v46 }
 0xfc2   : > { %v5083_v3 = vsel %vm5082_vm6, %v5059_v15, %v5081_v6 }
 0xfc3   : > { %v5085_v53 = vsel %vm5084_vm7, %v5063_v9, %v5083_v3 }
 0xfc4   : > { %v5087_v8 = vsel %vm5086_vm8, %v5067_v34, %v5085_v53 }
 0xfc5   : > { %v5089_v1 = vsel %vm5088_vm9, %v5071_v0, %v5087_v8 }
 0xfc6   : > { %v5091_v39 = vsel %vm5090_vm10, %v5075_v22, %v5089_v1 }
 0xfc7   : > { %v5093_v43 = vsel %vm5092_vm11, %v5079_v25, %v5091_v39 }
 0xfc8   : > { %5095 = vst.msk [vmem:[%s465_s24] sm:$0xff] %vm1292_vm4, %v5093_v43 }
 0xfc9 PF: > { %p25_p8 = scmp.ge.s32.totalorder %s6665_s25, 4   ;;  %s7739_s19 = smov %s6488_s20 }
 0xfca   : > { %s7740_s20 = smov %s6492_s21  ;;  %s7741_s21 = smov %s6676_s30 }
 0xfcb   : > { %s7742_s22 = smov %s6665_s25  ;;  %27 = sbr.rel (!%p25_p8) target bundleno = 8 (0x8), region = 120 }
 0xfd0   :  { %5115 = vsyncpa [#allocation4], 1 }
 0xfd1   :  { %5117 = vsyncpa [#allocation4 + $0x1], 1 }
 0xfd2   :  { %5118 = vsyncpa [#allocation6], 1 }
 0xfd3   :  { %5119 = vsyncpa [#allocation9], 1 }

</bundles_post_ra>
